<compile_context>
chip_gen: v6e
topology: v6e:2x2x1
jax: 0.10.0
libtpu: 0.0.40
codegen_flags: <defaults>
</compile_context>

<pallas_src>
import functools

import jax
import jax.numpy as jnp
import numpy as np
from jax.experimental import pallas as pl
from jax.experimental.pallas import tpu as pltpu


# ---------------------------------------------------------------------------
# Host-side parameter re-layout (tiny, runs once under jit).
# ---------------------------------------------------------------------------
def _dw_tap_weights(wdw, W, H, cpp):
    """(3,3,Cin) depthwise taps -> (9, H, W*cpp) lane/row-tiled tap weights.

    Channels are zero-padded to `cpp` per pixel.  Lanes of wrapped columns
    (dx=0 @ w=0, dx=2 @ w=W-1) and rows of wrapped H edges (dy=0 @ h=0,
    dy=2 @ h=H-1) are zeroed, so the in-kernel rolls need no masks.
    """
    C = wdw.shape[-1]
    w_pad = jnp.zeros((3, 3, cpp), wdw.dtype).at[:, :, :C].set(wdw)
    taps = []
    for dy in range(3):
        for dx in range(3):
            lane = jnp.tile(w_pad[dy, dx], W)                # (W*cpp,)
            if dx == 0:
                lane = lane.at[:cpp].set(0.0)
            elif dx == 2:
                lane = lane.at[W * cpp - cpp:].set(0.0)
            t = jnp.broadcast_to(lane[None, :], (H, W * cpp))
            if dy == 0:
                t = t.at[0, :].set(0.0)
            elif dy == 2:
                t = t.at[H - 1, :].set(0.0)
            taps.append(t)
    return jnp.stack(taps, axis=0)                            # (9, H, W*cpp)


def _block_diag_pw(wp, W, cin_pad, cout_pad):
    """(Cin, Cout) pointwise weight -> block-diagonal (W*cin_pad, W*cout_pad)."""
    Cin, Cout = wp.shape
    wp_p = jnp.zeros((cin_pad, cout_pad), wp.dtype).at[:Cin, :Cout].set(wp)
    eye = jnp.eye(W, dtype=wp.dtype)
    blk = eye[:, None, :, None] * wp_p[None, :, None, :]      # (W,cin,W,cout)
    return blk.reshape(W * cin_pad, W * cout_pad)


def _fused_bias(db, wp, pb, W, cout_pad):
    """Fold depthwise bias into pointwise bias: tile(db @ Wp + pb) over W."""
    fb = db @ wp + pb                                         # (Cout,)
    Cout = fb.shape[0]
    fb_p = jnp.zeros((cout_pad,), fb.dtype).at[:Cout].set(fb)
    return jnp.tile(fb_p, W)[None, :]                         # (1, W*cout_pad)


# ---------------------------------------------------------------------------
# Fused kernel: (adjacency mix -> SepConv) x 2, whole batch in one step.
# ---------------------------------------------------------------------------
def _stage(a_ref, x, dw_ref, pw_ref, pb_ref, *, B, N, cpp):
    """One GCN stage: A-mix + depthwise 3x3 + pointwise 1x1 (lane-dense)."""
    _, _, H, wc_in = x.shape
    wc_out = pw_ref.shape[1]

    # Adjacency message passing (A shared over batch): y[b,m] = sum_n A[m,n]*x[b,n].
    # N is tiny, so scalar(SMEM)-times-tile VPU sums beat an MXU call.
    mixed = []
    for b in range(B):
        for m in range(N):
            s = a_ref[m, 0] * x[b, 0]
            for n in range(1, N):
                s = s + a_ref[m, n] * x[b, n]
            mixed.append(s)
    y = jnp.stack(mixed, axis=0)                              # (B*N, H, wc_in)
    # TODO(synk): F.dropout2d (p=0.5, functional default training=True) is
    # stochastic with torch RNG; implemented as identity (eval-mode).

    # Depthwise 3x3 entirely in vregs: dy taps via sublane roll (axis=1),
    # dx taps via lane roll by +-cpp (axis=2).  Wrapped edges are already
    # zeroed in the host-built per-tap (H, wc) weights.
    acc = jnp.zeros_like(y)
    for dy in range(3):
        sh = (1 - dy) % H
        rows = y if sh == 0 else pltpu.roll(y, shift=sh, axis=1)
        for dx in range(3):
            shl = ((1 - dx) * cpp) % wc_in
            v = rows if shl == 0 else pltpu.roll(rows, shift=shl, axis=2)
            acc = acc + v * dw_ref[3 * dy + dx][None]         # (1,H,wc) bcast

    # Pointwise 1x1 (+ fused depthwise/pointwise bias): one full 128-row MXU
    # matmul over all B*N*H rows with the bf16 block-diagonal weight.
    out = jnp.dot(acc.reshape(B * N * H, wc_in).astype(jnp.bfloat16),
                  pw_ref[...], preferred_element_type=jnp.float32)
    out = out + pb_ref[...]
    return out.reshape(B, N, H, wc_out)


def _gcn_fused_kernel(a_ref, x_ref,
                      dw1_ref, pw1_ref, pb1_ref,
                      dw2_ref, pw2_ref, pb2_ref,
                      o_ref, *, B, N, cpp):
    x = x_ref[...]                                            # (B, N, H, W*cpp)
    y1 = _stage(a_ref, x, dw1_ref, pw1_ref, pb1_ref, B=B, N=N, cpp=cpp)
    y2 = _stage(a_ref, y1, dw2_ref, pw2_ref, pb2_ref, B=B, N=N, cpp=cpp)
    o_ref[...] = y2                                           # (B, N, H, W*cpp)


# ---------------------------------------------------------------------------
# ConvBasedGCN.forward (dynamic=False): A provided as (N, N), shared over batch.
# ---------------------------------------------------------------------------
def conv_based_gcn_forward(x, A, params):
    # x: (B, N, C, H, W) float32;  A: (N, N) float32
    B, N, C, H, W = x.shape
    mid = params["pw1"].shape[1]
    out_ch = params["pw2"].shape[1]
    cpp = max(C, mid, out_ch)          # uniform channels-per-pixel (lane-dense)
    wc = W * cpp                       # = 128 for the test shapes

    # Single NCHW -> channel-last transpose, zero-pad channels to cpp, flatten
    # W into the lane axis.
    x2 = jnp.transpose(x, (0, 1, 3, 4, 2))                    # (B,N,H,W,C)
    x2 = jnp.pad(x2, ((0, 0), (0, 0), (0, 0), (0, 0), (0, cpp - C)))
    x2 = x2.reshape(B, N, H, wc)

    # Host parameter re-layout: per-tap depthwise weights with fused edge
    # masks, block-diagonal bf16 pointwise weights, fused biases.
    dw1 = _dw_tap_weights(params["dw1"], W, H, cpp)
    pw1 = _block_diag_pw(params["pw1"], W, cpp, cpp).astype(jnp.bfloat16)
    pb1 = _fused_bias(params["db1"], params["pw1"], params["pb1"], W, cpp)
    dw2 = _dw_tap_weights(params["dw2"], W, H, cpp)
    pw2 = _block_diag_pw(params["pw2"], W, cpp, cpp).astype(jnp.bfloat16)
    pb2 = _fused_bias(params["db2"], params["pw2"], params["pb2"], W, cpp)

    kern = functools.partial(_gcn_fused_kernel, B=B, N=N, cpp=cpp)
    out2d = pl.pallas_call(
        kern,
        out_shape=jax.ShapeDtypeStruct((B, N, H, wc), jnp.float32),
        grid=(1,),                      # whole batch in one grid step
        in_specs=[
            pl.BlockSpec(memory_space=pltpu.MemorySpace.SMEM),        # A (N,N)
            pl.BlockSpec((B, N, H, wc), lambda i: (0, 0, 0, 0)),      # x
            pl.BlockSpec((9, H, wc), lambda i: (0, 0, 0)),            # dw1 taps
            pl.BlockSpec((wc, wc), lambda i: (0, 0)),                 # pw1 (bf16)
            pl.BlockSpec((1, wc), lambda i: (0, 0)),                  # pb1 fused
            pl.BlockSpec((9, H, wc), lambda i: (0, 0, 0)),            # dw2 taps
            pl.BlockSpec((wc, wc), lambda i: (0, 0)),                 # pw2 (bf16)
            pl.BlockSpec((1, wc), lambda i: (0, 0)),                  # pb2 fused
        ],
        out_specs=pl.BlockSpec((B, N, H, wc), lambda i: (0, 0, 0, 0)),
        compiler_params=pltpu.CompilerParams(
            dimension_semantics=("arbitrary",)),
    )(A, x2, dw1, pw1, pb1, dw2, pw2, pb2)

    # Single channel-last -> NCHW transpose on the way out (drop channel pad).
    out = out2d.reshape(B, N, H, W, cpp)[..., :out_ch]
    return jnp.transpose(out, (0, 1, 4, 2, 3))


# ---------------------------------------------------------------------------
# Pure-JAX reference (correctness check).
# ---------------------------------------------------------------------------
def _ref_sepconv_nchw(x, wdw, bdw, wpw, bpw):
    Cin = wdw.shape[-1]
    Cout = wpw.shape[1]
    wd = jnp.transpose(wdw, (2, 0, 1))[:, None, :, :]          # (Cin,1,3,3)
    y = jax.lax.conv_general_dilated(
        x, wd, (1, 1), "SAME",
        dimension_numbers=("NCHW", "OIHW", "NCHW"), feature_group_count=Cin)
    y = y + bdw.reshape(1, Cin, 1, 1)
    wp = jnp.transpose(wpw, (1, 0))[:, :, None, None]          # (Cout,Cin,1,1)
    z = jax.lax.conv_general_dilated(
        y, wp, (1, 1), "VALID", dimension_numbers=("NCHW", "OIHW", "NCHW"))
    return z + bpw.reshape(1, Cout, 1, 1)


def _ref_forward(x, A, params):
    B, N, C, H, W = x.shape
    A_b = jnp.broadcast_to(A[None], (B, N, N))
    y = jnp.einsum("bmn,bnchw->bmchw", A_b, x).reshape(B * N, C, H, W)
    y = _ref_sepconv_nchw(y, params["dw1"], params["db1"], params["pw1"], params["pb1"])
    mid = params["pw1"].shape[1]
    y = y.reshape(B, N, mid, H, W)
    y = jnp.einsum("bmn,bnchw->bmchw", A_b, y).reshape(B * N, mid, H, W)
    y = _ref_sepconv_nchw(y, params["dw2"], params["db2"], params["pw2"], params["pb2"])
    out_ch = params["pw2"].shape[1]
    return y.reshape(B, N, out_ch, H, W)


if __name__ == "__main__":
    B, N, C, H, W = 2, 4, 8, 16, 16     # x: BxNxCxHxW, in_ch=8  (W*C = 128 lanes)
    out_ch = 8                           # W*out_ch = 128 -> lane-dense output
    mid = C // 2                         # 4, zero-padded to 8 inside the kernel

    key = jax.random.PRNGKey(0)
    ks = jax.random.split(key, 10)
    x = jax.random.normal(ks[0], (B, N, C, H, W), jnp.float32)
    A = jax.nn.softmax(jax.random.normal(ks[1], (N, N), jnp.float32), axis=-1)

    params = {
        "dw1": jax.random.normal(ks[2], (3, 3, C), jnp.float32) * 0.2,
        "db1": jax.random.normal(ks[3], (C,), jnp.float32) * 0.1,
        "pw1": jax.random.normal(ks[4], (C, mid), jnp.float32) * 0.2,
        "pb1": jax.random.normal(ks[5], (mid,), jnp.float32) * 0.1,
        "dw2": jax.random.normal(ks[6], (3, 3, mid), jnp.float32) * 0.2,
        "db2": jax.random.normal(ks[7], (mid,), jnp.float32) * 0.1,
        "pw2": jax.random.normal(ks[8], (mid, out_ch), jnp.float32) * 0.2,
        "pb2": jax.random.normal(ks[9], (out_ch,), jnp.float32) * 0.1,
    }

    out = jax.jit(conv_based_gcn_forward)(x, A, params)
    out = jax.block_until_ready(out)
    assert out.shape == (B, N, out_ch, H, W)

    ref = _ref_forward(x, A, params)
    np.testing.assert_allclose(np.asarray(out), np.asarray(ref), rtol=2e-2, atol=2e-2)

    print("KERNEL_OK")
</pallas_src>

<mosaic_0001>
module attributes {stable_mosaic.version = 11 : i64} {
  func.func @_gcn_fused_kernel(%arg0: i32, %arg1: memref<4x4xf32, #tpu.memory_space<smem>>, %arg2: memref<2x4x16x128xf32, #tpu.memory_space<vmem>>, %arg3: memref<9x16x128xf32, #tpu.memory_space<vmem>>, %arg4: memref<128x128xbf16, #tpu.memory_space<vmem>>, %arg5: memref<1x128xf32, #tpu.memory_space<vmem>>, %arg6: memref<9x16x128xf32, #tpu.memory_space<vmem>>, %arg7: memref<128x128xbf16, #tpu.memory_space<vmem>>, %arg8: memref<1x128xf32, #tpu.memory_space<vmem>>, %arg9: memref<2x4x16x128xf32, #tpu.memory_space<vmem>>) attributes {dimension_semantics = [#tpu.dimension_semantics<arbitrary>], iteration_bounds = array<i64: 1>, scalar_prefetch = 0 : i64, scratch_operands = 0 : i64, tpu.core_type = #tpu.core_type<tc>, window_params = [{transform_indices = @transform_0, window_bounds = array<i64: 4, 4>}, {pipeline_mode = #tpu.pipeline_mode<synchronous>, transform_indices = @transform_1, window_bounds = array<i64: 2, 4, 16, 128>}, {pipeline_mode = #tpu.pipeline_mode<synchronous>, transform_indices = @transform_2, window_bounds = array<i64: 9, 16, 128>}, {pipeline_mode = #tpu.pipeline_mode<synchronous>, transform_indices = @transform_3, window_bounds = array<i64: 128, 128>}, {pipeline_mode = #tpu.pipeline_mode<synchronous>, transform_indices = @transform_4, window_bounds = array<i64: 1, 128>}, {pipeline_mode = #tpu.pipeline_mode<synchronous>, transform_indices = @transform_5, window_bounds = array<i64: 9, 16, 128>}, {pipeline_mode = #tpu.pipeline_mode<synchronous>, transform_indices = @transform_6, window_bounds = array<i64: 128, 128>}, {pipeline_mode = #tpu.pipeline_mode<synchronous>, transform_indices = @transform_7, window_bounds = array<i64: 1, 128>}, {pipeline_mode = #tpu.pipeline_mode<synchronous>, transform_indices = @transform_8, window_bounds = array<i64: 2, 4, 16, 128>}]} {
    %c0 = arith.constant 0 : index
    %c0_0 = arith.constant 0 : index
    %c0_1 = arith.constant 0 : index
    %c0_2 = arith.constant 0 : index
    %0 = vector.load %arg2[%c0, %c0_0, %c0_1, %c0_2] : memref<2x4x16x128xf32, #tpu.memory_space<vmem>>, vector<2x4x16x128xf32>
    %c0_3 = arith.constant 0 : index
    %c0_4 = arith.constant 0 : index
    %1 = memref.load %arg1[%c0_3, %c0_4] : memref<4x4xf32, #tpu.memory_space<smem>>
    %2 = vector.extract_strided_slice %0 {offsets = [0, 0, 0, 0], sizes = [1, 1, 16, 128], strides = [1, 1, 1, 1]} : vector<2x4x16x128xf32> to vector<1x1x16x128xf32>
    %3 = vector.shape_cast %2 : vector<1x1x16x128xf32> to vector<16x128xf32>
    %4 = vector.broadcast %1 : f32 to vector<16x128xf32>
    %5 = arith.mulf %4, %3 : vector<16x128xf32>
    %c0_5 = arith.constant 0 : index
    %c1 = arith.constant 1 : index
    %6 = memref.load %arg1[%c0_5, %c1] : memref<4x4xf32, #tpu.memory_space<smem>>
    %7 = vector.extract_strided_slice %0 {offsets = [0, 1, 0, 0], sizes = [1, 1, 16, 128], strides = [1, 1, 1, 1]} : vector<2x4x16x128xf32> to vector<1x1x16x128xf32>
    %8 = vector.shape_cast %7 : vector<1x1x16x128xf32> to vector<16x128xf32>
    %9 = vector.broadcast %6 : f32 to vector<16x128xf32>
    %10 = arith.mulf %9, %8 : vector<16x128xf32>
    %11 = arith.addf %5, %10 : vector<16x128xf32>
    %c0_6 = arith.constant 0 : index
    %c2 = arith.constant 2 : index
    %12 = memref.load %arg1[%c0_6, %c2] : memref<4x4xf32, #tpu.memory_space<smem>>
    %13 = vector.extract_strided_slice %0 {offsets = [0, 2, 0, 0], sizes = [1, 1, 16, 128], strides = [1, 1, 1, 1]} : vector<2x4x16x128xf32> to vector<1x1x16x128xf32>
    %14 = vector.shape_cast %13 : vector<1x1x16x128xf32> to vector<16x128xf32>
    %15 = vector.broadcast %12 : f32 to vector<16x128xf32>
    %16 = arith.mulf %15, %14 : vector<16x128xf32>
    %17 = arith.addf %11, %16 : vector<16x128xf32>
    %c0_7 = arith.constant 0 : index
    %c3 = arith.constant 3 : index
    %18 = memref.load %arg1[%c0_7, %c3] : memref<4x4xf32, #tpu.memory_space<smem>>
    %19 = vector.extract_strided_slice %0 {offsets = [0, 3, 0, 0], sizes = [1, 1, 16, 128], strides = [1, 1, 1, 1]} : vector<2x4x16x128xf32> to vector<1x1x16x128xf32>
    %20 = vector.shape_cast %19 : vector<1x1x16x128xf32> to vector<16x128xf32>
    %21 = vector.broadcast %18 : f32 to vector<16x128xf32>
    %22 = arith.mulf %21, %20 : vector<16x128xf32>
    %23 = arith.addf %17, %22 : vector<16x128xf32>
    %c1_8 = arith.constant 1 : index
    %c0_9 = arith.constant 0 : index
    %24 = memref.load %arg1[%c1_8, %c0_9] : memref<4x4xf32, #tpu.memory_space<smem>>
    %25 = vector.extract_strided_slice %0 {offsets = [0, 0, 0, 0], sizes = [1, 1, 16, 128], strides = [1, 1, 1, 1]} : vector<2x4x16x128xf32> to vector<1x1x16x128xf32>
    %26 = vector.shape_cast %25 : vector<1x1x16x128xf32> to vector<16x128xf32>
    %27 = vector.broadcast %24 : f32 to vector<16x128xf32>
    %28 = arith.mulf %27, %26 : vector<16x128xf32>
    %c1_10 = arith.constant 1 : index
    %c1_11 = arith.constant 1 : index
    %29 = memref.load %arg1[%c1_10, %c1_11] : memref<4x4xf32, #tpu.memory_space<smem>>
    %30 = vector.extract_strided_slice %0 {offsets = [0, 1, 0, 0], sizes = [1, 1, 16, 128], strides = [1, 1, 1, 1]} : vector<2x4x16x128xf32> to vector<1x1x16x128xf32>
    %31 = vector.shape_cast %30 : vector<1x1x16x128xf32> to vector<16x128xf32>
    %32 = vector.broadcast %29 : f32 to vector<16x128xf32>
    %33 = arith.mulf %32, %31 : vector<16x128xf32>
    %34 = arith.addf %28, %33 : vector<16x128xf32>
    %c1_12 = arith.constant 1 : index
    %c2_13 = arith.constant 2 : index
    %35 = memref.load %arg1[%c1_12, %c2_13] : memref<4x4xf32, #tpu.memory_space<smem>>
    %36 = vector.extract_strided_slice %0 {offsets = [0, 2, 0, 0], sizes = [1, 1, 16, 128], strides = [1, 1, 1, 1]} : vector<2x4x16x128xf32> to vector<1x1x16x128xf32>
    %37 = vector.shape_cast %36 : vector<1x1x16x128xf32> to vector<16x128xf32>
    %38 = vector.broadcast %35 : f32 to vector<16x128xf32>
    %39 = arith.mulf %38, %37 : vector<16x128xf32>
    %40 = arith.addf %34, %39 : vector<16x128xf32>
    %c1_14 = arith.constant 1 : index
    %c3_15 = arith.constant 3 : index
    %41 = memref.load %arg1[%c1_14, %c3_15] : memref<4x4xf32, #tpu.memory_space<smem>>
    %42 = vector.extract_strided_slice %0 {offsets = [0, 3, 0, 0], sizes = [1, 1, 16, 128], strides = [1, 1, 1, 1]} : vector<2x4x16x128xf32> to vector<1x1x16x128xf32>
    %43 = vector.shape_cast %42 : vector<1x1x16x128xf32> to vector<16x128xf32>
    %44 = vector.broadcast %41 : f32 to vector<16x128xf32>
    %45 = arith.mulf %44, %43 : vector<16x128xf32>
    %46 = arith.addf %40, %45 : vector<16x128xf32>
    %c2_16 = arith.constant 2 : index
    %c0_17 = arith.constant 0 : index
    %47 = memref.load %arg1[%c2_16, %c0_17] : memref<4x4xf32, #tpu.memory_space<smem>>
    %48 = vector.extract_strided_slice %0 {offsets = [0, 0, 0, 0], sizes = [1, 1, 16, 128], strides = [1, 1, 1, 1]} : vector<2x4x16x128xf32> to vector<1x1x16x128xf32>
    %49 = vector.shape_cast %48 : vector<1x1x16x128xf32> to vector<16x128xf32>
    %50 = vector.broadcast %47 : f32 to vector<16x128xf32>
    %51 = arith.mulf %50, %49 : vector<16x128xf32>
    %c2_18 = arith.constant 2 : index
    %c1_19 = arith.constant 1 : index
    %52 = memref.load %arg1[%c2_18, %c1_19] : memref<4x4xf32, #tpu.memory_space<smem>>
    %53 = vector.extract_strided_slice %0 {offsets = [0, 1, 0, 0], sizes = [1, 1, 16, 128], strides = [1, 1, 1, 1]} : vector<2x4x16x128xf32> to vector<1x1x16x128xf32>
    %54 = vector.shape_cast %53 : vector<1x1x16x128xf32> to vector<16x128xf32>
    %55 = vector.broadcast %52 : f32 to vector<16x128xf32>
    %56 = arith.mulf %55, %54 : vector<16x128xf32>
    %57 = arith.addf %51, %56 : vector<16x128xf32>
    %c2_20 = arith.constant 2 : index
    %c2_21 = arith.constant 2 : index
    %58 = memref.load %arg1[%c2_20, %c2_21] : memref<4x4xf32, #tpu.memory_space<smem>>
    %59 = vector.extract_strided_slice %0 {offsets = [0, 2, 0, 0], sizes = [1, 1, 16, 128], strides = [1, 1, 1, 1]} : vector<2x4x16x128xf32> to vector<1x1x16x128xf32>
    %60 = vector.shape_cast %59 : vector<1x1x16x128xf32> to vector<16x128xf32>
    %61 = vector.broadcast %58 : f32 to vector<16x128xf32>
    %62 = arith.mulf %61, %60 : vector<16x128xf32>
    %63 = arith.addf %57, %62 : vector<16x128xf32>
    %c2_22 = arith.constant 2 : index
    %c3_23 = arith.constant 3 : index
    %64 = memref.load %arg1[%c2_22, %c3_23] : memref<4x4xf32, #tpu.memory_space<smem>>
    %65 = vector.extract_strided_slice %0 {offsets = [0, 3, 0, 0], sizes = [1, 1, 16, 128], strides = [1, 1, 1, 1]} : vector<2x4x16x128xf32> to vector<1x1x16x128xf32>
    %66 = vector.shape_cast %65 : vector<1x1x16x128xf32> to vector<16x128xf32>
    %67 = vector.broadcast %64 : f32 to vector<16x128xf32>
    %68 = arith.mulf %67, %66 : vector<16x128xf32>
    %69 = arith.addf %63, %68 : vector<16x128xf32>
    %c3_24 = arith.constant 3 : index
    %c0_25 = arith.constant 0 : index
    %70 = memref.load %arg1[%c3_24, %c0_25] : memref<4x4xf32, #tpu.memory_space<smem>>
    %71 = vector.extract_strided_slice %0 {offsets = [0, 0, 0, 0], sizes = [1, 1, 16, 128], strides = [1, 1, 1, 1]} : vector<2x4x16x128xf32> to vector<1x1x16x128xf32>
    %72 = vector.shape_cast %71 : vector<1x1x16x128xf32> to vector<16x128xf32>
    %73 = vector.broadcast %70 : f32 to vector<16x128xf32>
    %74 = arith.mulf %73, %72 : vector<16x128xf32>
    %c3_26 = arith.constant 3 : index
    %c1_27 = arith.constant 1 : index
    %75 = memref.load %arg1[%c3_26, %c1_27] : memref<4x4xf32, #tpu.memory_space<smem>>
    %76 = vector.extract_strided_slice %0 {offsets = [0, 1, 0, 0], sizes = [1, 1, 16, 128], strides = [1, 1, 1, 1]} : vector<2x4x16x128xf32> to vector<1x1x16x128xf32>
    %77 = vector.shape_cast %76 : vector<1x1x16x128xf32> to vector<16x128xf32>
    %78 = vector.broadcast %75 : f32 to vector<16x128xf32>
    %79 = arith.mulf %78, %77 : vector<16x128xf32>
    %80 = arith.addf %74, %79 : vector<16x128xf32>
    %c3_28 = arith.constant 3 : index
    %c2_29 = arith.constant 2 : index
    %81 = memref.load %arg1[%c3_28, %c2_29] : memref<4x4xf32, #tpu.memory_space<smem>>
    %82 = vector.extract_strided_slice %0 {offsets = [0, 2, 0, 0], sizes = [1, 1, 16, 128], strides = [1, 1, 1, 1]} : vector<2x4x16x128xf32> to vector<1x1x16x128xf32>
    %83 = vector.shape_cast %82 : vector<1x1x16x128xf32> to vector<16x128xf32>
    %84 = vector.broadcast %81 : f32 to vector<16x128xf32>
    %85 = arith.mulf %84, %83 : vector<16x128xf32>
    %86 = arith.addf %80, %85 : vector<16x128xf32>
    %c3_30 = arith.constant 3 : index
    %c3_31 = arith.constant 3 : index
    %87 = memref.load %arg1[%c3_30, %c3_31] : memref<4x4xf32, #tpu.memory_space<smem>>
    %88 = vector.extract_strided_slice %0 {offsets = [0, 3, 0, 0], sizes = [1, 1, 16, 128], strides = [1, 1, 1, 1]} : vector<2x4x16x128xf32> to vector<1x1x16x128xf32>
    %89 = vector.shape_cast %88 : vector<1x1x16x128xf32> to vector<16x128xf32>
    %90 = vector.broadcast %87 : f32 to vector<16x128xf32>
    %91 = arith.mulf %90, %89 : vector<16x128xf32>
    %92 = arith.addf %86, %91 : vector<16x128xf32>
    %c0_32 = arith.constant 0 : index
    %c0_33 = arith.constant 0 : index
    %93 = memref.load %arg1[%c0_32, %c0_33] : memref<4x4xf32, #tpu.memory_space<smem>>
    %94 = vector.extract_strided_slice %0 {offsets = [1, 0, 0, 0], sizes = [1, 1, 16, 128], strides = [1, 1, 1, 1]} : vector<2x4x16x128xf32> to vector<1x1x16x128xf32>
    %95 = vector.shape_cast %94 : vector<1x1x16x128xf32> to vector<16x128xf32>
    %96 = vector.broadcast %93 : f32 to vector<16x128xf32>
    %97 = arith.mulf %96, %95 : vector<16x128xf32>
    %c0_34 = arith.constant 0 : index
    %c1_35 = arith.constant 1 : index
    %98 = memref.load %arg1[%c0_34, %c1_35] : memref<4x4xf32, #tpu.memory_space<smem>>
    %99 = vector.extract_strided_slice %0 {offsets = [1, 1, 0, 0], sizes = [1, 1, 16, 128], strides = [1, 1, 1, 1]} : vector<2x4x16x128xf32> to vector<1x1x16x128xf32>
    %100 = vector.shape_cast %99 : vector<1x1x16x128xf32> to vector<16x128xf32>
    %101 = vector.broadcast %98 : f32 to vector<16x128xf32>
    %102 = arith.mulf %101, %100 : vector<16x128xf32>
    %103 = arith.addf %97, %102 : vector<16x128xf32>
    %c0_36 = arith.constant 0 : index
    %c2_37 = arith.constant 2 : index
    %104 = memref.load %arg1[%c0_36, %c2_37] : memref<4x4xf32, #tpu.memory_space<smem>>
    %105 = vector.extract_strided_slice %0 {offsets = [1, 2, 0, 0], sizes = [1, 1, 16, 128], strides = [1, 1, 1, 1]} : vector<2x4x16x128xf32> to vector<1x1x16x128xf32>
    %106 = vector.shape_cast %105 : vector<1x1x16x128xf32> to vector<16x128xf32>
    %107 = vector.broadcast %104 : f32 to vector<16x128xf32>
    %108 = arith.mulf %107, %106 : vector<16x128xf32>
    %109 = arith.addf %103, %108 : vector<16x128xf32>
    %c0_38 = arith.constant 0 : index
    %c3_39 = arith.constant 3 : index
    %110 = memref.load %arg1[%c0_38, %c3_39] : memref<4x4xf32, #tpu.memory_space<smem>>
    %111 = vector.extract_strided_slice %0 {offsets = [1, 3, 0, 0], sizes = [1, 1, 16, 128], strides = [1, 1, 1, 1]} : vector<2x4x16x128xf32> to vector<1x1x16x128xf32>
    %112 = vector.shape_cast %111 : vector<1x1x16x128xf32> to vector<16x128xf32>
    %113 = vector.broadcast %110 : f32 to vector<16x128xf32>
    %114 = arith.mulf %113, %112 : vector<16x128xf32>
    %115 = arith.addf %109, %114 : vector<16x128xf32>
    %c1_40 = arith.constant 1 : index
    %c0_41 = arith.constant 0 : index
    %116 = memref.load %arg1[%c1_40, %c0_41] : memref<4x4xf32, #tpu.memory_space<smem>>
    %117 = vector.extract_strided_slice %0 {offsets = [1, 0, 0, 0], sizes = [1, 1, 16, 128], strides = [1, 1, 1, 1]} : vector<2x4x16x128xf32> to vector<1x1x16x128xf32>
    %118 = vector.shape_cast %117 : vector<1x1x16x128xf32> to vector<16x128xf32>
    %119 = vector.broadcast %116 : f32 to vector<16x128xf32>
    %120 = arith.mulf %119, %118 : vector<16x128xf32>
    %c1_42 = arith.constant 1 : index
    %c1_43 = arith.constant 1 : index
    %121 = memref.load %arg1[%c1_42, %c1_43] : memref<4x4xf32, #tpu.memory_space<smem>>
    %122 = vector.extract_strided_slice %0 {offsets = [1, 1, 0, 0], sizes = [1, 1, 16, 128], strides = [1, 1, 1, 1]} : vector<2x4x16x128xf32> to vector<1x1x16x128xf32>
    %123 = vector.shape_cast %122 : vector<1x1x16x128xf32> to vector<16x128xf32>
    %124 = vector.broadcast %121 : f32 to vector<16x128xf32>
    %125 = arith.mulf %124, %123 : vector<16x128xf32>
    %126 = arith.addf %120, %125 : vector<16x128xf32>
    %c1_44 = arith.constant 1 : index
    %c2_45 = arith.constant 2 : index
    %127 = memref.load %arg1[%c1_44, %c2_45] : memref<4x4xf32, #tpu.memory_space<smem>>
    %128 = vector.extract_strided_slice %0 {offsets = [1, 2, 0, 0], sizes = [1, 1, 16, 128], strides = [1, 1, 1, 1]} : vector<2x4x16x128xf32> to vector<1x1x16x128xf32>
    %129 = vector.shape_cast %128 : vector<1x1x16x128xf32> to vector<16x128xf32>
    %130 = vector.broadcast %127 : f32 to vector<16x128xf32>
    %131 = arith.mulf %130, %129 : vector<16x128xf32>
    %132 = arith.addf %126, %131 : vector<16x128xf32>
    %c1_46 = arith.constant 1 : index
    %c3_47 = arith.constant 3 : index
    %133 = memref.load %arg1[%c1_46, %c3_47] : memref<4x4xf32, #tpu.memory_space<smem>>
    %134 = vector.extract_strided_slice %0 {offsets = [1, 3, 0, 0], sizes = [1, 1, 16, 128], strides = [1, 1, 1, 1]} : vector<2x4x16x128xf32> to vector<1x1x16x128xf32>
    %135 = vector.shape_cast %134 : vector<1x1x16x128xf32> to vector<16x128xf32>
    %136 = vector.broadcast %133 : f32 to vector<16x128xf32>
    %137 = arith.mulf %136, %135 : vector<16x128xf32>
    %138 = arith.addf %132, %137 : vector<16x128xf32>
    %c2_48 = arith.constant 2 : index
    %c0_49 = arith.constant 0 : index
    %139 = memref.load %arg1[%c2_48, %c0_49] : memref<4x4xf32, #tpu.memory_space<smem>>
    %140 = vector.extract_strided_slice %0 {offsets = [1, 0, 0, 0], sizes = [1, 1, 16, 128], strides = [1, 1, 1, 1]} : vector<2x4x16x128xf32> to vector<1x1x16x128xf32>
    %141 = vector.shape_cast %140 : vector<1x1x16x128xf32> to vector<16x128xf32>
    %142 = vector.broadcast %139 : f32 to vector<16x128xf32>
    %143 = arith.mulf %142, %141 : vector<16x128xf32>
    %c2_50 = arith.constant 2 : index
    %c1_51 = arith.constant 1 : index
    %144 = memref.load %arg1[%c2_50, %c1_51] : memref<4x4xf32, #tpu.memory_space<smem>>
    %145 = vector.extract_strided_slice %0 {offsets = [1, 1, 0, 0], sizes = [1, 1, 16, 128], strides = [1, 1, 1, 1]} : vector<2x4x16x128xf32> to vector<1x1x16x128xf32>
    %146 = vector.shape_cast %145 : vector<1x1x16x128xf32> to vector<16x128xf32>
    %147 = vector.broadcast %144 : f32 to vector<16x128xf32>
    %148 = arith.mulf %147, %146 : vector<16x128xf32>
    %149 = arith.addf %143, %148 : vector<16x128xf32>
    %c2_52 = arith.constant 2 : index
    %c2_53 = arith.constant 2 : index
    %150 = memref.load %arg1[%c2_52, %c2_53] : memref<4x4xf32, #tpu.memory_space<smem>>
    %151 = vector.extract_strided_slice %0 {offsets = [1, 2, 0, 0], sizes = [1, 1, 16, 128], strides = [1, 1, 1, 1]} : vector<2x4x16x128xf32> to vector<1x1x16x128xf32>
    %152 = vector.shape_cast %151 : vector<1x1x16x128xf32> to vector<16x128xf32>
    %153 = vector.broadcast %150 : f32 to vector<16x128xf32>
    %154 = arith.mulf %153, %152 : vector<16x128xf32>
    %155 = arith.addf %149, %154 : vector<16x128xf32>
    %c2_54 = arith.constant 2 : index
    %c3_55 = arith.constant 3 : index
    %156 = memref.load %arg1[%c2_54, %c3_55] : memref<4x4xf32, #tpu.memory_space<smem>>
    %157 = vector.extract_strided_slice %0 {offsets = [1, 3, 0, 0], sizes = [1, 1, 16, 128], strides = [1, 1, 1, 1]} : vector<2x4x16x128xf32> to vector<1x1x16x128xf32>
    %158 = vector.shape_cast %157 : vector<1x1x16x128xf32> to vector<16x128xf32>
    %159 = vector.broadcast %156 : f32 to vector<16x128xf32>
    %160 = arith.mulf %159, %158 : vector<16x128xf32>
    %161 = arith.addf %155, %160 : vector<16x128xf32>
    %c3_56 = arith.constant 3 : index
    %c0_57 = arith.constant 0 : index
    %162 = memref.load %arg1[%c3_56, %c0_57] : memref<4x4xf32, #tpu.memory_space<smem>>
    %163 = vector.extract_strided_slice %0 {offsets = [1, 0, 0, 0], sizes = [1, 1, 16, 128], strides = [1, 1, 1, 1]} : vector<2x4x16x128xf32> to vector<1x1x16x128xf32>
    %164 = vector.shape_cast %163 : vector<1x1x16x128xf32> to vector<16x128xf32>
    %165 = vector.broadcast %162 : f32 to vector<16x128xf32>
    %166 = arith.mulf %165, %164 : vector<16x128xf32>
    %c3_58 = arith.constant 3 : index
    %c1_59 = arith.constant 1 : index
    %167 = memref.load %arg1[%c3_58, %c1_59] : memref<4x4xf32, #tpu.memory_space<smem>>
    %168 = vector.extract_strided_slice %0 {offsets = [1, 1, 0, 0], sizes = [1, 1, 16, 128], strides = [1, 1, 1, 1]} : vector<2x4x16x128xf32> to vector<1x1x16x128xf32>
    %169 = vector.shape_cast %168 : vector<1x1x16x128xf32> to vector<16x128xf32>
    %170 = vector.broadcast %167 : f32 to vector<16x128xf32>
    %171 = arith.mulf %170, %169 : vector<16x128xf32>
    %172 = arith.addf %166, %171 : vector<16x128xf32>
    %c3_60 = arith.constant 3 : index
    %c2_61 = arith.constant 2 : index
    %173 = memref.load %arg1[%c3_60, %c2_61] : memref<4x4xf32, #tpu.memory_space<smem>>
    %174 = vector.extract_strided_slice %0 {offsets = [1, 2, 0, 0], sizes = [1, 1, 16, 128], strides = [1, 1, 1, 1]} : vector<2x4x16x128xf32> to vector<1x1x16x128xf32>
    %175 = vector.shape_cast %174 : vector<1x1x16x128xf32> to vector<16x128xf32>
    %176 = vector.broadcast %173 : f32 to vector<16x128xf32>
    %177 = arith.mulf %176, %175 : vector<16x128xf32>
    %178 = arith.addf %172, %177 : vector<16x128xf32>
    %c3_62 = arith.constant 3 : index
    %c3_63 = arith.constant 3 : index
    %179 = memref.load %arg1[%c3_62, %c3_63] : memref<4x4xf32, #tpu.memory_space<smem>>
    %180 = vector.extract_strided_slice %0 {offsets = [1, 3, 0, 0], sizes = [1, 1, 16, 128], strides = [1, 1, 1, 1]} : vector<2x4x16x128xf32> to vector<1x1x16x128xf32>
    %181 = vector.shape_cast %180 : vector<1x1x16x128xf32> to vector<16x128xf32>
    %182 = vector.broadcast %179 : f32 to vector<16x128xf32>
    %183 = arith.mulf %182, %181 : vector<16x128xf32>
    %184 = arith.addf %178, %183 : vector<16x128xf32>
    %185 = vector.shape_cast %23 : vector<16x128xf32> to vector<1x16x128xf32>
    %186 = vector.shape_cast %46 : vector<16x128xf32> to vector<1x16x128xf32>
    %187 = vector.shape_cast %69 : vector<16x128xf32> to vector<1x16x128xf32>
    %188 = vector.shape_cast %92 : vector<16x128xf32> to vector<1x16x128xf32>
    %189 = vector.shape_cast %115 : vector<16x128xf32> to vector<1x16x128xf32>
    %190 = vector.shape_cast %138 : vector<16x128xf32> to vector<1x16x128xf32>
    %191 = vector.shape_cast %161 : vector<16x128xf32> to vector<1x16x128xf32>
    %192 = vector.shape_cast %184 : vector<16x128xf32> to vector<1x16x128xf32>
    %193 = tpu.concatenate %185, %186, %187, %188, %189, %190, %191, %192 in 0 : vector<1x16x128xf32>, vector<1x16x128xf32>, vector<1x16x128xf32>, vector<1x16x128xf32>, vector<1x16x128xf32>, vector<1x16x128xf32>, vector<1x16x128xf32>, vector<1x16x128xf32> -> vector<8x16x128xf32>
    %cst = arith.constant 0.000000e+00 : f32
    %194 = vector.broadcast %cst : f32 to vector<8x16x128xf32>
    %c1_i32 = arith.constant 1 : i32
    %195 = tpu.dynamic_rotate %193 by %c1_i32 dim 1 : vector<8x16x128xf32>, i32 -> vector<8x16x128xf32>
    %c8_i32 = arith.constant 8 : i32
    %196 = tpu.dynamic_rotate %195 by %c8_i32 dim 2 : vector<8x16x128xf32>, i32 -> vector<8x16x128xf32>
    %c0_64 = arith.constant 0 : index
    %c0_65 = arith.constant 0 : index
    %c0_66 = arith.constant 0 : index
    %197 = vector.load %arg3[%c0_64, %c0_65, %c0_66] : memref<9x16x128xf32, #tpu.memory_space<vmem>>, vector<1x16x128xf32>
    %198 = vector.shape_cast %197 : vector<1x16x128xf32> to vector<16x128xf32>
    %199 = vector.shape_cast %198 : vector<16x128xf32> to vector<1x16x128xf32>
    %200 = vector.broadcast %199 : vector<1x16x128xf32> to vector<8x16x128xf32>
    %201 = arith.mulf %196, %200 : vector<8x16x128xf32>
    %202 = arith.addf %194, %201 : vector<8x16x128xf32>
    %c1_67 = arith.constant 1 : index
    %c0_68 = arith.constant 0 : index
    %c0_69 = arith.constant 0 : index
    %203 = vector.load %arg3[%c1_67, %c0_68, %c0_69] : memref<9x16x128xf32, #tpu.memory_space<vmem>>, vector<1x16x128xf32>
    %204 = vector.shape_cast %203 : vector<1x16x128xf32> to vector<16x128xf32>
    %205 = vector.shape_cast %204 : vector<16x128xf32> to vector<1x16x128xf32>
    %206 = vector.broadcast %205 : vector<1x16x128xf32> to vector<8x16x128xf32>
    %207 = arith.mulf %195, %206 : vector<8x16x128xf32>
    %208 = arith.addf %202, %207 : vector<8x16x128xf32>
    %c120_i32 = arith.constant 120 : i32
    %209 = tpu.dynamic_rotate %195 by %c120_i32 dim 2 : vector<8x16x128xf32>, i32 -> vector<8x16x128xf32>
    %c2_70 = arith.constant 2 : index
    %c0_71 = arith.constant 0 : index
    %c0_72 = arith.constant 0 : index
    %210 = vector.load %arg3[%c2_70, %c0_71, %c0_72] : memref<9x16x128xf32, #tpu.memory_space<vmem>>, vector<1x16x128xf32>
    %211 = vector.shape_cast %210 : vector<1x16x128xf32> to vector<16x128xf32>
    %212 = vector.shape_cast %211 : vector<16x128xf32> to vector<1x16x128xf32>
    %213 = vector.broadcast %212 : vector<1x16x128xf32> to vector<8x16x128xf32>
    %214 = arith.mulf %209, %213 : vector<8x16x128xf32>
    %215 = arith.addf %208, %214 : vector<8x16x128xf32>
    %c8_i32_73 = arith.constant 8 : i32
    %216 = tpu.dynamic_rotate %193 by %c8_i32_73 dim 2 : vector<8x16x128xf32>, i32 -> vector<8x16x128xf32>
    %c3_74 = arith.constant 3 : index
    %c0_75 = arith.constant 0 : index
    %c0_76 = arith.constant 0 : index
    %217 = vector.load %arg3[%c3_74, %c0_75, %c0_76] : memref<9x16x128xf32, #tpu.memory_space<vmem>>, vector<1x16x128xf32>
    %218 = vector.shape_cast %217 : vector<1x16x128xf32> to vector<16x128xf32>
    %219 = vector.shape_cast %218 : vector<16x128xf32> to vector<1x16x128xf32>
    %220 = vector.broadcast %219 : vector<1x16x128xf32> to vector<8x16x128xf32>
    %221 = arith.mulf %216, %220 : vector<8x16x128xf32>
    %222 = arith.addf %215, %221 : vector<8x16x128xf32>
    %c4 = arith.constant 4 : index
    %c0_77 = arith.constant 0 : index
    %c0_78 = arith.constant 0 : index
    %223 = vector.load %arg3[%c4, %c0_77, %c0_78] : memref<9x16x128xf32, #tpu.memory_space<vmem>>, vector<1x16x128xf32>
    %224 = vector.shape_cast %223 : vector<1x16x128xf32> to vector<16x128xf32>
    %225 = vector.shape_cast %224 : vector<16x128xf32> to vector<1x16x128xf32>
    %226 = vector.broadcast %225 : vector<1x16x128xf32> to vector<8x16x128xf32>
    %227 = arith.mulf %193, %226 : vector<8x16x128xf32>
    %228 = arith.addf %222, %227 : vector<8x16x128xf32>
    %c120_i32_79 = arith.constant 120 : i32
    %229 = tpu.dynamic_rotate %193 by %c120_i32_79 dim 2 : vector<8x16x128xf32>, i32 -> vector<8x16x128xf32>
    %c5 = arith.constant 5 : index
    %c0_80 = arith.constant 0 : index
    %c0_81 = arith.constant 0 : index
    %230 = vector.load %arg3[%c5, %c0_80, %c0_81] : memref<9x16x128xf32, #tpu.memory_space<vmem>>, vector<1x16x128xf32>
    %231 = vector.shape_cast %230 : vector<1x16x128xf32> to vector<16x128xf32>
    %232 = vector.shape_cast %231 : vector<16x128xf32> to vector<1x16x128xf32>
    %233 = vector.broadcast %232 : vector<1x16x128xf32> to vector<8x16x128xf32>
    %234 = arith.mulf %229, %233 : vector<8x16x128xf32>
    %235 = arith.addf %228, %234 : vector<8x16x128xf32>
    %c15_i32 = arith.constant 15 : i32
    %236 = tpu.dynamic_rotate %193 by %c15_i32 dim 1 : vector<8x16x128xf32>, i32 -> vector<8x16x128xf32>
    %c8_i32_82 = arith.constant 8 : i32
    %237 = tpu.dynamic_rotate %236 by %c8_i32_82 dim 2 : vector<8x16x128xf32>, i32 -> vector<8x16x128xf32>
    %c6 = arith.constant 6 : index
    %c0_83 = arith.constant 0 : index
    %c0_84 = arith.constant 0 : index
    %238 = vector.load %arg3[%c6, %c0_83, %c0_84] : memref<9x16x128xf32, #tpu.memory_space<vmem>>, vector<1x16x128xf32>
    %239 = vector.shape_cast %238 : vector<1x16x128xf32> to vector<16x128xf32>
    %240 = vector.shape_cast %239 : vector<16x128xf32> to vector<1x16x128xf32>
    %241 = vector.broadcast %240 : vector<1x16x128xf32> to vector<8x16x128xf32>
    %242 = arith.mulf %237, %241 : vector<8x16x128xf32>
    %243 = arith.addf %235, %242 : vector<8x16x128xf32>
    %c7 = arith.constant 7 : index
    %c0_85 = arith.constant 0 : index
    %c0_86 = arith.constant 0 : index
    %244 = vector.load %arg3[%c7, %c0_85, %c0_86] : memref<9x16x128xf32, #tpu.memory_space<vmem>>, vector<1x16x128xf32>
    %245 = vector.shape_cast %244 : vector<1x16x128xf32> to vector<16x128xf32>
    %246 = vector.shape_cast %245 : vector<16x128xf32> to vector<1x16x128xf32>
    %247 = vector.broadcast %246 : vector<1x16x128xf32> to vector<8x16x128xf32>
    %248 = arith.mulf %236, %247 : vector<8x16x128xf32>
    %249 = arith.addf %243, %248 : vector<8x16x128xf32>
    %c120_i32_87 = arith.constant 120 : i32
    %250 = tpu.dynamic_rotate %236 by %c120_i32_87 dim 2 : vector<8x16x128xf32>, i32 -> vector<8x16x128xf32>
    %c8 = arith.constant 8 : index
    %c0_88 = arith.constant 0 : index
    %c0_89 = arith.constant 0 : index
    %251 = vector.load %arg3[%c8, %c0_88, %c0_89] : memref<9x16x128xf32, #tpu.memory_space<vmem>>, vector<1x16x128xf32>
    %252 = vector.shape_cast %251 : vector<1x16x128xf32> to vector<16x128xf32>
    %253 = vector.shape_cast %252 : vector<16x128xf32> to vector<1x16x128xf32>
    %254 = vector.broadcast %253 : vector<1x16x128xf32> to vector<8x16x128xf32>
    %255 = arith.mulf %250, %254 : vector<8x16x128xf32>
    %256 = arith.addf %249, %255 : vector<8x16x128xf32>
    %257 = vector.shape_cast %256 : vector<8x16x128xf32> to vector<128x128xf32>
    %258 = arith.truncf %257 : vector<128x128xf32> to vector<128x128xbf16>
    %c0_90 = arith.constant 0 : index
    %c0_91 = arith.constant 0 : index
    %259 = vector.load %arg4[%c0_90, %c0_91] : memref<128x128xbf16, #tpu.memory_space<vmem>>, vector<128x128xbf16>
    %cst_92 = arith.constant dense<0.000000e+00> : vector<128x128xf32>
    %260 = tpu.matmul %258, %259, %cst_92 {dimension_numbers = #tpu.dot_dimension_numbers<[1], [0], [0], [1], [0, 0, 1, 1], [], []>} : vector<128x128xbf16>, vector<128x128xbf16>, vector<128x128xf32> -> vector<128x128xf32>
    %c0_93 = arith.constant 0 : index
    %c0_94 = arith.constant 0 : index
    %261 = vector.load %arg5[%c0_93, %c0_94] : memref<1x128xf32, #tpu.memory_space<vmem>>, vector<1x128xf32>
    %262 = vector.broadcast %261 : vector<1x128xf32> to vector<128x128xf32>
    %263 = arith.addf %260, %262 : vector<128x128xf32>
    %264 = vector.shape_cast %263 : vector<128x128xf32> to vector<2x4x16x128xf32>
    %c0_95 = arith.constant 0 : index
    %c0_96 = arith.constant 0 : index
    %265 = memref.load %arg1[%c0_95, %c0_96] : memref<4x4xf32, #tpu.memory_space<smem>>
    %266 = vector.extract_strided_slice %264 {offsets = [0, 0, 0, 0], sizes = [1, 1, 16, 128], strides = [1, 1, 1, 1]} : vector<2x4x16x128xf32> to vector<1x1x16x128xf32>
    %267 = vector.shape_cast %266 : vector<1x1x16x128xf32> to vector<16x128xf32>
    %268 = vector.broadcast %265 : f32 to vector<16x128xf32>
    %269 = arith.mulf %268, %267 : vector<16x128xf32>
    %c0_97 = arith.constant 0 : index
    %c1_98 = arith.constant 1 : index
    %270 = memref.load %arg1[%c0_97, %c1_98] : memref<4x4xf32, #tpu.memory_space<smem>>
    %271 = vector.extract_strided_slice %264 {offsets = [0, 1, 0, 0], sizes = [1, 1, 16, 128], strides = [1, 1, 1, 1]} : vector<2x4x16x128xf32> to vector<1x1x16x128xf32>
    %272 = vector.shape_cast %271 : vector<1x1x16x128xf32> to vector<16x128xf32>
    %273 = vector.broadcast %270 : f32 to vector<16x128xf32>
    %274 = arith.mulf %273, %272 : vector<16x128xf32>
    %275 = arith.addf %269, %274 : vector<16x128xf32>
    %c0_99 = arith.constant 0 : index
    %c2_100 = arith.constant 2 : index
    %276 = memref.load %arg1[%c0_99, %c2_100] : memref<4x4xf32, #tpu.memory_space<smem>>
    %277 = vector.extract_strided_slice %264 {offsets = [0, 2, 0, 0], sizes = [1, 1, 16, 128], strides = [1, 1, 1, 1]} : vector<2x4x16x128xf32> to vector<1x1x16x128xf32>
    %278 = vector.shape_cast %277 : vector<1x1x16x128xf32> to vector<16x128xf32>
    %279 = vector.broadcast %276 : f32 to vector<16x128xf32>
    %280 = arith.mulf %279, %278 : vector<16x128xf32>
    %281 = arith.addf %275, %280 : vector<16x128xf32>
    %c0_101 = arith.constant 0 : index
    %c3_102 = arith.constant 3 : index
    %282 = memref.load %arg1[%c0_101, %c3_102] : memref<4x4xf32, #tpu.memory_space<smem>>
    %283 = vector.extract_strided_slice %264 {offsets = [0, 3, 0, 0], sizes = [1, 1, 16, 128], strides = [1, 1, 1, 1]} : vector<2x4x16x128xf32> to vector<1x1x16x128xf32>
    %284 = vector.shape_cast %283 : vector<1x1x16x128xf32> to vector<16x128xf32>
    %285 = vector.broadcast %282 : f32 to vector<16x128xf32>
    %286 = arith.mulf %285, %284 : vector<16x128xf32>
    %287 = arith.addf %281, %286 : vector<16x128xf32>
    %c1_103 = arith.constant 1 : index
    %c0_104 = arith.constant 0 : index
    %288 = memref.load %arg1[%c1_103, %c0_104] : memref<4x4xf32, #tpu.memory_space<smem>>
    %289 = vector.extract_strided_slice %264 {offsets = [0, 0, 0, 0], sizes = [1, 1, 16, 128], strides = [1, 1, 1, 1]} : vector<2x4x16x128xf32> to vector<1x1x16x128xf32>
    %290 = vector.shape_cast %289 : vector<1x1x16x128xf32> to vector<16x128xf32>
    %291 = vector.broadcast %288 : f32 to vector<16x128xf32>
    %292 = arith.mulf %291, %290 : vector<16x128xf32>
    %c1_105 = arith.constant 1 : index
    %c1_106 = arith.constant 1 : index
    %293 = memref.load %arg1[%c1_105, %c1_106] : memref<4x4xf32, #tpu.memory_space<smem>>
    %294 = vector.extract_strided_slice %264 {offsets = [0, 1, 0, 0], sizes = [1, 1, 16, 128], strides = [1, 1, 1, 1]} : vector<2x4x16x128xf32> to vector<1x1x16x128xf32>
    %295 = vector.shape_cast %294 : vector<1x1x16x128xf32> to vector<16x128xf32>
    %296 = vector.broadcast %293 : f32 to vector<16x128xf32>
    %297 = arith.mulf %296, %295 : vector<16x128xf32>
    %298 = arith.addf %292, %297 : vector<16x128xf32>
    %c1_107 = arith.constant 1 : index
    %c2_108 = arith.constant 2 : index
    %299 = memref.load %arg1[%c1_107, %c2_108] : memref<4x4xf32, #tpu.memory_space<smem>>
    %300 = vector.extract_strided_slice %264 {offsets = [0, 2, 0, 0], sizes = [1, 1, 16, 128], strides = [1, 1, 1, 1]} : vector<2x4x16x128xf32> to vector<1x1x16x128xf32>
    %301 = vector.shape_cast %300 : vector<1x1x16x128xf32> to vector<16x128xf32>
    %302 = vector.broadcast %299 : f32 to vector<16x128xf32>
    %303 = arith.mulf %302, %301 : vector<16x128xf32>
    %304 = arith.addf %298, %303 : vector<16x128xf32>
    %c1_109 = arith.constant 1 : index
    %c3_110 = arith.constant 3 : index
    %305 = memref.load %arg1[%c1_109, %c3_110] : memref<4x4xf32, #tpu.memory_space<smem>>
    %306 = vector.extract_strided_slice %264 {offsets = [0, 3, 0, 0], sizes = [1, 1, 16, 128], strides = [1, 1, 1, 1]} : vector<2x4x16x128xf32> to vector<1x1x16x128xf32>
    %307 = vector.shape_cast %306 : vector<1x1x16x128xf32> to vector<16x128xf32>
    %308 = vector.broadcast %305 : f32 to vector<16x128xf32>
    %309 = arith.mulf %308, %307 : vector<16x128xf32>
    %310 = arith.addf %304, %309 : vector<16x128xf32>
    %c2_111 = arith.constant 2 : index
    %c0_112 = arith.constant 0 : index
    %311 = memref.load %arg1[%c2_111, %c0_112] : memref<4x4xf32, #tpu.memory_space<smem>>
    %312 = vector.extract_strided_slice %264 {offsets = [0, 0, 0, 0], sizes = [1, 1, 16, 128], strides = [1, 1, 1, 1]} : vector<2x4x16x128xf32> to vector<1x1x16x128xf32>
    %313 = vector.shape_cast %312 : vector<1x1x16x128xf32> to vector<16x128xf32>
    %314 = vector.broadcast %311 : f32 to vector<16x128xf32>
    %315 = arith.mulf %314, %313 : vector<16x128xf32>
    %c2_113 = arith.constant 2 : index
    %c1_114 = arith.constant 1 : index
    %316 = memref.load %arg1[%c2_113, %c1_114] : memref<4x4xf32, #tpu.memory_space<smem>>
    %317 = vector.extract_strided_slice %264 {offsets = [0, 1, 0, 0], sizes = [1, 1, 16, 128], strides = [1, 1, 1, 1]} : vector<2x4x16x128xf32> to vector<1x1x16x128xf32>
    %318 = vector.shape_cast %317 : vector<1x1x16x128xf32> to vector<16x128xf32>
    %319 = vector.broadcast %316 : f32 to vector<16x128xf32>
    %320 = arith.mulf %319, %318 : vector<16x128xf32>
    %321 = arith.addf %315, %320 : vector<16x128xf32>
    %c2_115 = arith.constant 2 : index
    %c2_116 = arith.constant 2 : index
    %322 = memref.load %arg1[%c2_115, %c2_116] : memref<4x4xf32, #tpu.memory_space<smem>>
    %323 = vector.extract_strided_slice %264 {offsets = [0, 2, 0, 0], sizes = [1, 1, 16, 128], strides = [1, 1, 1, 1]} : vector<2x4x16x128xf32> to vector<1x1x16x128xf32>
    %324 = vector.shape_cast %323 : vector<1x1x16x128xf32> to vector<16x128xf32>
    %325 = vector.broadcast %322 : f32 to vector<16x128xf32>
    %326 = arith.mulf %325, %324 : vector<16x128xf32>
    %327 = arith.addf %321, %326 : vector<16x128xf32>
    %c2_117 = arith.constant 2 : index
    %c3_118 = arith.constant 3 : index
    %328 = memref.load %arg1[%c2_117, %c3_118] : memref<4x4xf32, #tpu.memory_space<smem>>
    %329 = vector.extract_strided_slice %264 {offsets = [0, 3, 0, 0], sizes = [1, 1, 16, 128], strides = [1, 1, 1, 1]} : vector<2x4x16x128xf32> to vector<1x1x16x128xf32>
    %330 = vector.shape_cast %329 : vector<1x1x16x128xf32> to vector<16x128xf32>
    %331 = vector.broadcast %328 : f32 to vector<16x128xf32>
    %332 = arith.mulf %331, %330 : vector<16x128xf32>
    %333 = arith.addf %327, %332 : vector<16x128xf32>
    %c3_119 = arith.constant 3 : index
    %c0_120 = arith.constant 0 : index
    %334 = memref.load %arg1[%c3_119, %c0_120] : memref<4x4xf32, #tpu.memory_space<smem>>
    %335 = vector.extract_strided_slice %264 {offsets = [0, 0, 0, 0], sizes = [1, 1, 16, 128], strides = [1, 1, 1, 1]} : vector<2x4x16x128xf32> to vector<1x1x16x128xf32>
    %336 = vector.shape_cast %335 : vector<1x1x16x128xf32> to vector<16x128xf32>
    %337 = vector.broadcast %334 : f32 to vector<16x128xf32>
    %338 = arith.mulf %337, %336 : vector<16x128xf32>
    %c3_121 = arith.constant 3 : index
    %c1_122 = arith.constant 1 : index
    %339 = memref.load %arg1[%c3_121, %c1_122] : memref<4x4xf32, #tpu.memory_space<smem>>
    %340 = vector.extract_strided_slice %264 {offsets = [0, 1, 0, 0], sizes = [1, 1, 16, 128], strides = [1, 1, 1, 1]} : vector<2x4x16x128xf32> to vector<1x1x16x128xf32>
    %341 = vector.shape_cast %340 : vector<1x1x16x128xf32> to vector<16x128xf32>
    %342 = vector.broadcast %339 : f32 to vector<16x128xf32>
    %343 = arith.mulf %342, %341 : vector<16x128xf32>
    %344 = arith.addf %338, %343 : vector<16x128xf32>
    %c3_123 = arith.constant 3 : index
    %c2_124 = arith.constant 2 : index
    %345 = memref.load %arg1[%c3_123, %c2_124] : memref<4x4xf32, #tpu.memory_space<smem>>
    %346 = vector.extract_strided_slice %264 {offsets = [0, 2, 0, 0], sizes = [1, 1, 16, 128], strides = [1, 1, 1, 1]} : vector<2x4x16x128xf32> to vector<1x1x16x128xf32>
    %347 = vector.shape_cast %346 : vector<1x1x16x128xf32> to vector<16x128xf32>
    %348 = vector.broadcast %345 : f32 to vector<16x128xf32>
    %349 = arith.mulf %348, %347 : vector<16x128xf32>
    %350 = arith.addf %344, %349 : vector<16x128xf32>
    %c3_125 = arith.constant 3 : index
    %c3_126 = arith.constant 3 : index
    %351 = memref.load %arg1[%c3_125, %c3_126] : memref<4x4xf32, #tpu.memory_space<smem>>
    %352 = vector.extract_strided_slice %264 {offsets = [0, 3, 0, 0], sizes = [1, 1, 16, 128], strides = [1, 1, 1, 1]} : vector<2x4x16x128xf32> to vector<1x1x16x128xf32>
    %353 = vector.shape_cast %352 : vector<1x1x16x128xf32> to vector<16x128xf32>
    %354 = vector.broadcast %351 : f32 to vector<16x128xf32>
    %355 = arith.mulf %354, %353 : vector<16x128xf32>
    %356 = arith.addf %350, %355 : vector<16x128xf32>
    %c0_127 = arith.constant 0 : index
    %c0_128 = arith.constant 0 : index
    %357 = memref.load %arg1[%c0_127, %c0_128] : memref<4x4xf32, #tpu.memory_space<smem>>
    %358 = vector.extract_strided_slice %264 {offsets = [1, 0, 0, 0], sizes = [1, 1, 16, 128], strides = [1, 1, 1, 1]} : vector<2x4x16x128xf32> to vector<1x1x16x128xf32>
    %359 = vector.shape_cast %358 : vector<1x1x16x128xf32> to vector<16x128xf32>
    %360 = vector.broadcast %357 : f32 to vector<16x128xf32>
    %361 = arith.mulf %360, %359 : vector<16x128xf32>
    %c0_129 = arith.constant 0 : index
    %c1_130 = arith.constant 1 : index
    %362 = memref.load %arg1[%c0_129, %c1_130] : memref<4x4xf32, #tpu.memory_space<smem>>
    %363 = vector.extract_strided_slice %264 {offsets = [1, 1, 0, 0], sizes = [1, 1, 16, 128], strides = [1, 1, 1, 1]} : vector<2x4x16x128xf32> to vector<1x1x16x128xf32>
    %364 = vector.shape_cast %363 : vector<1x1x16x128xf32> to vector<16x128xf32>
    %365 = vector.broadcast %362 : f32 to vector<16x128xf32>
    %366 = arith.mulf %365, %364 : vector<16x128xf32>
    %367 = arith.addf %361, %366 : vector<16x128xf32>
    %c0_131 = arith.constant 0 : index
    %c2_132 = arith.constant 2 : index
    %368 = memref.load %arg1[%c0_131, %c2_132] : memref<4x4xf32, #tpu.memory_space<smem>>
    %369 = vector.extract_strided_slice %264 {offsets = [1, 2, 0, 0], sizes = [1, 1, 16, 128], strides = [1, 1, 1, 1]} : vector<2x4x16x128xf32> to vector<1x1x16x128xf32>
    %370 = vector.shape_cast %369 : vector<1x1x16x128xf32> to vector<16x128xf32>
    %371 = vector.broadcast %368 : f32 to vector<16x128xf32>
    %372 = arith.mulf %371, %370 : vector<16x128xf32>
    %373 = arith.addf %367, %372 : vector<16x128xf32>
    %c0_133 = arith.constant 0 : index
    %c3_134 = arith.constant 3 : index
    %374 = memref.load %arg1[%c0_133, %c3_134] : memref<4x4xf32, #tpu.memory_space<smem>>
    %375 = vector.extract_strided_slice %264 {offsets = [1, 3, 0, 0], sizes = [1, 1, 16, 128], strides = [1, 1, 1, 1]} : vector<2x4x16x128xf32> to vector<1x1x16x128xf32>
    %376 = vector.shape_cast %375 : vector<1x1x16x128xf32> to vector<16x128xf32>
    %377 = vector.broadcast %374 : f32 to vector<16x128xf32>
    %378 = arith.mulf %377, %376 : vector<16x128xf32>
    %379 = arith.addf %373, %378 : vector<16x128xf32>
    %c1_135 = arith.constant 1 : index
    %c0_136 = arith.constant 0 : index
    %380 = memref.load %arg1[%c1_135, %c0_136] : memref<4x4xf32, #tpu.memory_space<smem>>
    %381 = vector.extract_strided_slice %264 {offsets = [1, 0, 0, 0], sizes = [1, 1, 16, 128], strides = [1, 1, 1, 1]} : vector<2x4x16x128xf32> to vector<1x1x16x128xf32>
    %382 = vector.shape_cast %381 : vector<1x1x16x128xf32> to vector<16x128xf32>
    %383 = vector.broadcast %380 : f32 to vector<16x128xf32>
    %384 = arith.mulf %383, %382 : vector<16x128xf32>
    %c1_137 = arith.constant 1 : index
    %c1_138 = arith.constant 1 : index
    %385 = memref.load %arg1[%c1_137, %c1_138] : memref<4x4xf32, #tpu.memory_space<smem>>
    %386 = vector.extract_strided_slice %264 {offsets = [1, 1, 0, 0], sizes = [1, 1, 16, 128], strides = [1, 1, 1, 1]} : vector<2x4x16x128xf32> to vector<1x1x16x128xf32>
    %387 = vector.shape_cast %386 : vector<1x1x16x128xf32> to vector<16x128xf32>
    %388 = vector.broadcast %385 : f32 to vector<16x128xf32>
    %389 = arith.mulf %388, %387 : vector<16x128xf32>
    %390 = arith.addf %384, %389 : vector<16x128xf32>
    %c1_139 = arith.constant 1 : index
    %c2_140 = arith.constant 2 : index
    %391 = memref.load %arg1[%c1_139, %c2_140] : memref<4x4xf32, #tpu.memory_space<smem>>
    %392 = vector.extract_strided_slice %264 {offsets = [1, 2, 0, 0], sizes = [1, 1, 16, 128], strides = [1, 1, 1, 1]} : vector<2x4x16x128xf32> to vector<1x1x16x128xf32>
    %393 = vector.shape_cast %392 : vector<1x1x16x128xf32> to vector<16x128xf32>
    %394 = vector.broadcast %391 : f32 to vector<16x128xf32>
    %395 = arith.mulf %394, %393 : vector<16x128xf32>
    %396 = arith.addf %390, %395 : vector<16x128xf32>
    %c1_141 = arith.constant 1 : index
    %c3_142 = arith.constant 3 : index
    %397 = memref.load %arg1[%c1_141, %c3_142] : memref<4x4xf32, #tpu.memory_space<smem>>
    %398 = vector.extract_strided_slice %264 {offsets = [1, 3, 0, 0], sizes = [1, 1, 16, 128], strides = [1, 1, 1, 1]} : vector<2x4x16x128xf32> to vector<1x1x16x128xf32>
    %399 = vector.shape_cast %398 : vector<1x1x16x128xf32> to vector<16x128xf32>
    %400 = vector.broadcast %397 : f32 to vector<16x128xf32>
    %401 = arith.mulf %400, %399 : vector<16x128xf32>
    %402 = arith.addf %396, %401 : vector<16x128xf32>
    %c2_143 = arith.constant 2 : index
    %c0_144 = arith.constant 0 : index
    %403 = memref.load %arg1[%c2_143, %c0_144] : memref<4x4xf32, #tpu.memory_space<smem>>
    %404 = vector.extract_strided_slice %264 {offsets = [1, 0, 0, 0], sizes = [1, 1, 16, 128], strides = [1, 1, 1, 1]} : vector<2x4x16x128xf32> to vector<1x1x16x128xf32>
    %405 = vector.shape_cast %404 : vector<1x1x16x128xf32> to vector<16x128xf32>
    %406 = vector.broadcast %403 : f32 to vector<16x128xf32>
    %407 = arith.mulf %406, %405 : vector<16x128xf32>
    %c2_145 = arith.constant 2 : index
    %c1_146 = arith.constant 1 : index
    %408 = memref.load %arg1[%c2_145, %c1_146] : memref<4x4xf32, #tpu.memory_space<smem>>
    %409 = vector.extract_strided_slice %264 {offsets = [1, 1, 0, 0], sizes = [1, 1, 16, 128], strides = [1, 1, 1, 1]} : vector<2x4x16x128xf32> to vector<1x1x16x128xf32>
    %410 = vector.shape_cast %409 : vector<1x1x16x128xf32> to vector<16x128xf32>
    %411 = vector.broadcast %408 : f32 to vector<16x128xf32>
    %412 = arith.mulf %411, %410 : vector<16x128xf32>
    %413 = arith.addf %407, %412 : vector<16x128xf32>
    %c2_147 = arith.constant 2 : index
    %c2_148 = arith.constant 2 : index
    %414 = memref.load %arg1[%c2_147, %c2_148] : memref<4x4xf32, #tpu.memory_space<smem>>
    %415 = vector.extract_strided_slice %264 {offsets = [1, 2, 0, 0], sizes = [1, 1, 16, 128], strides = [1, 1, 1, 1]} : vector<2x4x16x128xf32> to vector<1x1x16x128xf32>
    %416 = vector.shape_cast %415 : vector<1x1x16x128xf32> to vector<16x128xf32>
    %417 = vector.broadcast %414 : f32 to vector<16x128xf32>
    %418 = arith.mulf %417, %416 : vector<16x128xf32>
    %419 = arith.addf %413, %418 : vector<16x128xf32>
    %c2_149 = arith.constant 2 : index
    %c3_150 = arith.constant 3 : index
    %420 = memref.load %arg1[%c2_149, %c3_150] : memref<4x4xf32, #tpu.memory_space<smem>>
    %421 = vector.extract_strided_slice %264 {offsets = [1, 3, 0, 0], sizes = [1, 1, 16, 128], strides = [1, 1, 1, 1]} : vector<2x4x16x128xf32> to vector<1x1x16x128xf32>
    %422 = vector.shape_cast %421 : vector<1x1x16x128xf32> to vector<16x128xf32>
    %423 = vector.broadcast %420 : f32 to vector<16x128xf32>
    %424 = arith.mulf %423, %422 : vector<16x128xf32>
    %425 = arith.addf %419, %424 : vector<16x128xf32>
    %c3_151 = arith.constant 3 : index
    %c0_152 = arith.constant 0 : index
    %426 = memref.load %arg1[%c3_151, %c0_152] : memref<4x4xf32, #tpu.memory_space<smem>>
    %427 = vector.extract_strided_slice %264 {offsets = [1, 0, 0, 0], sizes = [1, 1, 16, 128], strides = [1, 1, 1, 1]} : vector<2x4x16x128xf32> to vector<1x1x16x128xf32>
    %428 = vector.shape_cast %427 : vector<1x1x16x128xf32> to vector<16x128xf32>
    %429 = vector.broadcast %426 : f32 to vector<16x128xf32>
    %430 = arith.mulf %429, %428 : vector<16x128xf32>
    %c3_153 = arith.constant 3 : index
    %c1_154 = arith.constant 1 : index
    %431 = memref.load %arg1[%c3_153, %c1_154] : memref<4x4xf32, #tpu.memory_space<smem>>
    %432 = vector.extract_strided_slice %264 {offsets = [1, 1, 0, 0], sizes = [1, 1, 16, 128], strides = [1, 1, 1, 1]} : vector<2x4x16x128xf32> to vector<1x1x16x128xf32>
    %433 = vector.shape_cast %432 : vector<1x1x16x128xf32> to vector<16x128xf32>
    %434 = vector.broadcast %431 : f32 to vector<16x128xf32>
    %435 = arith.mulf %434, %433 : vector<16x128xf32>
    %436 = arith.addf %430, %435 : vector<16x128xf32>
    %c3_155 = arith.constant 3 : index
    %c2_156 = arith.constant 2 : index
    %437 = memref.load %arg1[%c3_155, %c2_156] : memref<4x4xf32, #tpu.memory_space<smem>>
    %438 = vector.extract_strided_slice %264 {offsets = [1, 2, 0, 0], sizes = [1, 1, 16, 128], strides = [1, 1, 1, 1]} : vector<2x4x16x128xf32> to vector<1x1x16x128xf32>
    %439 = vector.shape_cast %438 : vector<1x1x16x128xf32> to vector<16x128xf32>
    %440 = vector.broadcast %437 : f32 to vector<16x128xf32>
    %441 = arith.mulf %440, %439 : vector<16x128xf32>
    %442 = arith.addf %436, %441 : vector<16x128xf32>
    %c3_157 = arith.constant 3 : index
    %c3_158 = arith.constant 3 : index
    %443 = memref.load %arg1[%c3_157, %c3_158] : memref<4x4xf32, #tpu.memory_space<smem>>
    %444 = vector.extract_strided_slice %264 {offsets = [1, 3, 0, 0], sizes = [1, 1, 16, 128], strides = [1, 1, 1, 1]} : vector<2x4x16x128xf32> to vector<1x1x16x128xf32>
    %445 = vector.shape_cast %444 : vector<1x1x16x128xf32> to vector<16x128xf32>
    %446 = vector.broadcast %443 : f32 to vector<16x128xf32>
    %447 = arith.mulf %446, %445 : vector<16x128xf32>
    %448 = arith.addf %442, %447 : vector<16x128xf32>
    %449 = vector.shape_cast %287 : vector<16x128xf32> to vector<1x16x128xf32>
    %450 = vector.shape_cast %310 : vector<16x128xf32> to vector<1x16x128xf32>
    %451 = vector.shape_cast %333 : vector<16x128xf32> to vector<1x16x128xf32>
    %452 = vector.shape_cast %356 : vector<16x128xf32> to vector<1x16x128xf32>
    %453 = vector.shape_cast %379 : vector<16x128xf32> to vector<1x16x128xf32>
    %454 = vector.shape_cast %402 : vector<16x128xf32> to vector<1x16x128xf32>
    %455 = vector.shape_cast %425 : vector<16x128xf32> to vector<1x16x128xf32>
    %456 = vector.shape_cast %448 : vector<16x128xf32> to vector<1x16x128xf32>
    %457 = tpu.concatenate %449, %450, %451, %452, %453, %454, %455, %456 in 0 : vector<1x16x128xf32>, vector<1x16x128xf32>, vector<1x16x128xf32>, vector<1x16x128xf32>, vector<1x16x128xf32>, vector<1x16x128xf32>, vector<1x16x128xf32>, vector<1x16x128xf32> -> vector<8x16x128xf32>
    %cst_159 = arith.constant 0.000000e+00 : f32
    %458 = vector.broadcast %cst_159 : f32 to vector<8x16x128xf32>
    %c1_i32_160 = arith.constant 1 : i32
    %459 = tpu.dynamic_rotate %457 by %c1_i32_160 dim 1 : vector<8x16x128xf32>, i32 -> vector<8x16x128xf32>
    %c8_i32_161 = arith.constant 8 : i32
    %460 = tpu.dynamic_rotate %459 by %c8_i32_161 dim 2 : vector<8x16x128xf32>, i32 -> vector<8x16x128xf32>
    %c0_162 = arith.constant 0 : index
    %c0_163 = arith.constant 0 : index
    %c0_164 = arith.constant 0 : index
    %461 = vector.load %arg6[%c0_162, %c0_163, %c0_164] : memref<9x16x128xf32, #tpu.memory_space<vmem>>, vector<1x16x128xf32>
    %462 = vector.shape_cast %461 : vector<1x16x128xf32> to vector<16x128xf32>
    %463 = vector.shape_cast %462 : vector<16x128xf32> to vector<1x16x128xf32>
    %464 = vector.broadcast %463 : vector<1x16x128xf32> to vector<8x16x128xf32>
    %465 = arith.mulf %460, %464 : vector<8x16x128xf32>
    %466 = arith.addf %458, %465 : vector<8x16x128xf32>
    %c1_165 = arith.constant 1 : index
    %c0_166 = arith.constant 0 : index
    %c0_167 = arith.constant 0 : index
    %467 = vector.load %arg6[%c1_165, %c0_166, %c0_167] : memref<9x16x128xf32, #tpu.memory_space<vmem>>, vector<1x16x128xf32>
    %468 = vector.shape_cast %467 : vector<1x16x128xf32> to vector<16x128xf32>
    %469 = vector.shape_cast %468 : vector<16x128xf32> to vector<1x16x128xf32>
    %470 = vector.broadcast %469 : vector<1x16x128xf32> to vector<8x16x128xf32>
    %471 = arith.mulf %459, %470 : vector<8x16x128xf32>
    %472 = arith.addf %466, %471 : vector<8x16x128xf32>
    %c120_i32_168 = arith.constant 120 : i32
    %473 = tpu.dynamic_rotate %459 by %c120_i32_168 dim 2 : vector<8x16x128xf32>, i32 -> vector<8x16x128xf32>
    %c2_169 = arith.constant 2 : index
    %c0_170 = arith.constant 0 : index
    %c0_171 = arith.constant 0 : index
    %474 = vector.load %arg6[%c2_169, %c0_170, %c0_171] : memref<9x16x128xf32, #tpu.memory_space<vmem>>, vector<1x16x128xf32>
    %475 = vector.shape_cast %474 : vector<1x16x128xf32> to vector<16x128xf32>
    %476 = vector.shape_cast %475 : vector<16x128xf32> to vector<1x16x128xf32>
    %477 = vector.broadcast %476 : vector<1x16x128xf32> to vector<8x16x128xf32>
    %478 = arith.mulf %473, %477 : vector<8x16x128xf32>
    %479 = arith.addf %472, %478 : vector<8x16x128xf32>
    %c8_i32_172 = arith.constant 8 : i32
    %480 = tpu.dynamic_rotate %457 by %c8_i32_172 dim 2 : vector<8x16x128xf32>, i32 -> vector<8x16x128xf32>
    %c3_173 = arith.constant 3 : index
    %c0_174 = arith.constant 0 : index
    %c0_175 = arith.constant 0 : index
    %481 = vector.load %arg6[%c3_173, %c0_174, %c0_175] : memref<9x16x128xf32, #tpu.memory_space<vmem>>, vector<1x16x128xf32>
    %482 = vector.shape_cast %481 : vector<1x16x128xf32> to vector<16x128xf32>
    %483 = vector.shape_cast %482 : vector<16x128xf32> to vector<1x16x128xf32>
    %484 = vector.broadcast %483 : vector<1x16x128xf32> to vector<8x16x128xf32>
    %485 = arith.mulf %480, %484 : vector<8x16x128xf32>
    %486 = arith.addf %479, %485 : vector<8x16x128xf32>
    %c4_176 = arith.constant 4 : index
    %c0_177 = arith.constant 0 : index
    %c0_178 = arith.constant 0 : index
    %487 = vector.load %arg6[%c4_176, %c0_177, %c0_178] : memref<9x16x128xf32, #tpu.memory_space<vmem>>, vector<1x16x128xf32>
    %488 = vector.shape_cast %487 : vector<1x16x128xf32> to vector<16x128xf32>
    %489 = vector.shape_cast %488 : vector<16x128xf32> to vector<1x16x128xf32>
    %490 = vector.broadcast %489 : vector<1x16x128xf32> to vector<8x16x128xf32>
    %491 = arith.mulf %457, %490 : vector<8x16x128xf32>
    %492 = arith.addf %486, %491 : vector<8x16x128xf32>
    %c120_i32_179 = arith.constant 120 : i32
    %493 = tpu.dynamic_rotate %457 by %c120_i32_179 dim 2 : vector<8x16x128xf32>, i32 -> vector<8x16x128xf32>
    %c5_180 = arith.constant 5 : index
    %c0_181 = arith.constant 0 : index
    %c0_182 = arith.constant 0 : index
    %494 = vector.load %arg6[%c5_180, %c0_181, %c0_182] : memref<9x16x128xf32, #tpu.memory_space<vmem>>, vector<1x16x128xf32>
    %495 = vector.shape_cast %494 : vector<1x16x128xf32> to vector<16x128xf32>
    %496 = vector.shape_cast %495 : vector<16x128xf32> to vector<1x16x128xf32>
    %497 = vector.broadcast %496 : vector<1x16x128xf32> to vector<8x16x128xf32>
    %498 = arith.mulf %493, %497 : vector<8x16x128xf32>
    %499 = arith.addf %492, %498 : vector<8x16x128xf32>
    %c15_i32_183 = arith.constant 15 : i32
    %500 = tpu.dynamic_rotate %457 by %c15_i32_183 dim 1 : vector<8x16x128xf32>, i32 -> vector<8x16x128xf32>
    %c8_i32_184 = arith.constant 8 : i32
    %501 = tpu.dynamic_rotate %500 by %c8_i32_184 dim 2 : vector<8x16x128xf32>, i32 -> vector<8x16x128xf32>
    %c6_185 = arith.constant 6 : index
    %c0_186 = arith.constant 0 : index
    %c0_187 = arith.constant 0 : index
    %502 = vector.load %arg6[%c6_185, %c0_186, %c0_187] : memref<9x16x128xf32, #tpu.memory_space<vmem>>, vector<1x16x128xf32>
    %503 = vector.shape_cast %502 : vector<1x16x128xf32> to vector<16x128xf32>
    %504 = vector.shape_cast %503 : vector<16x128xf32> to vector<1x16x128xf32>
    %505 = vector.broadcast %504 : vector<1x16x128xf32> to vector<8x16x128xf32>
    %506 = arith.mulf %501, %505 : vector<8x16x128xf32>
    %507 = arith.addf %499, %506 : vector<8x16x128xf32>
    %c7_188 = arith.constant 7 : index
    %c0_189 = arith.constant 0 : index
    %c0_190 = arith.constant 0 : index
    %508 = vector.load %arg6[%c7_188, %c0_189, %c0_190] : memref<9x16x128xf32, #tpu.memory_space<vmem>>, vector<1x16x128xf32>
    %509 = vector.shape_cast %508 : vector<1x16x128xf32> to vector<16x128xf32>
    %510 = vector.shape_cast %509 : vector<16x128xf32> to vector<1x16x128xf32>
    %511 = vector.broadcast %510 : vector<1x16x128xf32> to vector<8x16x128xf32>
    %512 = arith.mulf %500, %511 : vector<8x16x128xf32>
    %513 = arith.addf %507, %512 : vector<8x16x128xf32>
    %c120_i32_191 = arith.constant 120 : i32
    %514 = tpu.dynamic_rotate %500 by %c120_i32_191 dim 2 : vector<8x16x128xf32>, i32 -> vector<8x16x128xf32>
    %c8_192 = arith.constant 8 : index
    %c0_193 = arith.constant 0 : index
    %c0_194 = arith.constant 0 : index
    %515 = vector.load %arg6[%c8_192, %c0_193, %c0_194] : memref<9x16x128xf32, #tpu.memory_space<vmem>>, vector<1x16x128xf32>
    %516 = vector.shape_cast %515 : vector<1x16x128xf32> to vector<16x128xf32>
    %517 = vector.shape_cast %516 : vector<16x128xf32> to vector<1x16x128xf32>
    %518 = vector.broadcast %517 : vector<1x16x128xf32> to vector<8x16x128xf32>
    %519 = arith.mulf %514, %518 : vector<8x16x128xf32>
    %520 = arith.addf %513, %519 : vector<8x16x128xf32>
    %521 = vector.shape_cast %520 : vector<8x16x128xf32> to vector<128x128xf32>
    %522 = arith.truncf %521 : vector<128x128xf32> to vector<128x128xbf16>
    %c0_195 = arith.constant 0 : index
    %c0_196 = arith.constant 0 : index
    %523 = vector.load %arg7[%c0_195, %c0_196] : memref<128x128xbf16, #tpu.memory_space<vmem>>, vector<128x128xbf16>
    %cst_197 = arith.constant dense<0.000000e+00> : vector<128x128xf32>
    %524 = tpu.matmul %522, %523, %cst_197 {dimension_numbers = #tpu.dot_dimension_numbers<[1], [0], [0], [1], [0, 0, 1, 1], [], []>} : vector<128x128xbf16>, vector<128x128xbf16>, vector<128x128xf32> -> vector<128x128xf32>
    %c0_198 = arith.constant 0 : index
    %c0_199 = arith.constant 0 : index
    %525 = vector.load %arg8[%c0_198, %c0_199] : memref<1x128xf32, #tpu.memory_space<vmem>>, vector<1x128xf32>
    %526 = vector.broadcast %525 : vector<1x128xf32> to vector<128x128xf32>
    %527 = arith.addf %524, %526 : vector<128x128xf32>
    %528 = vector.shape_cast %527 : vector<128x128xf32> to vector<2x4x16x128xf32>
    %c0_200 = arith.constant 0 : index
    %c0_201 = arith.constant 0 : index
    %c0_202 = arith.constant 0 : index
    %c0_203 = arith.constant 0 : index
    %529 = vector.load %arg9[%c0_200, %c0_201, %c0_202, %c0_203] : memref<2x4x16x128xf32, #tpu.memory_space<vmem>>, vector<2x4x16x128xf32>
    tpu.vector_store %arg9[%c0_200, %c0_201, %c0_202, %c0_203], %528 {strides = array<i32>} : memref<2x4x16x128xf32, #tpu.memory_space<vmem>>, vector<2x4x16x128xf32>,
    return
  }
  func.func @transform_0(%arg0: i32) -> (i32, i32) {
    %c0_i32 = arith.constant 0 : i32
    %c0_i32_0 = arith.constant 0 : i32
    %c0_i32_1 = arith.constant 0 : i32
    return %c0_i32, %c0_i32_0 : i32, i32
  }
  func.func @transform_1(%arg0: i32) -> (i32, i32, i32, i32) {
    %c0_i32 = arith.constant 0 : i32
    %c0_i32_0 = arith.constant 0 : i32
    %c0_i32_1 = arith.constant 0 : i32
    %c0_i32_2 = arith.constant 0 : i32
    %c0_i32_3 = arith.constant 0 : i32
    return %c0_i32, %c0_i32_0, %c0_i32_1, %c0_i32_2 : i32, i32, i32, i32
  }
  func.func @transform_2(%arg0: i32) -> (i32, i32, i32) {
    %c0_i32 = arith.constant 0 : i32
    %c0_i32_0 = arith.constant 0 : i32
    %c0_i32_1 = arith.constant 0 : i32
    %c0_i32_2 = arith.constant 0 : i32
    return %c0_i32, %c0_i32_0, %c0_i32_1 : i32, i32, i32
  }
  func.func @transform_3(%arg0: i32) -> (i32, i32) {
    %c0_i32 = arith.constant 0 : i32
    %c0_i32_0 = arith.constant 0 : i32
    %c0_i32_1 = arith.constant 0 : i32
    return %c0_i32, %c0_i32_0 : i32, i32
  }
  func.func @transform_4(%arg0: i32) -> (i32, i32) {
    %c0_i32 = arith.constant 0 : i32
    %c0_i32_0 = arith.constant 0 : i32
    %c0_i32_1 = arith.constant 0 : i32
    return %c0_i32, %c0_i32_0 : i32, i32
  }
  func.func @transform_5(%arg0: i32) -> (i32, i32, i32) {
    %c0_i32 = arith.constant 0 : i32
    %c0_i32_0 = arith.constant 0 : i32
    %c0_i32_1 = arith.constant 0 : i32
    %c0_i32_2 = arith.constant 0 : i32
    return %c0_i32, %c0_i32_0, %c0_i32_1 : i32, i32, i32
  }
  func.func @transform_6(%arg0: i32) -> (i32, i32) {
    %c0_i32 = arith.constant 0 : i32
    %c0_i32_0 = arith.constant 0 : i32
    %c0_i32_1 = arith.constant 0 : i32
    return %c0_i32, %c0_i32_0 : i32, i32
  }
  func.func @transform_7(%arg0: i32) -> (i32, i32) {
    %c0_i32 = arith.constant 0 : i32
    %c0_i32_0 = arith.constant 0 : i32
    %c0_i32_1 = arith.constant 0 : i32
    return %c0_i32, %c0_i32_0 : i32, i32
  }
  func.func @transform_8(%arg0: i32) -> (i32, i32, i32, i32) {
    %c0_i32 = arith.constant 0 : i32
    %c0_i32_0 = arith.constant 0 : i32
    %c0_i32_1 = arith.constant 0 : i32
    %c0_i32_2 = arith.constant 0 : i32
    %c0_i32_3 = arith.constant 0 : i32
    return %c0_i32, %c0_i32_0, %c0_i32_1, %c0_i32_2 : i32, i32, i32, i32
  }
}

</mosaic_0001>

<bundles_post_ra>
// kernel: tile.84
= control target key start
LH: loop header
LB: loop body
LE: loop exit
PB: predicated region body
PF: predicated region fallthrough
CT: control target
= control target key end

     0   :  { %s28_s0 = inlined_call_operand.vmem [shape: f32[8], index: 0, kind: input, shape index: {}]   ;;  %s29_s1 = inlined_call_operand.vmem [shape: f32[16,8], index: 1, kind: output, shape index: {}]  }
   0x1   :  { %v4_v0 = vld [vmem:[%s28_s0] ss:$0 sm:$0xff] }
   0x2   :  { %5 = vst [vmem:[%s29_s1] sm:$0xff] %v4_v0  ;;  %8 = vst [vmem:[%s29_s1 + $0x8] sm:$0xff] %v4_v0 }

// kernel: tile.122
= control target key start
LH: loop header
LB: loop body
LE: loop exit
PB: predicated region body
PF: predicated region fallthrough
CT: control target
= control target key end

     0   :  { %s133_s10 = smov 120   ;;  %s134_s11 = smov 104   ;;  %vm3_vm0 = vcmask 64512   ;;  %vm9_vm1 = vcmask 1048512   ;;  %vm15_vm2 = vcmask 982912   ;;  %vm21_vm3 = vcmask 917312   ;;  %s209_s0 = inlined_call_operand.vmem [shape: f32[16,8], index: 0, kind: input, shape index: {}]   ;;  %s210_s1 = inlined_call_operand.vmem [shape: f32[1,128], index: 1, kind: output, shape index: {}]  }
   0x1   :  { %v103_v0 = vld [vmem:[%s209_s0 + $0xf] sm:$0x1]   ;;  %v105_v1 = vld [vmem:[%s209_s0 + $0xd] sm:$0x1]   ;;  %v104_v2 = vld [vmem:[%s209_s0 + $0xe] sm:$0x1]  }
   0x2   :  { %7 = vrot.lane.b32.xlu0 %v103_v0, %s133_s10  ;;  %19 = vrot.lane.b32.xlu1 %v105_v1, %s134_s11  ;;  %v106_v3 = vld [vmem:[%s209_s0 + $0xc] sm:$0x1]   ;;  %s135_s16 = smov 112   ;;  %s136_s17 = smov 96   ;;  %v107_v4 = vld [vmem:[%s209_s0 + $0xb] sm:$0x1]  }
   0x3   :  { %v108_v5 = vld [vmem:[%s209_s0 + $0xa] sm:$0x1]   ;;  %v2_v6 = vld [vmem:[%s209_s0] sm:$0x1]   ;;  %s137_s24 = smov 88   ;;  %s138_s25 = smov 80  }
   0x4   :  { %4 = vst.msk [vmem:[#allocation0] sm:$0x1] %vm3_vm0, %v2_v6   ;;  %v109_v7 = vld [vmem:[%s209_s0 + $0x9] sm:$0x1]   ;;  %v110_v8 = vld [vmem:[%s209_s0 + $0x8] sm:$0x1]  }
   0x5   :  { %s139_s30 = smov 72   ;;  %s140_s2 = smov 64   ;;  %v111_v9 = vld [vmem:[%s209_s0 + $0x7] sm:$0x1]   ;;  %v112_v10 = vld [vmem:[%s209_s0 + $0x6] sm:$0x1]  }
   0x6   :  { %13 = vrot.lane.b32.xlu0 %v104_v2, %s135_s16  ;;  %25 = vrot.lane.b32.xlu1 %v106_v3, %s136_s17  ;;  %s141_s7 = smov 56   ;;  %s142_s8 = smov 48   ;;  %v113_v11 = vld [vmem:[%s209_s0 + $0x5] sm:$0x1]   ;;  %v114_v12 = vld [vmem:[%s209_s0 + $0x4] sm:$0x1]  }
   0x7   :  { %s143_s13 = smov 40   ;;  %s144_s14 = smov 32   ;;  %v115_v13 = vld [vmem:[%s209_s0 + $0x3] sm:$0x1]   ;;  %v116_v14 = vld [vmem:[%s209_s0 + $0x2] sm:$0x1]  }
   0x8   :  { %s145_s19 = smov 24   ;;  %s146_s20 = smov 16   ;;  %v117_v15 = vld [vmem:[%s209_s0 + $0x1] sm:$0x1]   ;;  %vm27_vm4 = vcmask 851712   ;;  %vm33_vm5 = vcmask 786112  }
   0x9   :  { %s147_s0 = smov 8   ;;  %vm39_vm6 = vcmask 720512   ;;  %vm45_vm7 = vcmask 654912   ;;  %vm51_vm8 = vcmask 589312   ;;  %vm57_vm9 = vcmask 523712  }
   0xa   :  { %31 = vrot.lane.b32.xlu0 %v107_v4, %s137_s24  ;;  %37 = vrot.lane.b32.xlu1 %v108_v5, %s138_s25  ;;  %vm63_vm10 = vcmask 458112   ;;  %vm69_vm11 = vcmask 392512   ;;  %vm75_vm12 = vcmask 326912   ;;  %vm81_vm13 = vcmask 261312  }
   0xb   :  { %vm87_vm14 = vcmask 195712   ;;  %vm93_vm15 = vcmask 130112  }
   0xe   :  { %43 = vrot.lane.b32.xlu0 %v109_v7, %s139_s30  ;;  %49 = vrot.lane.b32.xlu1 %v110_v8, %s140_s2 }
  0x12   :  { %55 = vrot.lane.b32.xlu0 %v111_v9, %s141_s7  ;;  %61 = vrot.lane.b32.xlu1 %v112_v10, %s142_s8 }
  0x16   :  { %67 = vrot.lane.b32.xlu0 %v113_v11, %s143_s13  ;;  %73 = vrot.lane.b32.xlu1 %v114_v12, %s144_s14 }
  0x1a   :  { %79 = vrot.lane.b32.xlu0 %v115_v13, %s145_s19  ;;  %85 = vrot.lane.b32.xlu1 %v116_v14, %s146_s20 }
  0x1e   :  { %91 = vrot.lane.b32.xlu0 %v117_v15, %s147_s0 }
  0x74   :  { %v8_v16 = vpop.permute.xlu0 %7   ;;  %v20_v17 = vpop.permute.xlu1 %19  }
  0x75   :  { %10 = vst.msk [vmem:[#allocation0] sm:$0x1] %vm9_vm1, %v8_v16  }
  0x78   :  { %v14_v18 = vpop.permute.xlu0 %13   ;;  %v26_v19 = vpop.permute.xlu1 %25  }
  0x79   :  { %16 = vst.msk [vmem:[#allocation0] sm:$0x1] %vm15_vm2, %v14_v18  }
  0x7a   :  { %22 = vst.msk [vmem:[#allocation0] sm:$0x1] %vm21_vm3, %v20_v17  }
  0x7b   :  { %28 = vst.msk [vmem:[#allocation0] sm:$0x1] %vm27_vm4, %v26_v19  }
  0x7c   :  { %v32_v20 = vpop.permute.xlu0 %31   ;;  %v38_v21 = vpop.permute.xlu1 %37  }
  0x7d   :  { %34 = vst.msk [vmem:[#allocation0] sm:$0x1] %vm33_vm5, %v32_v20  }
  0x7e   :  { %40 = vst.msk [vmem:[#allocation0] sm:$0x1] %vm39_vm6, %v38_v21  }
  0x80   :  { %v44_v22 = vpop.permute.xlu0 %43   ;;  %v50_v23 = vpop.permute.xlu1 %49  }
  0x81   :  { %46 = vst.msk [vmem:[#allocation0] sm:$0x1] %vm45_vm7, %v44_v22  }
  0x82   :  { %52 = vst.msk [vmem:[#allocation0] sm:$0x1] %vm51_vm8, %v50_v23  }
  0x84   :  { %v56_v24 = vpop.permute.xlu0 %55   ;;  %v62_v25 = vpop.permute.xlu1 %61  }
  0x85   :  { %58 = vst.msk [vmem:[#allocation0] sm:$0x1] %vm57_vm9, %v56_v24  }
  0x86   :  { %64 = vst.msk [vmem:[#allocation0] sm:$0x1] %vm63_vm10, %v62_v25  }
  0x88   :  { %v68_v26 = vpop.permute.xlu0 %67   ;;  %v74_v27 = vpop.permute.xlu1 %73  }
  0x89   :  { %70 = vst.msk [vmem:[#allocation0] sm:$0x1] %vm69_vm11, %v68_v26  }
  0x8a   :  { %76 = vst.msk [vmem:[#allocation0] sm:$0x1] %vm75_vm12, %v74_v27  }
  0x8c   :  { %v80_v28 = vpop.permute.xlu0 %79   ;;  %v86_v29 = vpop.permute.xlu1 %85  }
  0x8d   :  { %82 = vst.msk [vmem:[#allocation0] sm:$0x1] %vm81_vm13, %v80_v28  }
  0x8e   :  { %88 = vst.msk [vmem:[#allocation0] sm:$0x1] %vm87_vm14, %v86_v29  }
  0x90   :  { %v92_v30 = vpop.permute.xlu0 %91  }
  0x91   :  { %94 = vst.msk [vmem:[#allocation0] sm:$0x1] %vm93_vm15, %v92_v30  }
  0x98   :  { %v99_v31 = vld [vmem:[#allocation0] sm:$0x1] }
  0x99   :  { %102 = vst [vmem:[%s210_s1] sm:$0x1] %v99_v31 }

// kernel: conv_based_gcn_forward.1
= control target key start
LH: loop header
LB: loop body
LE: loop exit
PB: predicated region body
PF: predicated region fallthrough
CT: control target
= control target key end

     0   :  { %13 = vsyncpa [#allocation3], 0  ;;  %s4069_s0 = inlined_call_operand.vmem [shape: f32[4,4], index: 0, kind: input, shape index: {}]   ;;  %s4070_s1 = inlined_call_operand.vmem [shape: f32[2,4,16,128], index: 1, kind: input, shape index: {}]   ;;  %s4071_s2 = inlined_call_operand.vmem [shape: f32[9,16,128], index: 2, kind: input, shape index: {}]   ;;  %s4072_s3 = inlined_call_operand.vmem [shape: bf16[128,128], index: 3, kind: input, shape index: {}]   ;;  %s4073_s4 = inlined_call_operand.vmem [shape: f32[1,128], index: 4, kind: input, shape index: {}]   ;;  %s4074_s5 = inlined_call_operand.vmem [shape: f32[9,16,128], index: 5, kind: input, shape index: {}]   ;;  %s4075_s6 = inlined_call_operand.vmem [shape: bf16[128,128], index: 6, kind: input, shape index: {}]   ;;  %s4076_s7 = inlined_call_operand.vmem [shape: f32[1,128], index: 7, kind: input, shape index: {}]   ;;  %s4077_s8 = inlined_call_operand.vmem [shape: f32[2,4,16,128], index: 8, kind: output, shape index: {}]  }
   0x1   :  { %s20_s29 = sshll.u32 %s4069_s0, 4  ;;  %s21_s29 = int_to_ptr.vmem [resolvable:$true] %s20_s29 }
   0x2   :  { %s2012_s30 = scalar_lea.vmem %s21_s29, 64  ;;  %p2017_p1 = scmp.lt.s32.totalorder %s21_s29, %s21_s29 }
   0x3   :  { %p2013_p0 = scmp.ne.s32.totalorder %s21_s29, %s2012_s30  ;;  %p2018_p2 = scmp.lt.s32.totalorder %s2012_s30, %s2012_s30 }
   0x5   :  { %p2019_p3 = por %p2018_p2, %p2017_p1 }
   0x7   :  { %p2020_p4 = pnand %p2019_p3, %p2013_p0 }
   0x9   :  { %2023 = shalt.err (!%p2020_p4)
}
   0xa   :  { %s2026_s9 = smov [#allocation2]  }
   0xb   :  { %23 = dma.vmem_to_smem %s21_s29, 64, %s2026_s9, [#allocation3]  }
   0xc   :  { %2024 = dma.done.wait [#allocation3], 64  }
   0xd   :  { %2025 = vsyncadd [#allocation3], 4294967232 }
   0xe   :  { %41 = sfence }
   0xf   :  { %s59_s10 = sld [smem:[#allocation2]]  ;;  %v219_v0 = vlaneseq  ;;  %v2080_v1 = vld [vmem:[%s4070_s1 + $0x8] sm:$0xff]  ;;  %v2085_v2 = vld [vmem:[%s4070_s1] sm:$0xff]  ;;  %v2092_v4 = vld [vmem:[%s4070_s1 + $0x18] sm:$0xff]  ;;  %s2027_s16 = smov 8  }
  0x10   :  { %s1832_s11 = sld [smem:[#allocation2 + $0x1]]  ;;  %v2097_v5 = vld [vmem:[%s4070_s1 + $0x10] sm:$0xff]  ;;  %v2102_v6 = vld [vmem:[%s4070_s1 + $0x28] sm:$0xff]  ;;  %v2109_v8 = vld [vmem:[%s4070_s1 + $0x20] sm:$0xff] }
  0x11   :  { %s1833_s12 = sld [smem:[#allocation2 + $0x2]]  ;;  %v2087_v3 = vshrl.u32 %v219_v0, 7  ;;  %v2114_v9 = vld [vmem:[%s4070_s1 + $0x38] sm:$0xff]  ;;  %v2123_v12 = vld [vmem:[%s4070_s1 + $0x30] sm:$0xff] }
  0x12   :  { %s1834_s13 = sld [smem:[#allocation2 + $0x3]] }
  0x13   :  { %s1835_s17 = sld [smem:[#allocation2 + $0x80]]  ;;  %4157 = vst [vmem:[#allocation5_spill] sm:$0xff] %v2087_v3  ;;  %vm221_vm0 = vcmp.lt.s32.totalorder %v2087_v3, 1  ;;  %vm591_vm1 = vcmp.lt.s32.totalorder %v2087_v3, 7 }
  0x14   :  { %s1836_s22 = sld [smem:[#allocation2 + $0x81]] }
  0x15   :  { %v2104_v7 = vstv %s59_s10  ;;  %s1837_s27 = sld [smem:[#allocation2 + $0x82]] }
  0x16   :  { %4158 = vst [vmem:[#allocation6_spill] sm:$0xff] %v2104_v7  ;;  %v62_v10 = vmul.f32 %v2104_v7, %v2080_v1  ;;  %v2118_v11 = vstv %s1832_s11  ;;  %v61_v13 = vmul.f32 %v2104_v7, %v2085_v2  ;;  %s1838_s10 = sld [smem:[#allocation2 + $0x83]] }
  0x17   :  { %4159 = vst [vmem:[#allocation7_spill] sm:$0xff] %v2118_v11  ;;  %v66_v14 = vmul.f32 %v2118_v11, %v2092_v4  ;;  %v2129_v15 = vstv %s1833_s12  ;;  %v65_v16 = vmul.f32 %v2118_v11, %v2097_v5  ;;  %s2134_s11 = sld [smem:[#allocation2 + $0x100]] }
  0x18   :  { %4160 = vst [vmem:[#allocation8_spill] sm:$0xff] %v2129_v15  ;;  %v72_v17 = vmul.f32 %v2129_v15, %v2102_v6  ;;  %v2138_v18 = vstv %s1834_s13  ;;  %v71_v19 = vmul.f32 %v2129_v15, %v2109_v8  ;;  %s2142_s14 = sld [smem:[#allocation2 + $0x101]] }
  0x19   :  { %4161 = vst [vmem:[#allocation9_spill] sm:$0xff] %v2138_v18  ;;  %v68_v20 = vadd.f32 %v66_v14, %v62_v10  ;;  %v78_v21 = vmul.f32 %v2138_v18, %v2114_v9  ;;  %v67_v22 = vadd.f32 %v65_v16, %v61_v13  ;;  %v77_v23 = vmul.f32 %v2138_v18, %v2123_v12  ;;  %s2152_s12 = sld [smem:[#allocation2 + $0x102]]  ;;  %v2243_v13 = vld [vmem:[%s4070_s1 + $0x40] sm:$0xff]  ;;  %v2248_v14 = vld [vmem:[%s4070_s1 + $0x48] sm:$0xff]  ;;  %v2253_v16 = vld [vmem:[%s4070_s1 + $0x50] sm:$0xff] }
  0x1a   :  { %v2148_v24 = vstv %s1835_s17  ;;  %v2150_v25 = vstv %s1836_s22  ;;  %s2158_s13 = sld [smem:[#allocation2 + $0x103]] }
  0x1b   :  { %4162 = vst [vmem:[#allocation10_spill] sm:$0xff] %v2148_v24  ;;  %4163 = vst [vmem:[#allocation11_spill] sm:$0xff] %v2150_v25  ;;  %v74_v26 = vadd.f32 %v72_v17, %v68_v20  ;;  %v73_v27 = vadd.f32 %v71_v19, %v67_v22  ;;  %v83_v28 = vmul.f32 %v2148_v24, %v2085_v2  ;;  %v2164_v32 = vstv %s1837_s27  ;;  %s2168_s0 = sld [smem:[#allocation2 + $0x180]]  ;;  %s2028_s27 = smov 120  }
  0x1c   :  { %v84_v29 = vmul.f32 %v2148_v24, %v2080_v1  ;;  %v87_v30 = vmul.f32 %v2150_v25, %v2097_v5  ;;  %v88_v31 = vmul.f32 %v2150_v25, %v2092_v4  ;;  %4164 = vst [vmem:[#allocation12_spill] sm:$0xff] %v2164_v32  ;;  %v2166_v33 = vstv %s1838_s10  ;;  %s2178_s15 = sld [smem:[#allocation2 + $0x181]] }
  0x1d   :  { %4165 = vst [vmem:[#allocation13_spill] sm:$0xff] %v2166_v33  ;;  %v2170_v34 = vadd.f32 %v78_v21, %v74_v26  ;;  %v2172_v35 = vadd.f32 %v77_v23, %v73_v27  ;;  %v93_v36 = vmul.f32 %v2164_v32, %v2109_v8  ;;  %v94_v37 = vmul.f32 %v2164_v32, %v2102_v6  ;;  %s2200_s17 = sld [smem:[#allocation2 + $0x182]]  ;;  %v2274_v26 = vld [vmem:[%s4070_s1 + $0x58] sm:$0xff] }
  0x1e   :  { %v89_v38 = vadd.f32 %v87_v30, %v83_v28  ;;  %v90_v39 = vadd.f32 %v88_v31, %v84_v29  ;;  %v99_v40 = vmul.f32 %v2166_v33, %v2123_v12  ;;  %v100_v41 = vmul.f32 %v2166_v33, %v2114_v9  ;;  %s2226_s18 = sld [smem:[#allocation2 + $0x183]] }
  0x1f   :  { %408 = vrot.lane.b32.xlu1 %v2170_v34, %s2027_s16  ;;  %406 = vrot.lane.b32.xlu0 %v2172_v35, %s2027_s16  ;;  %v203_v42 = vrot.slane %v2172_v35, 7  ;;  %v211_v43 = vrot.slane %v2170_v34, 7  ;;  %v2191_v44 = vstv %s2134_s11  ;;  %v2194_v45 = vstv %s2142_s14 }
  0x20   :  { %4166 = vst [vmem:[#allocation14_spill] sm:$0xff] %v2191_v44  ;;  %4167 = vst [vmem:[#allocation15_spill] sm:$0xff] %v2194_v45  ;;  %v95_v46 = vadd.f32 %v93_v36, %v89_v38  ;;  %v96_v47 = vadd.f32 %v94_v37, %v90_v39  ;;  %v105_v48 = vmul.f32 %v2191_v44, %v2085_v2  ;;  %v2221_v58 = vstv %s2152_s12 }
  0x21   :  { %v106_v49 = vmul.f32 %v2191_v44, %v2080_v1  ;;  %v2204_v50 = vsel %vm221_vm0, %v211_v43, %v203_v42  ;;  %v109_v51 = vmul.f32 %v2194_v45, %v2097_v5  ;;  %v110_v52 = vmul.f32 %v2194_v45, %v2092_v4  ;;  %4168 = vst [vmem:[#allocation16_spill] sm:$0xff] %v2221_v58 }
  0x22   :  { %v2210_v53 = vadd.f32 %v99_v40, %v95_v46  ;;  %v2212_v54 = vadd.f32 %v100_v41, %v96_v47  ;;  %v2216_v55 = vsel %vm221_vm0, %v203_v42, %v211_v43  ;;  %v2224_v59 = vstv %s2158_s13  ;;  %v2313_v43 = vld [vmem:[%s4070_s1 + $0x60] sm:$0xff]  ;;  %v2318_v46 = vld [vmem:[%s4070_s1 + $0x68] sm:$0xff] }
  0x23   :  { %238 = vrot.lane.b32.xlu0 %v2204_v50, %s2027_s16  ;;  %v111_v56 = vadd.f32 %v109_v51, %v105_v48  ;;  %v112_v57 = vadd.f32 %v110_v52, %v106_v49  ;;  %4169 = vst [vmem:[#allocation17_spill] sm:$0xff] %v2224_v59  ;;  %v115_v62 = vmul.f32 %v2221_v58, %v2109_v8  ;;  %v2235_v0 = vstv %s2168_s0  ;;  %v2331_v49 = vld [vmem:[%s4070_s1 + $0x70] sm:$0xff]  ;;  %v2336_v51 = vld [vmem:[%s4070_s1 + $0x78] sm:$0xff] }
  0x24   :  { %v204_v60 = vrot.slane %v2210_v53, 7  ;;  %v212_v61 = vrot.slane %v2212_v54, 7  ;;  %v116_v63 = vmul.f32 %v2221_v58, %v2102_v6  ;;  %4170 = vst [vmem:[#allocation18_spill] sm:$0xff] %v2235_v0  ;;  %v2238_v10 = vstv %s2178_s15 }
  0x25   :  { %4171 = vst [vmem:[#allocation19_spill] sm:$0xff] %v2238_v10  ;;  %v121_v19 = vmul.f32 %v2224_v59, %v2123_v12  ;;  %v122_v20 = vmul.f32 %v2224_v59, %v2114_v9  ;;  %v117_v22 = vadd.f32 %v115_v62, %v111_v56  ;;  %v127_v27 = vmul.f32 %v2235_v0, %v2085_v2 }
  0x26   :  { %v2257_v17 = vsel %vm221_vm0, %v212_v61, %v204_v60  ;;  %v2267_v21 = vsel %vm221_vm0, %v204_v60, %v212_v61  ;;  %v118_v23 = vadd.f32 %v116_v63, %v112_v57  ;;  %v128_v28 = vmul.f32 %v2235_v0, %v2080_v1 }
  0x27   :  { %242 = vrot.lane.b32.xlu1 %v2257_v17, %s2027_s16  ;;  %240 = vrot.lane.b32.xlu0 %v2216_v55, %s2027_s16  ;;  %v131_v29 = vmul.f32 %v2238_v10, %v2097_v5  ;;  %v2283_v30 = vstv %s2200_s17  ;;  %v132_v31 = vmul.f32 %v2238_v10, %v2092_v4  ;;  %v147_v36 = vmul.f32 %v2104_v7, %v2243_v13 }
  0x28   :  { %4172 = vst [vmem:[#allocation20_spill] sm:$0xff] %v2283_v30  ;;  %v148_v37 = vmul.f32 %v2104_v7, %v2248_v14  ;;  %v149_v2 = vmul.f32 %v2118_v11, %v2253_v16  ;;  %v150_v1 = vmul.f32 %v2118_v11, %v2274_v26  ;;  %v2299_v4 = vadd.f32 %v121_v19, %v117_v22  ;;  %v2736_v11 = vld [vmem:[%s4071_s2 + $0x48] sm:$0xff] }
  0x29   :  { %v2301_v5 = vadd.f32 %v122_v20, %v118_v23  ;;  %v137_v38 = vmul.f32 %v2283_v30, %v2109_v8  ;;  %v133_v39 = vadd.f32 %v131_v29, %v127_v27  ;;  %v134_v40 = vadd.f32 %v132_v31, %v128_v28 }
  0x2a   :  { %v138_v41 = vmul.f32 %v2283_v30, %v2102_v6  ;;  %v2308_v42 = vstv %s2226_s18  ;;  %v151_v47 = vadd.f32 %v149_v2, %v147_v36  ;;  %v205_v6 = vrot.slane %v2299_v4, 7 }
  0x2b   :  { %244 = vrot.lane.b32.xlu1 %v2267_v21, %s2027_s16  ;;  %339 = vrot.lane.b32.xlu0 %v2204_v50, %s2028_s27  ;;  %4173 = vst [vmem:[#allocation21_spill] sm:$0xff] %v2308_v42  ;;  %v213_v8 = vrot.slane %v2301_v5, 7  ;;  %v143_v48 = vmul.f32 %v2308_v42, %v2123_v12  ;;  %v152_v52 = vadd.f32 %v150_v1, %v148_v37 }
  0x2c   :  { %v139_v56 = vadd.f32 %v137_v38, %v133_v39  ;;  %v140_v57 = vadd.f32 %v138_v41, %v134_v40  ;;  %v144_v60 = vmul.f32 %v2308_v42, %v2114_v9  ;;  %v153_v61 = vmul.f32 %v2129_v15, %v2313_v43 }
  0x2d   :  { %v154_v12 = vmul.f32 %v2129_v15, %v2318_v46  ;;  %v157_v63 = vmul.f32 %v2138_v18, %v2331_v49  ;;  %v158_v19 = vmul.f32 %v2138_v18, %v2336_v51  ;;  %v2354_v9 = vsel %vm221_vm0, %v213_v8, %v205_v6 }
  0x2e   :  { %v155_v62 = vadd.f32 %v153_v61, %v151_v47  ;;  %v161_v22 = vmul.f32 %v2148_v24, %v2243_v13  ;;  %v2358_v23 = vadd.f32 %v143_v48, %v139_v56  ;;  %v2360_v27 = vadd.f32 %v144_v60, %v140_v57  ;;  %v2395_v60 = vld [vmem:[%s4071_s2 + $0x10] sm:$0xff] }
  0x2f   :  { %341 = vrot.lane.b32.xlu1 %v2216_v55, %s2028_s27  ;;  %343 = vrot.lane.b32.xlu0 %v2257_v17, %s2028_s27  ;;  %v156_v20 = vadd.f32 %v154_v12, %v152_v52  ;;  %v162_v29 = vmul.f32 %v2148_v24, %v2248_v14  ;;  %v163_v36 = vmul.f32 %v2150_v25, %v2253_v16  ;;  %v2716_v24 = vld [vmem:[%s4071_s2 + $0x28] sm:$0xff] }
  0x30   :  { %v2362_v28 = vadd.f32 %v157_v63, %v155_v62  ;;  %v164_v37 = vmul.f32 %v2150_v25, %v2274_v26  ;;  %v167_v2 = vmul.f32 %v2164_v32, %v2313_v43  ;;  %v168_v38 = vmul.f32 %v2164_v32, %v2318_v46 }
  0x31   :  { %v2366_v31 = vadd.f32 %v158_v19, %v156_v20  ;;  %v171_v39 = vmul.f32 %v2166_v33, %v2331_v49  ;;  %v165_v41 = vadd.f32 %v163_v36, %v161_v22  ;;  %v172_v48 = vmul.f32 %v2166_v33, %v2336_v51 }
  0x32   :  { %4174 = vst [vmem:[#allocation22_spill] sm:$0xff] %v2362_v28  ;;  %v207_v1 = vrot.slane %v2362_v28, 7  ;;  %v166_v47 = vadd.f32 %v164_v37, %v162_v29  ;;  %v2388_v52 = vsel %vm221_vm0, %v205_v6, %v213_v8  ;;  %v206_v56 = vrot.slane %v2358_v23, 7  ;;  %v1996_v29 = vld [vmem:[%s4072_s3 + $0x38] sm:$0xff]  }
  0x33   :  { %345 = vrot.lane.b32.xlu1 %v2267_v21, %s2028_s27  ;;  %410 = vrot.lane.b32.xlu0 %v2210_v53, %s2027_s16  ;;  %4175 = vst [vmem:[#allocation23_spill] sm:$0xff] %v2366_v31  ;;  %v215_v40 = vrot.slane %v2366_v31, 7  ;;  %v214_v57 = vrot.slane %v2360_v27, 7  ;;  %v169_v12 = vadd.f32 %v167_v2, %v165_v41  ;;  %v583_v41 = vrot.slane %v2170_v34, 1 }
  0x34   :  { %v170_v6 = vadd.f32 %v168_v38, %v166_v47  ;;  %1929 = vmatprep.subr.bf16.mxu0 %v1996_v29  ;;  %v1997_v38 = vld [vmem:[%s4072_s3 + $0x30] sm:$0xff]   ;;  %v1998_v47 = vld [vmem:[%s4072_s3 + $0x28] sm:$0xff]   ;;  %v192_v32 = vmul.f32 %v2238_v10, %v2274_v26  ;;  %v309_v25 = vmul.f32 %v2395_v60, %v2257_v17 }
  0x35   :  { %v2403_v61 = vsel %vm221_vm0, %v215_v40, %v207_v1  ;;  %v2413_v62 = vadd.f32 %v171_v39, %v169_v12  ;;  %v2419_v19 = vsel %vm221_vm0, %v214_v57, %v206_v56  ;;  %v2440_v37 = vsel %vm221_vm0, %v206_v56, %v214_v57  ;;  %1930 = vmatpush3.bf16.msra.mxu0 %v1996_v29  ;;  %v1999_v56 = vld [vmem:[%s4072_s3 + $0x20] sm:$0xff]   ;;  %v2000_v29 = vld [vmem:[%s4072_s3 + $0x18] sm:$0xff]  }
  0x36   :  { %v2407_v8 = vmul.f32 %v2395_v60, %v2403_v61  ;;  %v2415_v63 = vadd.f32 %v172_v48, %v170_v6  ;;  %v575_v39 = vrot.slane %v2172_v35, 1  ;;  %1931 = vmatprep.subr.bf16.mxu0 %v1997_v38  ;;  %v576_v12 = vrot.slane %v2210_v53, 1 }
  0x37   :  { %412 = vrot.lane.b32.xlu1 %v2212_v54, %s2027_s16  ;;  %246 = vrot.lane.b32.xlu0 %v2354_v9, %s2027_s16  ;;  %4177 = vst [vmem:[#allocation25_spill] sm:$0xff] %v2413_v62  ;;  %v208_v20 = vrot.slane %v2413_v62, 7  ;;  %v584_v6 = vrot.slane %v2212_v54, 1 }
  0x38   :  { %4176 = vst [vmem:[#allocation24_spill] sm:$0xff] %v2407_v8  ;;  %4178 = vst [vmem:[#allocation26_spill] sm:$0xff] %v2415_v63  ;;  %v216_v22 = vrot.slane %v2415_v63, 7  ;;  %v2465_v48 = vsel %vm591_vm1, %v575_v39, %v583_v41  ;;  %v2476_v57 = vsel %vm591_vm1, %v583_v41, %v575_v39  ;;  %v2001_v39 = vld [vmem:[%s4072_s3 + $0x10] sm:$0xff]  }
  0x39   :  { %1932 = vmatpush3.bf16.msra.mxu0 %v1997_v38  ;;  %v2489_v38 = vsel %vm591_vm1, %v576_v12, %v584_v6  ;;  %v2500_v41 = vsel %vm591_vm1, %v584_v6, %v576_v12  ;;  %v2534_v12 = vsel %vm221_vm0, %v207_v1, %v215_v40  ;;  %v577_v40 = vrot.slane %v2299_v4, 1 }
  0x3a   :  { %v2436_v36 = vsel %vm221_vm0, %v216_v22, %v208_v20  ;;  %1933 = vmatprep.subr.bf16.mxu0 %v1998_v47  ;;  %4180 = vst [vmem:[#allocation28_spill] sm:$0xff] %v2534_v12  ;;  %v2550_v1 = vsel %vm221_vm0, %v208_v20, %v216_v22  ;;  %v585_v6 = vrot.slane %v2301_v5, 1 }
  0x3b   :  { %248 = vrot.lane.b32.xlu1 %v2388_v52, %s2027_s16  ;;  %508 = vrot.lane.b32.xlu0 %v2172_v35, %s2028_s27  ;;  %v2444_v2 = vmul.f32 %v2395_v60, %v2436_v36  ;;  %4181 = vst [vmem:[#allocation29_spill] sm:$0xff] %v2550_v1 }
  0x3c   :  { %v2564_v20 = vsel %vm591_vm1, %v577_v40, %v585_v6  ;;  %v2572_v22 = vsel %vm591_vm1, %v585_v6, %v577_v40  ;;  %v178_v40 = vmul.f32 %v2194_v45, %v2274_v26 }
  0x3d   :  { %4179 = vst [vmem:[#allocation27_spill] sm:$0xff] %v2444_v2  ;;  %1934 = vmatpush3.bf16.msra.mxu0 %v1998_v47  ;;  %v2002_v47 = vld [vmem:[%s4072_s3 + $0x8] sm:$0xff]  }
  0x3e   :  { %1935 = vmatprep.subr.bf16.mxu0 %v1999_v56 }
  0x3f   :  { %510 = vrot.lane.b32.xlu1 %v2170_v34, %s2028_s27  ;;  %250 = vrot.lane.b32.xlu0 %v2419_v19, %s2027_s16 }
  0x41   :  { %1936 = vmatpush3.bf16.msra.mxu0 %v1999_v56  ;;  %v2003_v56 = vld [vmem:[%s4072_s3] sm:$0xff]  }
  0x42   :  { %1937 = vmatprep.subr.bf16.mxu0 %v2000_v29 }
  0x43   :  { %252 = vrot.lane.b32.xlu1 %v2440_v37, %s2027_s16  ;;  %512 = vrot.lane.b32.xlu0 %v2210_v53, %s2028_s27 }
  0x45   :  { %1938 = vmatpush3.bf16.msra.mxu0 %v2000_v29  ;;  %v578_v29 = vrot.slane %v2358_v23, 1 }
  0x46   :  { %1939 = vmatprep.subr.bf16.mxu0 %v2001_v39 }
  0x47   :  { %514 = vrot.lane.b32.xlu1 %v2212_v54, %s2028_s27  ;;  %347 = vrot.lane.b32.xlu0 %v2354_v9, %s2028_s27 }
  0x49   :  { %1940 = vmatpush3.bf16.msra.mxu0 %v2001_v39  ;;  %v586_v39 = vrot.slane %v2360_v27, 1 }
  0x4a   :  { %1941 = vmatprep.subr.bf16.mxu0 %v2002_v47 }
  0x4b   :  { %349 = vrot.lane.b32.xlu1 %v2388_v52, %s2028_s27  ;;  %608 = vrot.lane.b32.xlu0 %v2465_v48, %s2027_s16  ;;  %v2590_v6 = vsel %vm591_vm1, %v578_v29, %v586_v39 }
  0x4d   :  { %1942 = vmatpush3.bf16.msra.mxu0 %v2002_v47  ;;  %v177_v47 = vmul.f32 %v2194_v45, %v2253_v16  ;;  %v2602_v45 = vsel %vm591_vm1, %v586_v39, %v578_v29  ;;  %v190_v29 = vmul.f32 %v2235_v0, %v2248_v14  ;;  %v191_v39 = vmul.f32 %v2238_v10, %v2253_v16 }
  0x4e   :  { %1943 = vmatprep.subr.bf16.mxu0 %v2003_v56  ;;  %4182 = vst [vmem:[#allocation30_spill] sm:$0xff] %v2602_v45  ;;  %v196_v16 = vmul.f32 %v2283_v30, %v2318_v46 }
  0x4f   :  { %610 = vrot.lane.b32.xlu1 %v2476_v57, %s2027_s16  ;;  %351 = vrot.lane.b32.xlu0 %v2419_v19, %s2028_s27 }
  0x51   :  { %1944 = vmatpush3.bf16.msra.mxu0 %v2003_v56  ;;  %v176_v56 = vmul.f32 %v2191_v44, %v2248_v14  ;;  %v194_v14 = vadd.f32 %v192_v32, %v190_v29  ;;  %v200_v32 = vmul.f32 %v2308_v42, %v2336_v51 }
  0x53   :  { %353 = vrot.lane.b32.xlu1 %v2440_v37, %s2028_s27  ;;  %612 = vrot.lane.b32.xlu0 %v2489_v38, %s2027_s16  ;;  %v180_v18 = vadd.f32 %v178_v40, %v176_v56  ;;  %v186_v40 = vmul.f32 %v2224_v59, %v2336_v51  ;;  %v2659_v51 = vld [vmem:[%s4071_s2] sm:$0xff] }
  0x57   :  { %614 = vrot.lane.b32.xlu1 %v2500_v41, %s2027_s16  ;;  %414 = vrot.lane.b32.xlu0 %v2299_v4, %s2027_s16 }
  0x5b   :  { %416 = vrot.lane.b32.xlu1 %v2301_v5, %s2027_s16  ;;  %418 = vrot.lane.b32.xlu0 %v2358_v23, %s2027_s16 }
  0x5f   :  { %420 = vrot.lane.b32.xlu1 %v2360_v27, %s2027_s16  ;;  %710 = vrot.lane.b32.xlu0 %v2465_v48, %s2028_s27 }
  0x63   :  { %712 = vrot.lane.b32.xlu1 %v2476_v57, %s2028_s27  ;;  %714 = vrot.lane.b32.xlu0 %v2489_v38, %s2028_s27 }
  0x67   :  { %716 = vrot.lane.b32.xlu1 %v2500_v41, %s2028_s27  ;;  %254 = vrot.lane.b32.xlu0 %v2403_v61, %s2027_s16 }
  0x6b   :  { %256 = vrot.lane.b32.xlu1 %v2534_v12, %s2027_s16  ;;  %516 = vrot.lane.b32.xlu0 %v2299_v4, %s2028_s27 }
  0x6f   :  { %518 = vrot.lane.b32.xlu1 %v2301_v5, %s2028_s27  ;;  %258 = vrot.lane.b32.xlu0 %v2436_v36, %s2027_s16 }
  0x73   :  { %260 = vrot.lane.b32.xlu1 %v2550_v1, %s2027_s16  ;;  %520 = vrot.lane.b32.xlu0 %v2358_v23, %s2028_s27 }
  0x77   :  { %522 = vrot.lane.b32.xlu1 %v2360_v27, %s2028_s27  ;;  %355 = vrot.lane.b32.xlu0 %v2403_v61, %s2028_s27  ;;  %v175_v61 = vmul.f32 %v2191_v44, %v2243_v13  ;;  %v182_v44 = vmul.f32 %v2221_v58, %v2318_v46 }
  0x79   :  { %v179_v33 = vadd.f32 %v177_v47, %v175_v61  ;;  %v185_v61 = vmul.f32 %v2224_v59, %v2331_v49  ;;  %v184_v56 = vadd.f32 %v182_v44, %v180_v18 }
  0x7b   :  { %357 = vrot.lane.b32.xlu1 %v2534_v12, %s2028_s27  ;;  %616 = vrot.lane.b32.xlu0 %v2564_v20, %s2027_s16  ;;  %v2628_v44 = vadd.f32 %v186_v40, %v184_v56 }
  0x7d   :  { %4184 = vst [vmem:[#allocation32_spill] sm:$0xff] %v2628_v44 }
  0x7f   :  { %618 = vrot.lane.b32.xlu1 %v2572_v22, %s2027_s16  ;;  %359 = vrot.lane.b32.xlu0 %v2436_v36, %s2028_s27  ;;  %v181_v36 = vmul.f32 %v2221_v58, %v2313_v43  ;;  %v189_v58 = vmul.f32 %v2235_v0, %v2243_v13 }
  0x81   :  { %v183_v47 = vadd.f32 %v181_v36, %v179_v33  ;;  %v195_v33 = vmul.f32 %v2283_v30, %v2313_v43  ;;  %v193_v13 = vadd.f32 %v191_v39, %v189_v58  ;;  %v199_v36 = vmul.f32 %v2308_v42, %v2331_v49 }
  0x82   :  { %v217_v43 = vrot.slane %v2628_v44, 7 }
  0x83   :  { %361 = vrot.lane.b32.xlu1 %v2550_v1, %s2028_s27  ;;  %620 = vrot.lane.b32.xlu0 %v2590_v6, %s2027_s16  ;;  %v2624_v18 = vadd.f32 %v185_v61, %v183_v47  ;;  %v197_v61 = vadd.f32 %v195_v33, %v193_v13  ;;  %v198_v47 = vadd.f32 %v196_v16, %v194_v14 }
  0x85   :  { %4183 = vst [vmem:[#allocation31_spill] sm:$0xff] %v2624_v18  ;;  %v209_v26 = vrot.slane %v2624_v18, 7  ;;  %v2650_v49 = vadd.f32 %v199_v36, %v197_v61  ;;  %v2652_v40 = vadd.f32 %v200_v32, %v198_v47  ;;  %v307_v36 = vmul.f32 %v2395_v60, %v2204_v50  ;;  %v2674_v61 = vld [vmem:[%s4071_s2 + $0x18] sm:$0xff]  ;;  %v2689_v50 = vld [vmem:[%s4071_s2 + $0x20] sm:$0xff] }
  0x86   :  { %v2698_v32 = vld [vmem:[%s4071_s2 + $0x40] sm:$0xff]  ;;  %v308_v30 = vmul.f32 %v2674_v61, %v2216_v55 }
  0x87   :  { %622 = vrot.lane.b32.xlu1 %v2602_v45, %s2027_s16  ;;  %422 = vrot.lane.b32.xlu0 %v2362_v28, %s2027_s16  ;;  %v2648_v56 = vsel %vm221_vm0, %v217_v43, %v209_v26  ;;  %4186 = vst [vmem:[#allocation34_spill] sm:$0xff] %v2650_v49  ;;  %4187 = vst [vmem:[#allocation35_spill] sm:$0xff] %v2652_v40  ;;  %v2665_v39 = vsel %vm221_vm0, %v209_v26, %v217_v43  ;;  %v210_v33 = vrot.slane %v2650_v49, 7  ;;  %v2682_v26 = vld [vmem:[%s4071_s2 + $0x8] sm:$0xff] }
  0x88   :  { %4185 = vst [vmem:[#allocation33_spill] sm:$0xff] %v2648_v56  ;;  %4188 = vst [vmem:[#allocation36_spill] sm:$0xff] %v2665_v39  ;;  %v218_v13 = vrot.slane %v2652_v40, 7  ;;  %v476_v55 = vmul.f32 %v2698_v32, %v2172_v35  ;;  %v310_v35 = vmul.f32 %v2674_v61, %v2267_v21  ;;  %v587_v21 = vrot.slane %v2366_v31, 1 }
  0x8a   :  { %v2693_v43 = vsel %vm221_vm0, %v218_v13, %v210_v33 }
  0x8b   :  { %424 = vrot.lane.b32.xlu1 %v2366_v31, %s2027_s16  ;;  %426 = vrot.lane.b32.xlu0 %v2413_v62, %s2027_s16  ;;  %4189 = vst [vmem:[#allocation37_spill] sm:$0xff] %v2693_v43 }
  0x8f   :  { %428 = vrot.lane.b32.xlu1 %v2415_v63, %s2027_s16  ;;  %718 = vrot.lane.b32.xlu0 %v2564_v20, %s2028_s27 }
  0x91   :  { %v407_v58 = vpop.permute.xlu0 %406  ;;  %v409_v46 = vpop.permute.xlu1 %408 }
  0x93   :  { %720 = vrot.lane.b32.xlu1 %v2572_v22, %s2028_s27  ;;  %722 = vrot.lane.b32.xlu0 %v2590_v6, %s2028_s27 }
  0x95   :  { %v239_v29 = vpop.permute.xlu0 %238 }
  0x96   :  { %v272_v47 = vmul.f32 %v2659_v51, %v239_v29  ;;  %v2703_v29 = vld [vmem:[%s4071_s2 + $0x30] sm:$0xff] }
  0x97   :  { %724 = vrot.lane.b32.xlu1 %v2602_v45, %s2028_s27  ;;  %262 = vrot.lane.b32.xlu0 %v2648_v56, %s2027_s16  ;;  %v441_v17 = vmul.f32 %v2703_v29, %v407_v58 }
  0x98   :  { %v323_v10 = vadd.f32 %v307_v36, %v272_v47  ;;  %v2731_v47 = vsel %vm221_vm0, %v210_v33, %v218_v13  ;;  %v579_v33 = vrot.slane %v2362_v28, 1 }
  0x99   :  { %v243_v14 = vpop.permute.xlu1 %242  ;;  %v241_v16 = vpop.permute.xlu0 %240  ;;  %4190 = vst [vmem:[#allocation38_spill] sm:$0xff] %v2731_v47 }
  0x9a   :  { %v273_v0 = vmul.f32 %v2682_v26, %v241_v16  ;;  %v274_v16 = vmul.f32 %v2659_v51, %v243_v14 }
  0x9b   :  { %264 = vrot.lane.b32.xlu1 %v2665_v39, %s2027_s16  ;;  %524 = vrot.lane.b32.xlu0 %v2362_v28, %s2028_s27 }
  0x9c   :  { %v324_v1 = vadd.f32 %v308_v30, %v273_v0  ;;  %v477_v0 = vmul.f32 %v2736_v11, %v2170_v34  ;;  %v325_v30 = vadd.f32 %v309_v25, %v274_v16 }
  0x9d   :  { %v245_v42 = vpop.permute.xlu1 %244  ;;  %v340_v59 = vpop.permute.xlu0 %339 }
  0x9e   :  { %v374_v15 = vmul.f32 %v2689_v50, %v340_v59  ;;  %v2725_v59 = vld [vmem:[%s4071_s2 + $0x38] sm:$0xff] }
  0x9f   :  { %526 = vrot.lane.b32.xlu1 %v2366_v31, %s2028_s27  ;;  %266 = vrot.lane.b32.xlu0 %v2693_v43, %s2027_s16 }
  0xa0   :  { %v390_v36 = vadd.f32 %v374_v15, %v323_v10  ;;  %v442_v10 = vmul.f32 %v2725_v59, %v409_v46 }
  0xa1   :  { %v342_v7 = vpop.permute.xlu1 %341  ;;  %v344_v2 = vpop.permute.xlu0 %343 }
  0xa2   :  { %v375_v58 = vmul.f32 %v2716_v24, %v342_v7  ;;  %v457_v8 = vadd.f32 %v441_v17, %v390_v36  ;;  %v376_v15 = vmul.f32 %v2689_v50, %v344_v2  ;;  %v275_v7 = vmul.f32 %v2682_v26, %v245_v42 }
  0xa3   :  { %268 = vrot.lane.b32.xlu1 %v2731_v47, %s2027_s16  ;;  %528 = vrot.lane.b32.xlu0 %v2413_v62, %s2028_s27  ;;  %v478_v17 = vmul.f32 %v2698_v32, %v2210_v53  ;;  %v2762_v42 = vsel %vm591_vm1, %v579_v33, %v587_v21 }
  0xa4   :  { %v391_v13 = vadd.f32 %v375_v58, %v324_v1  ;;  %v492_v2 = vadd.f32 %v476_v55, %v457_v8  ;;  %v392_v45 = vadd.f32 %v376_v15, %v325_v30  ;;  %v326_v25 = vadd.f32 %v310_v35, %v275_v7  ;;  %4191 = vst [vmem:[#allocation39_spill] sm:$0xff] %v2762_v42 }
  0xa5   :  { %v346_v14 = vpop.permute.xlu1 %345  ;;  %v411_v46 = vpop.permute.xlu0 %410  ;;  %v479_v58 = vmul.f32 %v2736_v11, %v2212_v54  ;;  %v580_v35 = vrot.slane %v2413_v62, 1 }
  0xa6   :  { %v458_v36 = vadd.f32 %v442_v10, %v391_v13  ;;  %v377_v12 = vmul.f32 %v2716_v24, %v346_v14  ;;  %v443_v28 = vmul.f32 %v2703_v29, %v411_v46  ;;  %v2804_v46 = vld [vmem:[%s4071_s2 + $0x50] sm:$0xff] }
  0xa7   :  { %530 = vrot.lane.b32.xlu1 %v2415_v63, %s2028_s27  ;;  %363 = vrot.lane.b32.xlu0 %v2648_v56, %s2028_s27 }
  0xa8   :  { %v459_v34 = vadd.f32 %v443_v28, %v392_v45  ;;  %v493_v8 = vadd.f32 %v477_v0, %v458_v36  ;;  %v393_v55 = vadd.f32 %v377_v12, %v326_v25  ;;  %v2775_v28 = vsel %vm591_vm1, %v587_v21, %v579_v33  ;;  %v2815_v25 = vld [vmem:[%s4071_s2 + $0x70] sm:$0xff] }
  0xa9   :  { %v413_v53 = vpop.permute.xlu1 %412  ;;  %v2764_v1 = vpop.permute.xlu0 %246  ;;  %4192 = vst [vmem:[#allocation40_spill] sm:$0xff] %v2775_v28  ;;  %v588_v12 = vrot.slane %v2415_v63, 1 }
  0xaa   :  { %v444_v16 = vmul.f32 %v2725_v59, %v413_v53  ;;  %v494_v15 = vadd.f32 %v478_v17, %v459_v34  ;;  %v2821_v53 = vld [vmem:[%s4071_s2 + $0x58] sm:$0xff] }
  0xab   :  { %365 = vrot.lane.b32.xlu1 %v2665_v39, %s2028_s27  ;;  %624 = vrot.lane.b32.xlu0 %v2762_v42, %s2027_s16  ;;  %v2787_v30 = vsel %vm591_vm1, %v580_v35, %v588_v12  ;;  %v2797_v7 = vsel %vm591_vm1, %v588_v12, %v580_v35  ;;  %v678_v35 = vmul.f32 %v2815_v25, %v2465_v48  ;;  %v2848_v39 = vld [vmem:[%s4071_s2 + $0x68] sm:$0xff] }
  0xac   :  { %v460_v45 = vadd.f32 %v444_v16, %v393_v55  ;;  %4193 = vst [vmem:[#allocation41_spill] sm:$0xff] %v2787_v30  ;;  %4194 = vst [vmem:[#allocation42_spill] sm:$0xff] %v2797_v7  ;;  %v2830_v55 = vld [vmem:[%s4071_s2 + $0x60] sm:$0xff] }
  0xad   :  { %v2779_v10 = vpop.permute.xlu1 %248  ;;  %v509_v0 = vpop.permute.xlu0 %508 }
  0xae   :  { %v495_v54 = vadd.f32 %v479_v58, %v460_v45  ;;  %v543_v34 = vmul.f32 %v2804_v46, %v509_v0  ;;  %v2837_v45 = vld [vmem:[%s4071_s2 + $0x78] sm:$0xff] }
  0xaf   :  { %626 = vrot.lane.b32.xlu1 %v2775_v28, %s2027_s16  ;;  %367 = vrot.lane.b32.xlu0 %v2693_v43, %s2028_s27  ;;  %v679_v48 = vmul.f32 %v2837_v45, %v2476_v57 }
  0xb0   :  { %v559_v0 = vadd.f32 %v543_v34, %v492_v2 }
  0xb1   :  { %v511_v33 = vpop.permute.xlu1 %510  ;;  %v2789_v21 = vpop.permute.xlu0 %250 }
  0xb2   :  { %v544_v12 = vmul.f32 %v2821_v53, %v511_v33 }
  0xb3   :  { %369 = vrot.lane.b32.xlu1 %v2731_v47, %s2028_s27  ;;  %628 = vrot.lane.b32.xlu0 %v2787_v30, %s2027_s16 }
  0xb4   :  { %v560_v2 = vadd.f32 %v544_v12, %v493_v8 }
  0xb5   :  { %v2799_v13 = vpop.permute.xlu1 %252  ;;  %v513_v14 = vpop.permute.xlu0 %512 }
  0xb6   :  { %v545_v34 = vmul.f32 %v2804_v46, %v513_v14 }
  0xb7   :  { %630 = vrot.lane.b32.xlu1 %v2797_v7, %s2027_s16  ;;  %430 = vrot.lane.b32.xlu0 %v2624_v18, %s2027_s16 }
  0xb8   :  { %v561_v12 = vadd.f32 %v545_v34, %v494_v15  ;;  %v681_v15 = vmul.f32 %v2837_v45, %v2500_v41 }
  0xb9   :  { %v515_v17 = vpop.permute.xlu1 %514  ;;  %v2810_v36 = vpop.permute.xlu0 %347 }
  0xba   :  { %v546_v8 = vmul.f32 %v2821_v53, %v515_v17 }
  0xbb   :  { %432 = vrot.lane.b32.xlu1 %v2628_v44, %s2027_s16  ;;  %434 = vrot.lane.b32.xlu0 %v2650_v49, %s2027_s16 }
  0xbc   :  { %v562_v17 = vadd.f32 %v546_v8, %v495_v54 }
  0xbd   :  { %v2832_v16 = vpop.permute.xlu1 %349  ;;  %v609_v58 = vpop.permute.xlu0 %608 }
  0xbe   :  { %v643_v47 = vmul.f32 %v2830_v55, %v609_v58 }
  0xbf   :  { %436 = vrot.lane.b32.xlu1 %v2652_v40, %s2027_s16  ;;  %726 = vrot.lane.b32.xlu0 %v2762_v42, %s2028_s27 }
  0xc0   :  { %v659_v43 = vadd.f32 %v643_v47, %v559_v0  ;;  %v680_v47 = vmul.f32 %v2815_v25, %v2489_v38  ;;  %v589_v38 = vrot.slane %v2628_v44, 1 }
  0xc1   :  { %v611_v56 = vpop.permute.xlu1 %610  ;;  %v2854_v33 = vpop.permute.xlu0 %351 }
  0xc2   :  { %v644_v58 = vmul.f32 %v2848_v39, %v611_v56  ;;  %v694_v63 = vadd.f32 %v678_v35, %v659_v43  ;;  %v581_v35 = vrot.slane %v2624_v18, 1 }
  0xc3   :  { %728 = vrot.lane.b32.xlu1 %v2775_v28, %s2028_s27  ;;  %730 = vrot.lane.b32.xlu0 %v2787_v30, %s2028_s27 }
  0xc4   :  { %v660_v62 = vadd.f32 %v644_v58, %v560_v2 }
  0xc5   :  { %v2864_v57 = vpop.permute.xlu1 %353  ;;  %v613_v0 = vpop.permute.xlu0 %612 }
  0xc6   :  { %v645_v14 = vmul.f32 %v2830_v55, %v613_v0  ;;  %v695_v56 = vadd.f32 %v679_v48, %v660_v62  ;;  %v2885_v0 = vsel %vm591_vm1, %v581_v35, %v589_v38 }
  0xc7   :  { %732 = vrot.lane.b32.xlu1 %v2797_v7, %s2028_s27  ;;  %532 = vrot.lane.b32.xlu0 %v2624_v18, %s2028_s27  ;;  %4195 = vst [vmem:[#allocation43_spill] sm:$0xff] %v2885_v0 }
  0xc8   :  { %v661_v43 = vadd.f32 %v645_v14, %v561_v12  ;;  %v582_v12 = vrot.slane %v2650_v49, 1  ;;  %v590_v14 = vrot.slane %v2652_v40, 1 }
  0xc9   :  { %v615_v2 = vpop.permute.xlu1 %614  ;;  %v2874_v58 = vpop.permute.xlu0 %414 }
  0xca   :  { %v646_v62 = vmul.f32 %v2848_v39, %v615_v2  ;;  %v696_v48 = vadd.f32 %v680_v47, %v661_v43  ;;  %v2898_v47 = vld [vmem:[%s4071_s2 + $0x80] sm:$0xff]  ;;  %v2902_v43 = vsel %vm591_vm1, %v589_v38, %v581_v35  ;;  %v2906_v2 = vsel %vm591_vm1, %v582_v12, %v590_v14 }
  0xcb   :  { %534 = vrot.lane.b32.xlu1 %v2628_v44, %s2028_s27  ;;  %536 = vrot.lane.b32.xlu0 %v2650_v49, %s2028_s27  ;;  %4196 = vst [vmem:[#allocation44_spill] sm:$0xff] %v2902_v43  ;;  %4197 = vst [vmem:[#allocation45_spill] sm:$0xff] %v2906_v2  ;;  %v2922_v35 = vsel %vm591_vm1, %v590_v14, %v582_v12 }
  0xcc   :  { %v662_v34 = vadd.f32 %v646_v62, %v562_v17  ;;  %4198 = vst [vmem:[#allocation46_spill] sm:$0xff] %v2922_v35 }
  0xcd   :  { %v417_v41 = vpop.permute.xlu1 %416  ;;  %v2889_v54 = vpop.permute.xlu0 %418 }
  0xce   :  { %v697_v8 = vadd.f32 %v681_v15, %v662_v34  ;;  %v2916_v34 = vld [vmem:[%s4071_s2 + $0x88] sm:$0xff]  ;;  %v446_v28 = vmul.f32 %v2725_v59, %v417_v41  ;;  %v381_v41 = vmul.f32 %v2716_v24, %v2864_v57 }
  0xcf   :  { %538 = vrot.lane.b32.xlu1 %v2652_v40, %s2028_s27  ;;  %632 = vrot.lane.b32.xlu0 %v2885_v0, %s2027_s16 }
  0xd1   :  { %v2908_v15 = vpop.permute.xlu1 %420  ;;  %v711_v17 = vpop.permute.xlu0 %710 }
  0xd2   :  { %v745_v62 = vmul.f32 %v2898_v47, %v711_v17 }
  0xd3   :  { %634 = vrot.lane.b32.xlu1 %v2902_v43, %s2027_s16  ;;  %636 = vrot.lane.b32.xlu0 %v2906_v2, %s2027_s16 }
  0xd4   :  { %v761_v44 = vadd.f32 %v745_v62, %v694_v63 }
  0xd5   :  { %v713_v38 = vpop.permute.xlu1 %712  ;;  %v715_v40 = vpop.permute.xlu0 %714 }
  0xd6   :  { %v746_v49 = vmul.f32 %v2916_v34, %v713_v38  ;;  %v747_v17 = vmul.f32 %v2898_v47, %v715_v40 }
  0xd7   :  { %638 = vrot.lane.b32.xlu1 %v2922_v35, %s2027_s16  ;;  %734 = vrot.lane.b32.xlu0 %v2885_v0, %s2028_s27 }
  0xd8   :  { %v762_v18 = vadd.f32 %v746_v49, %v695_v56  ;;  %v763_v14 = vadd.f32 %v747_v17, %v696_v48 }
  0xd9   :  { %v717_v7 = vpop.permute.xlu1 %716  ;;  %v2930_v30 = vpop.permute.xlu0 %254 }
  0xda   :  { %v748_v12 = vmul.f32 %v2916_v34, %v717_v7  ;;  %v777_v3 = vpack.c.bf16 %v762_v18, %v761_v44 }
  0xdb   :  { %736 = vrot.lane.b32.xlu1 %v2902_v43, %s2028_s27  ;;  %738 = vrot.lane.b32.xlu0 %v2906_v2, %s2028_s27  ;;  %v378_v2 = vmul.f32 %v2689_v50, %v2810_v36  ;;  %v379_v43 = vmul.f32 %v2716_v24, %v2832_v16  ;;  %v314_v36 = vmul.f32 %v2674_v61, %v2440_v37 }
  0xdc   :  { %v764_v63 = vadd.f32 %v748_v12, %v697_v8  ;;  %1945 = vmatprep.mubr.bf16.mxu0 %v777_v3  ;;  %v311_v8 = vmul.f32 %v2395_v60, %v2354_v9  ;;  %v276_v12 = vmul.f32 %v2659_v51, %v2764_v1  ;;  %v313_v9 = vmul.f32 %v2395_v60, %v2419_v19 }
  0xdd   :  { %v2937_v40 = vpop.permute.xlu1 %256  ;;  %v517_v62 = vpop.permute.xlu0 %516  ;;  %v278_v1 = vmul.f32 %v2659_v51, %v2789_v21  ;;  %v279_v16 = vmul.f32 %v2682_v26, %v2799_v13  ;;  %v481_v13 = vmul.f32 %v2736_v11, %v2301_v5 }
  0xde   :  { %v778_v38 = vpack.c.bf16 %v764_v63, %v763_v14  ;;  %v312_v14 = vmul.f32 %v2674_v61, %v2388_v52  ;;  %v277_v63 = vmul.f32 %v2682_v26, %v2779_v10  ;;  %v327_v0 = vadd.f32 %v311_v8, %v276_v12 }
  0xdf   :  { %740 = vrot.lane.b32.xlu1 %v2922_v35, %s2028_s27  ;;  %v445_v52 = vmul.f32 %v2703_v29, %v2874_v58  ;;  %v380_v8 = vmul.f32 %v2689_v50, %v2854_v33  ;;  %v480_v58 = vmul.f32 %v2698_v32, %v2299_v4  ;;  %v329_v12 = vadd.f32 %v313_v9, %v278_v1 }
  0xe0   :  { %1946 = vmatmul.mubr.bf16.vlgmr.msra.gmra.mxu0 %v778_v38  ;;  %v328_v10 = vadd.f32 %v312_v14, %v277_v63  ;;  %v394_v19 = vadd.f32 %v378_v2, %v327_v0  ;;  %v447_v63 = vmul.f32 %v2703_v29, %v2889_v54  ;;  %v330_v33 = vadd.f32 %v314_v36, %v279_v16 }
  0xe1   :  { %v519_v49 = vpop.permute.xlu1 %518  ;;  %v2941_v7 = vpop.permute.xlu0 %258  ;;  %v448_v4 = vmul.f32 %v2725_v59, %v2908_v15  ;;  %v547_v9 = vmul.f32 %v2804_v46, %v517_v62  ;;  %v482_v1 = vmul.f32 %v2698_v32, %v2358_v23  ;;  %v483_v62 = vmul.f32 %v2736_v11, %v2360_v27 }
  0xe2   :  { %v395_v21 = vadd.f32 %v379_v43, %v328_v10  ;;  %v461_v14 = vadd.f32 %v445_v52, %v394_v19  ;;  %v396_v43 = vadd.f32 %v380_v8, %v329_v12  ;;  %v548_v57 = vmul.f32 %v2821_v53, %v519_v49 }
  0xe3   :  { %v397_v54 = vadd.f32 %v381_v41, %v330_v33  ;;  %v682_v23 = vmul.f32 %v2815_v25, %v2564_v20  ;;  %v683_v41 = vmul.f32 %v2837_v45, %v2572_v22 }
  0xe4   :  { %v462_v37 = vadd.f32 %v446_v28, %v395_v21  ;;  %v463_v28 = vadd.f32 %v447_v63, %v396_v43  ;;  %v496_v52 = vadd.f32 %v480_v58, %v461_v14 }
  0xe5   :  { %v2943_v18 = vpop.permute.xlu1 %260  ;;  %v521_v44 = vpop.permute.xlu0 %520  ;;  %v464_v8 = vadd.f32 %v448_v4, %v397_v54 }
  0xe6   :  { %v497_v10 = vadd.f32 %v481_v13, %v462_v37  ;;  %v563_v15 = vadd.f32 %v547_v9, %v496_v52  ;;  %v549_v49 = vmul.f32 %v2804_v46, %v521_v44 }
  0xe7   :  { %v499_v27 = vadd.f32 %v483_v62, %v464_v8 }
  0xe8   :  { %v564_v21 = vadd.f32 %v548_v57, %v497_v10 }
  0xe9   :  { %v523_v56 = vpop.permute.xlu1 %522  ;;  %v2945_v48 = vpop.permute.xlu0 %355 }
  0xea   :  { %v550_v58 = vmul.f32 %v2821_v53, %v523_v56  ;;  %v684_v56 = vmul.f32 %v2815_v25, %v2590_v6 }
  0xec   :  { %v566_v33 = vadd.f32 %v550_v58, %v499_v27 }
  0xed   :  { %v2947_v17 = vpop.permute.xlu1 %357  ;;  %v617_v3 = vpop.permute.xlu0 %616 }
  0xee   :  { %v647_v5 = vmul.f32 %v2830_v55, %v617_v3  ;;  %v498_v3 = vadd.f32 %v482_v1, %v463_v28 }
  0xf0   :  { %v663_v12 = vadd.f32 %v647_v5, %v563_v15  ;;  %v565_v13 = vadd.f32 %v549_v49, %v498_v3 }
  0xf1   :  { %v619_v38 = vpop.permute.xlu1 %618  ;;  %v2957_v35 = vpop.permute.xlu0 %359 }
  0xf2   :  { %v648_v19 = vmul.f32 %v2848_v39, %v619_v38  ;;  %v698_v4 = vadd.f32 %v682_v23, %v663_v12  ;;  %v280_v12 = vmul.f32 %v2659_v51, %v2930_v30 }
  0xf4   :  { %v664_v14 = vadd.f32 %v648_v19, %v564_v21 }
  0xf5   :  { %v2970_v42 = vpop.permute.xlu1 %361  ;;  %v621_v31 = vpop.permute.xlu0 %620 }
  0xf6   :  { %v649_v38 = vmul.f32 %v2830_v55, %v621_v31  ;;  %v4199_v31 = vld [vmem:[#allocation30_spill] sm:$0xff]  ;;  %v699_v22 = vadd.f32 %v683_v41, %v664_v14  ;;  %v382_v14 = vmul.f32 %v2689_v50, %v2945_v48 }
  0xf7   :  { %v685_v9 = vmul.f32 %v2837_v45, %v4199_v31  ;;  %v4202_v31 = vld [vmem:[#allocation22_spill] sm:$0xff] }
  0xf8   :  { %v665_v43 = vadd.f32 %v649_v38, %v565_v13  ;;  %v281_v13 = vmul.f32 %v2682_v26, %v2937_v40  ;;  %v484_v48 = vmul.f32 %v2698_v32, %v4202_v31 }
  0xf9   :  { %v623_v0 = vpop.permute.xlu1 %622  ;;  %v2986_v2 = vpop.permute.xlu0 %422 }
  0xfa   :  { %v650_v44 = vmul.f32 %v2848_v39, %v623_v0  ;;  %v700_v10 = vadd.f32 %v684_v56, %v665_v43  ;;  %v449_v56 = vmul.f32 %v2703_v29, %v2986_v2  ;;  %v383_v43 = vmul.f32 %v2716_v24, %v2947_v17 }
  0xfc   :  { %v666_v54 = vadd.f32 %v650_v44, %v566_v33  ;;  %v4201_v44 = vld [vmem:[#allocation24_spill] sm:$0xff] }
  0xfd   :  { %v425_v36 = vpop.permute.xlu1 %424  ;;  %v2996_v16 = vpop.permute.xlu0 %426 }
  0xfe   :  { %v701_v6 = vadd.f32 %v685_v9, %v666_v54  ;;  %v450_v40 = vmul.f32 %v2725_v59, %v425_v36  ;;  %v4205_v36 = vld [vmem:[#allocation27_spill] sm:$0xff] }
 0x101   :  { %v3007_v63 = vpop.permute.xlu1 %428  ;;  %v719_v37 = vpop.permute.xlu0 %718 }
 0x102   :  { %v749_v20 = vmul.f32 %v2898_v47, %v719_v37  ;;  %v4200_v37 = vld [vmem:[#allocation28_spill] sm:$0xff] }
 0x103   :  { %v316_v27 = vmul.f32 %v2674_v61, %v4200_v37 }
 0x104   :  { %v765_v52 = vadd.f32 %v749_v20, %v698_v4  ;;  %v331_v20 = vadd.f32 %v4201_v44, %v280_v12  ;;  %v452_v44 = vmul.f32 %v2725_v59, %v3007_v63 }
 0x105   :  { %v721_v57 = vpop.permute.xlu1 %720  ;;  %v723_v1 = vpop.permute.xlu0 %722  ;;  %v332_v9 = vadd.f32 %v316_v27, %v281_v13  ;;  %v4207_v13 = vld [vmem:[#allocation25_spill] sm:$0xff] }
 0x106   :  { %v750_v28 = vmul.f32 %v2916_v34, %v721_v57  ;;  %v751_v0 = vmul.f32 %v2898_v47, %v723_v1  ;;  %v398_v4 = vadd.f32 %v382_v14, %v331_v20 }
 0x107   :  { %v399_v2 = vadd.f32 %v383_v43, %v332_v9 }
 0x108   :  { %v766_v5 = vadd.f32 %v750_v28, %v699_v22  ;;  %v767_v62 = vadd.f32 %v751_v0, %v700_v10  ;;  %v282_v22 = vmul.f32 %v2659_v51, %v2941_v7  ;;  %v465_v57 = vadd.f32 %v449_v56, %v398_v4  ;;  %v4204_v10 = vld [vmem:[#allocation23_spill] sm:$0xff] }
 0x109   :  { %v725_v19 = vpop.permute.xlu1 %724  ;;  %v3017_v8 = vpop.permute.xlu0 %262  ;;  %v384_v28 = vmul.f32 %v2689_v50, %v2957_v35  ;;  %v485_v7 = vmul.f32 %v2736_v11, %v4204_v10 }
 0x10a   :  { %v752_v15 = vmul.f32 %v2916_v34, %v725_v19  ;;  %v779_v49 = vpack.c.bf16 %v766_v5, %v765_v52  ;;  %v4203_v52 = vld [vmem:[#allocation29_spill] sm:$0xff]  ;;  %v283_v5 = vmul.f32 %v2682_v26, %v2943_v18  ;;  %v333_v19 = vadd.f32 %v4205_v36, %v282_v22 }
 0x10b   :  { %v318_v0 = vmul.f32 %v2674_v61, %v4203_v52 }
 0x10c   :  { %v768_v23 = vadd.f32 %v752_v15, %v701_v6  ;;  %1949 = vmatprep.mubr.bf16.mxu0 %v779_v49  ;;  %v466_v6 = vadd.f32 %v450_v40, %v399_v2  ;;  %v451_v15 = vmul.f32 %v2703_v29, %v2996_v16  ;;  %v4206_v49 = vld [vmem:[#allocation39_spill] sm:$0xff]  ;;  %v400_v18 = vadd.f32 %v384_v28, %v333_v19  ;;  %v4209_v28 = vld [vmem:[#allocation26_spill] sm:$0xff] }
 0x10d   :  { %v3020_v21 = vpop.permute.xlu1 %264  ;;  %v525_v58 = vpop.permute.xlu0 %524  ;;  %v686_v35 = vmul.f32 %v2815_v25, %v4206_v49  ;;  %v334_v27 = vadd.f32 %v318_v0, %v283_v5  ;;  %v486_v16 = vmul.f32 %v2698_v32, %v4207_v13  ;;  %v4210_v0 = vld [vmem:[#allocation41_spill] sm:$0xff] }
 0x10e   :  { %v780_v3 = vpack.c.bf16 %v768_v23, %v767_v62  ;;  %v551_v17 = vmul.f32 %v2804_v46, %v525_v58  ;;  %v500_v62 = vadd.f32 %v484_v48, %v465_v57  ;;  %v385_v23 = vmul.f32 %v2716_v24, %v2970_v42  ;;  %v4208_v42 = vld [vmem:[#allocation40_spill] sm:$0xff] }
 0x10f   :  { %v467_v20 = vadd.f32 %v451_v15, %v400_v18  ;;  %v501_v56 = vadd.f32 %v485_v7, %v466_v6  ;;  %v687_v4 = vmul.f32 %v2837_v45, %v4208_v42  ;;  %v688_v5 = vmul.f32 %v2815_v25, %v4210_v0  ;;  %v4215_v0 = vld [vmem:[#allocation38_spill] sm:$0xff] }
 0x110   :  { %1950 = vmatmul.mubr.bf16.gmra.mxu0 %v780_v3  ;;  %v567_v14 = vadd.f32 %v551_v17, %v500_v62  ;;  %v401_v31 = vadd.f32 %v385_v23, %v334_v27  ;;  %v487_v17 = vmul.f32 %v2736_v11, %v4209_v28  ;;  %v4211_v23 = vld [vmem:[#allocation42_spill] sm:$0xff] }
 0x111   :  { %v527_v38 = vpop.permute.xlu1 %526  ;;  %v3024_v41 = vpop.permute.xlu0 %266  ;;  %v502_v63 = vadd.f32 %v486_v16, %v467_v20  ;;  %v284_v20 = vmul.f32 %v2659_v51, %v3017_v8 }
 0x112   :  { %v552_v12 = vmul.f32 %v2821_v53, %v527_v38  ;;  %v468_v2 = vadd.f32 %v452_v44, %v401_v31 }
 0x114   :  { %v568_v38 = vadd.f32 %v552_v12, %v501_v56  ;;  %v503_v15 = vadd.f32 %v487_v17, %v468_v2 }
 0x115   :  { %v3035_v33 = vpop.permute.xlu1 %268  ;;  %v529_v30 = vpop.permute.xlu0 %528 }
 0x116   :  { %v553_v22 = vmul.f32 %v2804_v46, %v529_v30 }
 0x118   :  { %v569_v19 = vadd.f32 %v553_v22, %v502_v63 }
 0x119   :  { %v531_v1 = vpop.permute.xlu1 %530  ;;  %v3044_v54 = vpop.permute.xlu0 %363 }
 0x11a   :  { %v554_v36 = vmul.f32 %v2821_v53, %v531_v1  ;;  %v4212_v1 = vld [vmem:[#allocation33_spill] sm:$0xff]  ;;  %v386_v8 = vmul.f32 %v2689_v50, %v3044_v54 }
 0x11b   :  { %v319_v44 = vmul.f32 %v2395_v60, %v4212_v1 }
 0x11c   :  { %v570_v18 = vadd.f32 %v554_v36, %v503_v15 }
 0x11d   :  { %v3062_v58 = vpop.permute.xlu1 %365  ;;  %v625_v3 = vpop.permute.xlu0 %624  ;;  %v335_v2 = vadd.f32 %v319_v44, %v284_v20 }
 0x11e   :  { %v651_v37 = vmul.f32 %v2830_v55, %v625_v3  ;;  %v689_v3 = vmul.f32 %v2837_v45, %v4211_v23  ;;  %v387_v54 = vmul.f32 %v2716_v24, %v3062_v58 }
 0x11f   :  { %v402_v15 = vadd.f32 %v386_v8, %v335_v2 }
 0x120   :  { %v667_v43 = vadd.f32 %v651_v37, %v567_v14 }
 0x121   :  { %v627_v48 = vpop.permute.xlu1 %626  ;;  %v368_v9 = vpop.permute.xlu0 %367 }
 0x122   :  { %v652_v40 = vmul.f32 %v2848_v39, %v627_v48  ;;  %v702_v57 = vadd.f32 %v686_v35, %v667_v43  ;;  %v286_v48 = vmul.f32 %v2659_v51, %v3024_v41  ;;  %v322_v51 = vmul.f32 %v2674_v61, %v4215_v0 }
 0x123   :  { %v287_v41 = vmul.f32 %v2682_v26, %v3035_v33 }
 0x124   :  { %v668_v52 = vadd.f32 %v652_v40, %v568_v38  ;;  %v4214_v38 = vld [vmem:[#allocation36_spill] sm:$0xff]  ;;  %v285_v40 = vmul.f32 %v2682_v26, %v3020_v21  ;;  %v388_v21 = vmul.f32 %v2689_v50, %v368_v9  ;;  %v4216_v50 = vld [vmem:[#allocation31_spill] sm:$0xff] }
 0x125   :  { %v370_v10 = vpop.permute.xlu1 %369  ;;  %v629_v7 = vpop.permute.xlu0 %628  ;;  %v320_v22 = vmul.f32 %v2674_v61, %v4214_v38  ;;  %v338_v23 = vadd.f32 %v322_v51, %v287_v41  ;;  %v488_v9 = vmul.f32 %v2698_v32, %v4216_v50 }
 0x126   :  { %v653_v6 = vmul.f32 %v2830_v55, %v629_v7  ;;  %v703_v30 = vadd.f32 %v687_v4, %v668_v52  ;;  %v4213_v4 = vld [vmem:[#allocation37_spill] sm:$0xff]  ;;  %v389_v26 = vmul.f32 %v2716_v24, %v370_v10  ;;  %v4217_v10 = vld [vmem:[#allocation32_spill] sm:$0xff] }
 0x127   :  { %v321_v31 = vmul.f32 %v2395_v60, %v4213_v4  ;;  %v4218_v4 = vld [vmem:[#allocation34_spill] sm:$0xff] }
 0x128   :  { %v669_v62 = vadd.f32 %v653_v6, %v569_v19  ;;  %v336_v19 = vadd.f32 %v320_v22, %v285_v40  ;;  %v405_v44 = vadd.f32 %v389_v26, %v338_v23 }
 0x129   :  { %v631_v49 = vpop.permute.xlu1 %630  ;;  %v431_v35 = vpop.permute.xlu0 %430 }
 0x12a   :  { %v654_v12 = vmul.f32 %v2848_v39, %v631_v49  ;;  %v704_v14 = vadd.f32 %v688_v5, %v669_v62  ;;  %v337_v5 = vadd.f32 %v321_v31, %v286_v48  ;;  %v453_v7 = vmul.f32 %v2703_v29, %v431_v35  ;;  %v4219_v48 = vld [vmem:[#allocation43_spill] sm:$0xff] }
 0x12b   :  { %v690_v38 = vmul.f32 %v2815_v25, %v4219_v48 }
 0x12c   :  { %v670_v37 = vadd.f32 %v654_v12, %v570_v18  ;;  %v469_v35 = vadd.f32 %v453_v7, %v402_v15  ;;  %v403_v18 = vadd.f32 %v387_v54, %v336_v19 }
 0x12d   :  { %v433_v27 = vpop.permute.xlu1 %432  ;;  %v435_v13 = vpop.permute.xlu0 %434 }
 0x12e   :  { %v705_v16 = vadd.f32 %v689_v3, %v670_v37  ;;  %v454_v33 = vmul.f32 %v2725_v59, %v433_v27  ;;  %v455_v3 = vmul.f32 %v2703_v29, %v435_v13  ;;  %v489_v27 = vmul.f32 %v2736_v11, %v4217_v10 }
 0x12f   :  { %v490_v29 = vmul.f32 %v2698_v32, %v4218_v4  ;;  %v4221_v32 = vld [vmem:[#allocation44_spill] sm:$0xff] }
 0x130   :  { %v470_v20 = vadd.f32 %v454_v33, %v403_v18 }
 0x131   :  { %v437_v56 = vpop.permute.xlu1 %436  ;;  %v727_v43 = vpop.permute.xlu0 %726 }
 0x132   :  { %v753_v42 = vmul.f32 %v2898_v47, %v727_v43  ;;  %v456_v24 = vmul.f32 %v2725_v59, %v437_v56  ;;  %v505_v2 = vadd.f32 %v489_v27, %v470_v20 }
 0x134   :  { %v769_v52 = vadd.f32 %v753_v42, %v702_v57  ;;  %v504_v42 = vadd.f32 %v488_v9, %v469_v35  ;;  %v472_v56 = vadd.f32 %v456_v24, %v405_v44  ;;  %v3144_v24 = vld [vmem:[%s4073_s4] ss:$0 sm:$0xff] }
 0x135   :  { %v729_v28 = vpop.permute.xlu1 %728  ;;  %v731_v17 = vpop.permute.xlu0 %730 }
 0x136   :  { %v754_v63 = vmul.f32 %v2916_v34, %v729_v28  ;;  %v755_v60 = vmul.f32 %v2898_v47, %v731_v17  ;;  %v4220_v28 = vld [vmem:[#allocation35_spill] sm:$0xff] }
 0x137   :  { %v491_v17 = vmul.f32 %v2736_v11, %v4220_v28 }
 0x138   :  { %v770_v36 = vadd.f32 %v754_v63, %v703_v30  ;;  %v771_v49 = vadd.f32 %v755_v60, %v704_v14  ;;  %v404_v30 = vadd.f32 %v388_v21, %v337_v5  ;;  %v4222_v60 = vld [vmem:[#allocation45_spill] sm:$0xff] }
 0x139   :  { %v733_v6 = vpop.permute.xlu1 %732  ;;  %v533_v57 = vpop.permute.xlu0 %532  ;;  %v692_v0 = vmul.f32 %v2815_v25, %v4222_v60  ;;  %v507_v11 = vadd.f32 %v491_v17, %v472_v56  ;;  %v4227_v56 = vld [vmem:[#allocation11_spill] sm:$0xff]  ;;  %v4228_v17 = vld [vmem:[#allocation8_spill] sm:$0xff] }
 0x13a   :  { %v756_v62 = vmul.f32 %v2916_v34, %v733_v6  ;;  %v781_v61 = vpack.c.bf16 %v770_v36, %v769_v52  ;;  %v555_v14 = vmul.f32 %v2804_v46, %v533_v57  ;;  %v471_v43 = vadd.f32 %v455_v3, %v404_v30  ;;  %v4223_v57 = vld [vmem:[#allocation46_spill] sm:$0xff] }
 0x13b   :  { %v691_v52 = vmul.f32 %v2837_v45, %v4221_v32  ;;  %v693_v15 = vmul.f32 %v2837_v45, %v4223_v57 }
 0x13c   :  { %v772_v58 = vadd.f32 %v756_v62, %v705_v16  ;;  %1953 = vmatprep.mubr.bf16.mxu0 %v781_v61  ;;  %v571_v22 = vadd.f32 %v555_v14, %v504_v42  ;;  %v506_v8 = vadd.f32 %v490_v29, %v471_v43  ;;  %v4224_v43 = vld [vmem:[#allocation6_spill] sm:$0xff] }
 0x13d   :  { %v535_v12 = vpop.permute.xlu1 %534  ;;  %v537_v37 = vpop.permute.xlu0 %536 }
 0x13e   :  { %v782_v1 = vpack.c.bf16 %v772_v58, %v771_v49  ;;  %v556_v13 = vmul.f32 %v2821_v53, %v535_v12  ;;  %v557_v40 = vmul.f32 %v2804_v46, %v537_v37 }
 0x140   :  { %1954 = vmatmul.mubr.bf16.gmra.mxu0 %v782_v1  ;;  %v572_v51 = vadd.f32 %v556_v13, %v505_v2  ;;  %v573_v21 = vadd.f32 %v557_v40, %v506_v8  ;;  %v4225_v13 = vld [vmem:[#allocation7_spill] sm:$0xff] }
 0x141   :  { %v539_v16 = vpop.permute.xlu1 %538  ;;  %v633_v31 = vpop.permute.xlu0 %632 }
 0x142   :  { %v655_v59 = vmul.f32 %v2830_v55, %v633_v31  ;;  %v558_v41 = vmul.f32 %v2821_v53, %v539_v16  ;;  %v4226_v31 = vld [vmem:[#allocation10_spill] sm:$0xff] }
 0x144   :  { %v671_v63 = vadd.f32 %v655_v59, %v571_v22  ;;  %v574_v62 = vadd.f32 %v558_v41, %v507_v11 }
 0x145   :  { %v635_v5 = vpop.permute.xlu1 %634  ;;  %v637_v46 = vpop.permute.xlu0 %636 }
 0x146   :  { %v656_v7 = vmul.f32 %v2848_v39, %v635_v5  ;;  %v657_v36 = vmul.f32 %v2830_v55, %v637_v46  ;;  %v706_v19 = vadd.f32 %v690_v38, %v671_v63  ;;  %v4229_v63 = vld [vmem:[#allocation12_spill] sm:$0xff] }
 0x148   :  { %v672_v54 = vadd.f32 %v656_v7, %v572_v51  ;;  %v673_v6 = vadd.f32 %v657_v36, %v573_v21  ;;  %v4230_v51 = vld [vmem:[#allocation9_spill] sm:$0xff] }
 0x149   :  { %v639_v49 = vpop.permute.xlu1 %638  ;;  %v735_v25 = vpop.permute.xlu0 %734 }
 0x14a   :  { %v658_v61 = vmul.f32 %v2848_v39, %v639_v49  ;;  %v707_v53 = vadd.f32 %v691_v52, %v672_v54  ;;  %v757_v23 = vmul.f32 %v2898_v47, %v735_v25  ;;  %v708_v26 = vadd.f32 %v692_v0, %v673_v6 }
 0x14c   :  { %v674_v33 = vadd.f32 %v658_v61, %v574_v62  ;;  %v773_v30 = vadd.f32 %v757_v23, %v706_v19  ;;  %v4231_v62 = vld [vmem:[#allocation13_spill] sm:$0xff] }
 0x14d   :  { %v737_v50 = vpop.permute.xlu1 %736  ;;  %v739_v9 = vpop.permute.xlu0 %738 }
 0x14e   :  { %v758_v55 = vmul.f32 %v2916_v34, %v737_v50  ;;  %v709_v35 = vadd.f32 %v693_v15, %v674_v33  ;;  %v759_v3 = vmul.f32 %v2898_v47, %v739_v9  ;;  %v4232_v50 = vld [vmem:[#allocation14_spill] sm:$0xff] }
 0x150   :  { %v774_v58 = vadd.f32 %v758_v55, %v707_v53  ;;  %v775_v12 = vadd.f32 %v759_v3, %v708_v26  ;;  %v4234_v3 = vld [vmem:[#allocation16_spill] sm:$0xff] }
 0x151   :  { %v741_v45 = vpop.permute.xlu1 %740 }
 0x152   :  { %v760_v18 = vmul.f32 %v2916_v34, %v741_v45  ;;  %v783_v37 = vpack.c.bf16 %v774_v58, %v773_v30  ;;  %v4233_v30 = vld [vmem:[#allocation15_spill] sm:$0xff] }
 0x154   :  { %v776_v39 = vadd.f32 %v760_v18, %v709_v35  ;;  %1957 = vmatprep.mubr.bf16.mxu0 %v783_v37 }
 0x156   :  { %v784_v14 = vpack.c.bf16 %v776_v39, %v775_v12  ;;  %v4235_v12 = vld [vmem:[#allocation18_spill] sm:$0xff] }
 0x158   :  { %1958 = vmatmul.mubr.bf16.gmra.mxu0 %v784_v14  ;;  %v4236_v14 = vld [vmem:[#allocation19_spill] sm:$0xff] }
 0x1a0   :  { %v1947_v1 = vpop.f32.mrf.mxu0 }
 0x1a1   :  { %v899_v27 = vadd.f32 %v1947_v1, %v3144_v24 }
 0x1a2   :  { %v890_v44 = vpop.f32.mrf.mxu0 }
 0x1a3   :  { %v891_v47 = vadd.f32 %v3144_v24, %v890_v44  ;;  %v955_v16 = vmul.f32 %v899_v27, %v4225_v13  ;;  %v969_v2 = vmul.f32 %v899_v27, %v4227_v56  ;;  %v983_v35 = vmul.f32 %v899_v27, %v4233_v30 }
 0x1a4   :  { %v1948_v20 = vpop.f32.mrf.mxu0  ;;  %v997_v1 = vmul.f32 %v899_v27, %v4236_v14 }
 0x1a5   :  { %v953_v42 = vmul.f32 %v891_v47, %v4224_v43  ;;  %v967_v48 = vmul.f32 %v891_v47, %v4226_v31  ;;  %v902_v59 = vadd.f32 %v1948_v20, %v3144_v24  ;;  %v981_v9 = vmul.f32 %v891_v47, %v4232_v50  ;;  %v4237_v20 = vld [vmem:[#allocation20_spill] sm:$0xff] }
 0x1a6   :  { %v893_v10 = vpop.f32.mrf.mxu0  ;;  %v995_v37 = vmul.f32 %v891_v47, %v4235_v12 }
 0x1a7   :  { %v894_v29 = vadd.f32 %v3144_v24, %v893_v10  ;;  %v957_v28 = vadd.f32 %v955_v16, %v953_v42  ;;  %v971_v0 = vadd.f32 %v969_v2, %v967_v48  ;;  %v956_v46 = vmul.f32 %v902_v59, %v4225_v13  ;;  %v4238_v16 = vld [vmem:[#allocation17_spill] sm:$0xff] }
 0x1a8   :  { %v970_v54 = vmul.f32 %v902_v59, %v4227_v56  ;;  %v985_v18 = vadd.f32 %v983_v35, %v981_v9  ;;  %v2005_v9 = vld [vmem:[%s4075_s6 + $0x30] sm:$0xff]  }
 0x1a9   :  { %v954_v60 = vmul.f32 %v894_v29, %v4224_v43  ;;  %v968_v21 = vmul.f32 %v894_v29, %v4226_v31  ;;  %v982_v39 = vmul.f32 %v894_v29, %v4232_v50 }
 0x1ab   :  { %v958_v6 = vadd.f32 %v956_v46, %v954_v60  ;;  %v972_v25 = vadd.f32 %v970_v54, %v968_v21 }
 0x1d0   :  { %v1951_v34 = vpop.f32.mrf.mxu0 }
 0x1d1   :  { %v915_v38 = vadd.f32 %v1951_v34, %v3144_v24  ;;  %v984_v34 = vmul.f32 %v902_v59, %v4233_v30 }
 0x1d2   :  { %v906_v4 = vpop.f32.mrf.mxu0 }
 0x1d3   :  { %v907_v22 = vadd.f32 %v3144_v24, %v906_v4  ;;  %v963_v41 = vmul.f32 %v915_v38, %v4230_v51  ;;  %v977_v49 = vmul.f32 %v915_v38, %v4231_v62  ;;  %v999_v4 = vadd.f32 %v997_v1, %v995_v37 }
 0x1d4   :  { %v1952_v40 = vpop.f32.mrf.mxu0  ;;  %v991_v47 = vmul.f32 %v915_v38, %v4238_v16  ;;  %v986_v48 = vadd.f32 %v984_v34, %v982_v39  ;;  %v2007_v39 = vld [vmem:[%s4075_s6 + $0x20] sm:$0xff]  }
 0x1d5   :  { %v959_v8 = vmul.f32 %v907_v22, %v4228_v17  ;;  %v973_v32 = vmul.f32 %v907_v22, %v4229_v63  ;;  %v918_v7 = vadd.f32 %v1952_v40, %v3144_v24  ;;  %v987_v58 = vmul.f32 %v907_v22, %v4234_v3 }
 0x1d6   :  { %v909_v52 = vpop.f32.mrf.mxu0  ;;  %v1001_v10 = vmul.f32 %v907_v22, %v4237_v20  ;;  %v996_v40 = vmul.f32 %v894_v29, %v4235_v12  ;;  %v998_v22 = vmul.f32 %v902_v59, %v4236_v14 }
 0x1d7   :  { %v961_v5 = vadd.f32 %v959_v8, %v957_v28  ;;  %v910_v36 = vadd.f32 %v3144_v24, %v909_v52  ;;  %v975_v19 = vadd.f32 %v973_v32, %v971_v0  ;;  %v964_v61 = vmul.f32 %v918_v7, %v4230_v51  ;;  %v4239_v32 = vld [vmem:[#allocation21_spill] sm:$0xff] }
 0x1d8   :  { %v978_v55 = vmul.f32 %v918_v7, %v4231_v62  ;;  %v989_v44 = vadd.f32 %v987_v58, %v985_v18  ;;  %v1003_v27 = vadd.f32 %v1001_v10, %v999_v4  ;;  %v1005_v52 = vmul.f32 %v915_v38, %v4239_v32  ;;  %v2006_v18 = vld [vmem:[%s4075_s6 + $0x28] sm:$0xff]  }
 0x1d9   :  { %v3164_v11 = vadd.f32 %v963_v41, %v961_v5  ;;  %v960_v57 = vmul.f32 %v910_v36, %v4228_v17  ;;  %v974_v15 = vmul.f32 %v910_v36, %v4229_v63  ;;  %v3173_v23 = vadd.f32 %v977_v49, %v975_v19  ;;  %v2004_v49 = vld [vmem:[%s4075_s6 + $0x38] sm:$0xff]  }
 0x1da   :  { %v988_v42 = vmul.f32 %v910_v36, %v4234_v3  ;;  %v3203_v2 = vadd.f32 %v991_v47, %v989_v44  ;;  %v1002_v8 = vmul.f32 %v910_v36, %v4237_v20  ;;  %v1000_v60 = vadd.f32 %v998_v22, %v996_v40  ;;  %1961 = vmatprep.subr.bf16.mxu1 %v2004_v49  ;;  %v2009_v47 = vld [vmem:[%s4075_s6 + $0x10] sm:$0xff]   ;;  %v2010_v22 = vld [vmem:[%s4075_s6 + $0x8] sm:$0xff]  }
 0x1db   :  { %1265 = vrot.lane.b32.xlu0 %v3164_v11, %s2027_s16  ;;  %v962_v53 = vadd.f32 %v960_v57, %v958_v6  ;;  %v976_v26 = vadd.f32 %v974_v15, %v972_v25  ;;  %v992_v0 = vmul.f32 %v918_v7, %v4238_v16  ;;  %v3213_v29 = vadd.f32 %v1005_v52, %v1003_v27 }
 0x1dc   :  { %v990_v28 = vadd.f32 %v988_v42, %v986_v48  ;;  %v1004_v41 = vadd.f32 %v1002_v8, %v1000_v60  ;;  %v1006_v59 = vmul.f32 %v918_v7, %v4239_v32  ;;  %v1065_v21 = vrot.slane %v3164_v11, 7  ;;  %1962 = vmatpush3.bf16.msra.mxu1 %v2004_v49  ;;  %v2008_v42 = vld [vmem:[%s4075_s6 + $0x18] sm:$0xff]   ;;  %v2011_v60 = vld [vmem:[%s4075_s6] sm:$0xff]  }
 0x1dd   :  { %v3175_v33 = vadd.f32 %v964_v61, %v962_v53  ;;  %v3185_v45 = vadd.f32 %v978_v55, %v976_v26  ;;  %v1066_v54 = vrot.slane %v3173_v23, 7  ;;  %v1067_v61 = vrot.slane %v3203_v2, 7  ;;  %1963 = vmatprep.subr.bf16.mxu1 %v2005_v9 }
 0x1de   :  { %v3215_v5 = vadd.f32 %v992_v0, %v990_v28  ;;  %v3222_v38 = vadd.f32 %v1006_v59, %v1004_v41  ;;  %v1068_v55 = vrot.slane %v3213_v29, 7  ;;  %v1434_v44 = vrot.slane %v3164_v11, 1 }
 0x1df   :  { %1269 = vrot.lane.b32.xlu0 %v3173_v23, %s2027_s16  ;;  %1267 = vrot.lane.b32.xlu1 %v3175_v33, %s2027_s16  ;;  %v1073_v46 = vrot.slane %v3175_v33, 7  ;;  %v1074_v19 = vrot.slane %v3185_v45, 7  ;;  %v1442_v37 = vrot.slane %v3175_v33, 1  ;;  %v1443_v48 = vrot.slane %v3185_v45, 1 }
 0x1e0   :  { %v1075_v25 = vrot.slane %v3215_v5, 7  ;;  %v1076_v26 = vrot.slane %v3222_v38, 7  ;;  %1964 = vmatpush3.bf16.msra.mxu1 %v2005_v9  ;;  %v1435_v27 = vrot.slane %v3173_v23, 1  ;;  %v1444_v59 = vrot.slane %v3215_v5, 1 }
 0x1e1   :  { %v3236_v36 = vsel %vm221_vm0, %v1073_v46, %v1065_v21  ;;  %v3246_v6 = vsel %vm221_vm0, %v1074_v19, %v1066_v54  ;;  %v3252_v57 = vsel %vm221_vm0, %v1065_v21, %v1073_v46  ;;  %v3260_v15 = vsel %vm221_vm0, %v1066_v54, %v1074_v19  ;;  %1965 = vmatprep.subr.bf16.mxu1 %v2006_v18 }
 0x1e2   :  { %v3275_v53 = vsel %vm221_vm0, %v1075_v25, %v1067_v61  ;;  %v3288_v35 = vsel %vm221_vm0, %v1076_v26, %v1068_v55  ;;  %v3294_v58 = vsel %vm221_vm0, %v1067_v61, %v1075_v25  ;;  %v3309_v1 = vsel %vm221_vm0, %v1068_v55, %v1076_v26 }
 0x1e3   :  { %1367 = vrot.lane.b32.xlu0 %v3164_v11, %s2028_s27  ;;  %1271 = vrot.lane.b32.xlu1 %v3185_v45, %s2027_s16  ;;  %v3316_v34 = vsel %vm591_vm1, %v1434_v44, %v1442_v37  ;;  %v3333_v40 = vsel %vm591_vm1, %v1442_v37, %v1434_v44  ;;  %v3343_v8 = vsel %vm591_vm1, %v1435_v27, %v1443_v48  ;;  %v1436_v21 = vrot.slane %v3203_v2, 1 }
 0x1e4   :  { %1966 = vmatpush3.bf16.msra.mxu1 %v2006_v18  ;;  %4241 = vst [vmem:[#allocation30_spill] sm:$0xff] %v3343_v8  ;;  %v3356_v41 = vsel %vm591_vm1, %v1443_v48, %v1435_v27  ;;  %v1445_v54 = vrot.slane %v3222_v38, 1  ;;  %v1437_v61 = vrot.slane %v3213_v29, 1 }
 0x1e5   :  { %1967 = vmatprep.subr.bf16.mxu1 %v2007_v39  ;;  %4242 = vst [vmem:[#allocation28_spill] sm:$0xff] %v3356_v41  ;;  %v3368_v19 = vsel %vm591_vm1, %v1436_v21, %v1444_v59 }
 0x1e6   :  { %4243 = vst [vmem:[#allocation24_spill] sm:$0xff] %v3368_v19  ;;  %v3381_v55 = vsel %vm591_vm1, %v1437_v61, %v1445_v54 }
 0x1e7   :  { %1371 = vrot.lane.b32.xlu0 %v3173_v23, %s2028_s27  ;;  %1369 = vrot.lane.b32.xlu1 %v3175_v33, %s2028_s27  ;;  %4244 = vst [vmem:[#allocation22_spill] sm:$0xff] %v3381_v55 }
 0x1e8   :  { %1968 = vmatpush3.bf16.msra.mxu1 %v2007_v39  ;;  %v3388_v39 = vsel %vm591_vm1, %v1444_v59, %v1436_v21 }
 0x1e9   :  { %1969 = vmatprep.subr.bf16.mxu1 %v2008_v42  ;;  %4245 = vst [vmem:[#allocation29_spill] sm:$0xff] %v3388_v39 }
 0x1eb   :  { %1273 = vrot.lane.b32.xlu0 %v3203_v2, %s2027_s16  ;;  %1373 = vrot.lane.b32.xlu1 %v3185_v45, %s2028_s27 }
 0x1ec   :  { %1970 = vmatpush3.bf16.msra.mxu1 %v2008_v42 }
 0x1ed   :  { %1971 = vmatprep.subr.bf16.mxu1 %v2009_v47 }
 0x1ef   :  { %1277 = vrot.lane.b32.xlu0 %v3213_v29, %s2027_s16  ;;  %1275 = vrot.lane.b32.xlu1 %v3215_v5, %s2027_s16 }
 0x1f0   :  { %1972 = vmatpush3.bf16.msra.mxu1 %v2009_v47 }
 0x1f1   :  { %1973 = vmatprep.subr.bf16.mxu1 %v2010_v22 }
 0x1f3   :  { %1375 = vrot.lane.b32.xlu0 %v3203_v2, %s2028_s27  ;;  %1279 = vrot.lane.b32.xlu1 %v3222_v38, %s2027_s16 }
 0x1f4   :  { %1974 = vmatpush3.bf16.msra.mxu1 %v2010_v22 }
 0x1f5   :  { %1975 = vmatprep.subr.bf16.mxu1 %v2011_v60 }
 0x1f7   :  { %1379 = vrot.lane.b32.xlu0 %v3213_v29, %s2028_s27  ;;  %1377 = vrot.lane.b32.xlu1 %v3215_v5, %s2028_s27 }
 0x1f8   :  { %1976 = vmatpush3.bf16.msra.mxu1 %v2011_v60 }
 0x1fb   :  { %1097 = vrot.lane.b32.xlu0 %v3236_v36, %s2027_s16  ;;  %1381 = vrot.lane.b32.xlu1 %v3222_v38, %s2028_s27 }
 0x1ff   :  { %1101 = vrot.lane.b32.xlu0 %v3246_v6, %s2027_s16  ;;  %1099 = vrot.lane.b32.xlu1 %v3252_v57, %s2027_s16 }
 0x200   :  { %v1955_v10 = vpop.f32.mrf.mxu0 }
 0x201   :  { %v931_v26 = vadd.f32 %v1955_v10, %v3144_v24 }
 0x202   :  { %v922_v4 = vpop.f32.mrf.mxu0 }
 0x203   :  { %1198 = vrot.lane.b32.xlu0 %v3236_v36, %s2028_s27  ;;  %1103 = vrot.lane.b32.xlu1 %v3260_v15, %s2027_s16  ;;  %v923_v49 = vadd.f32 %v3144_v24, %v922_v4  ;;  %v1011_v10 = vmul.f32 %v931_v26, %v4225_v13 }
 0x204   :  { %v1956_v28 = vpop.f32.mrf.mxu0 }
 0x205   :  { %v1009_v18 = vmul.f32 %v923_v49, %v4224_v43  ;;  %v934_v4 = vadd.f32 %v1956_v28, %v3144_v24  ;;  %v1023_v27 = vmul.f32 %v923_v49, %v4226_v31  ;;  %v1025_v28 = vmul.f32 %v931_v26, %v4227_v56 }
 0x206   :  { %v925_v52 = vpop.f32.mrf.mxu0 }
 0x207   :  { %1202 = vrot.lane.b32.xlu0 %v3246_v6, %s2028_s27  ;;  %1200 = vrot.lane.b32.xlu1 %v3252_v57, %s2028_s27  ;;  %v926_v44 = vadd.f32 %v3144_v24, %v925_v52  ;;  %v1013_v48 = vadd.f32 %v1011_v10, %v1009_v18  ;;  %v3403_v52 = vsel %vm591_vm1, %v1445_v54, %v1437_v61 }
 0x208   :  { %4246 = vst [vmem:[#allocation23_spill] sm:$0xff] %v3403_v52  ;;  %v1012_v21 = vmul.f32 %v934_v4, %v4225_v13  ;;  %v1027_v18 = vadd.f32 %v1025_v28, %v1023_v27  ;;  %v1026_v13 = vmul.f32 %v934_v4, %v4227_v56  ;;  %v1037_v56 = vmul.f32 %v923_v49, %v4232_v50 }
 0x209   :  { %v1010_v60 = vmul.f32 %v926_v44, %v4224_v43  ;;  %v1024_v43 = vmul.f32 %v926_v44, %v4226_v31 }
 0x20b   :  { %1105 = vrot.lane.b32.xlu0 %v3275_v53, %s2027_s16  ;;  %1204 = vrot.lane.b32.xlu1 %v3260_v15, %s2028_s27  ;;  %v1014_v54 = vadd.f32 %v1012_v21, %v1010_v60  ;;  %v1028_v60 = vadd.f32 %v1026_v13, %v1024_v43  ;;  %v1040_v43 = vmul.f32 %v934_v4, %v4233_v30 }
 0x20f   :  { %1109 = vrot.lane.b32.xlu0 %v3288_v35, %s2027_s16  ;;  %1107 = vrot.lane.b32.xlu1 %v3294_v58, %s2027_s16 }
 0x213   :  { %1206 = vrot.lane.b32.xlu0 %v3275_v53, %s2028_s27  ;;  %1111 = vrot.lane.b32.xlu1 %v3309_v1, %s2027_s16 }
 0x217   :  { %1466 = vrot.lane.b32.xlu0 %v3316_v34, %s2027_s16  ;;  %1208 = vrot.lane.b32.xlu1 %v3294_v58, %s2028_s27 }
 0x218   :  { %v1959_v0 = vpop.f32.mrf.mxu0 }
 0x219   :  { %v947_v22 = vadd.f32 %v1959_v0, %v3144_v24 }
 0x21a   :  { %v938_v46 = vpop.f32.mrf.mxu0 }
 0x21b   :  { %1210 = vrot.lane.b32.xlu0 %v3288_v35, %s2028_s27  ;;  %1468 = vrot.lane.b32.xlu1 %v3333_v40, %s2027_s16  ;;  %v939_v9 = vadd.f32 %v3144_v24, %v938_v46  ;;  %v1033_v27 = vmul.f32 %v947_v22, %v4231_v62 }
 0x21c   :  { %v1960_v25 = vpop.f32.mrf.mxu0 }
 0x21d   :  { %v1015_v42 = vmul.f32 %v939_v9, %v4228_v17  ;;  %v1029_v46 = vmul.f32 %v939_v9, %v4229_v63  ;;  %v950_v61 = vadd.f32 %v1960_v25, %v3144_v24 }
 0x21e   :  { %v941_v37 = vpop.f32.mrf.mxu0 }
 0x21f   :  { %1470 = vrot.lane.b32.xlu0 %v3343_v8, %s2027_s16  ;;  %1212 = vrot.lane.b32.xlu1 %v3309_v1, %s2028_s27  ;;  %v942_v47 = vadd.f32 %v3144_v24, %v941_v37  ;;  %v1017_v59 = vadd.f32 %v1015_v42, %v1013_v48  ;;  %v1019_v37 = vmul.f32 %v947_v22, %v4230_v51 }
 0x220   :  { %v1031_v10 = vadd.f32 %v1029_v46, %v1027_v18  ;;  %v1020_v31 = vmul.f32 %v950_v61, %v4230_v51  ;;  %v1039_v51 = vmul.f32 %v931_v26, %v4233_v30  ;;  %v1038_v18 = vmul.f32 %v926_v44, %v4232_v50 }
 0x221   :  { %v1016_v0 = vmul.f32 %v942_v47, %v4228_v17  ;;  %v3419_v42 = vadd.f32 %v1019_v37, %v1017_v59  ;;  %v1030_v48 = vmul.f32 %v942_v47, %v4229_v63  ;;  %v1034_v63 = vmul.f32 %v950_v61, %v4231_v62 }
 0x222   :  { %v3429_v24 = vadd.f32 %v1033_v27, %v1031_v10  ;;  %v1043_v59 = vmul.f32 %v939_v9, %v4234_v3  ;;  %v1041_v21 = vadd.f32 %v1039_v51, %v1037_v56  ;;  %v1053_v62 = vmul.f32 %v931_v26, %v4236_v14 }
 0x223   :  { %1568 = vrot.lane.b32.xlu0 %v3316_v34, %s2028_s27  ;;  %1472 = vrot.lane.b32.xlu1 %v3356_v41, %s2027_s16  ;;  %4247 = vst [vmem:[#allocation27_spill] sm:$0xff] %v3419_v42  ;;  %v1018_v17 = vadd.f32 %v1016_v0, %v1014_v54  ;;  %v1032_v25 = vadd.f32 %v1030_v48, %v1028_v60 }
 0x224   :  { %v1051_v0 = vmul.f32 %v923_v49, %v4235_v12  ;;  %v1045_v37 = vadd.f32 %v1043_v59, %v1041_v21  ;;  %v1057_v54 = vmul.f32 %v939_v9, %v4237_v20  ;;  %v1044_v10 = vmul.f32 %v942_v47, %v4234_v3 }
 0x225   :  { %v3431_v28 = vadd.f32 %v1020_v31, %v1018_v17  ;;  %v3441_v46 = vadd.f32 %v1034_v63, %v1032_v25  ;;  %v1047_v49 = vmul.f32 %v947_v22, %v4238_v16  ;;  %v1042_v17 = vadd.f32 %v1040_v43, %v1038_v18 }
 0x226   :  { %v1055_v13 = vadd.f32 %v1053_v62, %v1051_v0  ;;  %v1052_v50 = vmul.f32 %v926_v44, %v4235_v12  ;;  %v1054_v9 = vmul.f32 %v934_v4, %v4236_v14  ;;  %v1058_v3 = vmul.f32 %v942_v47, %v4237_v20 }
 0x227   :  { %1572 = vrot.lane.b32.xlu0 %v3343_v8, %s2028_s27  ;;  %1570 = vrot.lane.b32.xlu1 %v3333_v40, %s2028_s27  ;;  %4248 = vst [vmem:[#allocation39_spill] sm:$0xff] %v3431_v28  ;;  %v3459_v48 = vadd.f32 %v1047_v49, %v1045_v37  ;;  %v1046_v30 = vadd.f32 %v1044_v10, %v1042_v17  ;;  %v1078_v21 = vrot.slane %v3441_v46, 7  ;;  %v1070_v0 = vrot.slane %v3429_v24, 7 }
 0x228   :  { %v1059_v26 = vadd.f32 %v1057_v54, %v1055_v13  ;;  %v1061_v27 = vmul.f32 %v947_v22, %v4239_v32  ;;  %v1056_v60 = vadd.f32 %v1054_v9, %v1052_v50  ;;  %v1048_v31 = vmul.f32 %v950_v61, %v4238_v16 }
 0x229   :  { %v1062_v20 = vmul.f32 %v950_v61, %v4239_v32  ;;  %v1077_v32 = vrot.slane %v3431_v28, 7  ;;  %v1069_v61 = vrot.slane %v3419_v42, 7  ;;  %v3520_v37 = vsel %vm221_vm0, %v1078_v21, %v1070_v0 }
 0x22a   :  { %v3471_v44 = vadd.f32 %v1061_v27, %v1059_v26  ;;  %v1060_v25 = vadd.f32 %v1058_v3, %v1056_v60  ;;  %v3473_v14 = vadd.f32 %v1048_v31, %v1046_v30  ;;  %4252 = vst [vmem:[#allocation41_spill] sm:$0xff] %v3520_v37  ;;  %v3538_v13 = vsel %vm221_vm0, %v1070_v0, %v1078_v21  ;;  %v3588_v21 = vld [vmem:[%s4074_s5 + $0x10] sm:$0xff] }
 0x22b   :  { %1474 = vrot.lane.b32.xlu0 %v3368_v19, %s2027_s16  ;;  %1574 = vrot.lane.b32.xlu1 %v3356_v41, %s2028_s27  ;;  %v3506_v59 = vsel %vm221_vm0, %v1077_v32, %v1069_v61  ;;  %v3526_v54 = vsel %vm221_vm0, %v1069_v61, %v1077_v32  ;;  %4254 = vst [vmem:[#allocation33_spill] sm:$0xff] %v3538_v13  ;;  %v1071_v26 = vrot.slane %v3459_v48, 7  ;;  %v3575_v32 = vld [vmem:[%s4074_s5] sm:$0xff] }
 0x22c   :  { %4249 = vst [vmem:[#allocation25_spill] sm:$0xff] %v3473_v14  ;;  %v3484_v47 = vadd.f32 %v1062_v20, %v1060_v25  ;;  %4251 = vst [vmem:[#allocation26_spill] sm:$0xff] %v3506_v59  ;;  %v1079_v50 = vrot.slane %v3473_v14, 7  ;;  %v1072_v60 = vrot.slane %v3471_v44, 7 }
 0x22d   :  { %4253 = vst [vmem:[#allocation42_spill] sm:$0xff] %v3526_v54 }
 0x22e   :  { %4250 = vst [vmem:[#allocation40_spill] sm:$0xff] %v3484_v47  ;;  %v3558_v3 = vsel %vm221_vm0, %v1079_v50, %v1071_v26  ;;  %v1080_v27 = vrot.slane %v3484_v47, 7  ;;  %v3581_v61 = vsel %vm221_vm0, %v1071_v26, %v1079_v50  ;;  %v3601_v26 = vld [vmem:[%s4074_s5 + $0x20] sm:$0xff] }
 0x22f   :  { %1478 = vrot.lane.b32.xlu0 %v3381_v55, %s2027_s16  ;;  %1476 = vrot.lane.b32.xlu1 %v3388_v39, %s2027_s16  ;;  %4258 = vst [vmem:[#allocation31_spill] sm:$0xff] %v3558_v3  ;;  %4260 = vst [vmem:[#allocation34_spill] sm:$0xff] %v3581_v61 }
 0x230   :  { %v3570_v20 = vsel %vm221_vm0, %v1080_v27, %v1072_v60  ;;  %v3596_v50 = vsel %vm221_vm0, %v1072_v60, %v1080_v27  ;;  %v3616_v27 = vld [vmem:[%s4074_s5 + $0x30] sm:$0xff] }
 0x233   :  { %1576 = vrot.lane.b32.xlu0 %v3368_v19, %s2028_s27  ;;  %1480 = vrot.lane.b32.xlu1 %v3403_v52, %s2027_s16  ;;  %v3632_v19 = vld [vmem:[%s4074_s5 + $0x40] sm:$0xff] }
 0x237   :  { %1580 = vrot.lane.b32.xlu0 %v3381_v55, %s2028_s27  ;;  %1578 = vrot.lane.b32.xlu1 %v3388_v39, %s2028_s27 }
 0x23b   :  { %1281 = vrot.lane.b32.xlu0 %v3419_v42, %s2027_s16  ;;  %1582 = vrot.lane.b32.xlu1 %v3403_v52, %s2028_s27 }
 0x23f   :  { %1285 = vrot.lane.b32.xlu0 %v3429_v24, %s2027_s16  ;;  %1283 = vrot.lane.b32.xlu1 %v3431_v28, %s2027_s16 }
 0x243   :  { %1383 = vrot.lane.b32.xlu0 %v3419_v42, %s2028_s27  ;;  %1287 = vrot.lane.b32.xlu1 %v3441_v46, %s2027_s16 }
 0x247   :  { %1387 = vrot.lane.b32.xlu0 %v3429_v24, %s2028_s27  ;;  %1385 = vrot.lane.b32.xlu1 %v3431_v28, %s2028_s27 }
 0x24b   :  { %1289 = vrot.lane.b32.xlu0 %v3459_v48, %s2027_s16  ;;  %1389 = vrot.lane.b32.xlu1 %v3441_v46, %s2028_s27 }
 0x24d   :  { %v3469_v12 = vpop.permute.xlu0 %1265 }
 0x24f   :  { %1293 = vrot.lane.b32.xlu0 %v3471_v44, %s2027_s16  ;;  %1291 = vrot.lane.b32.xlu1 %v3473_v14, %s2027_s16 }
 0x251   :  { %v3480_v4 = vpop.permute.xlu0 %1269  ;;  %v3482_v16 = vpop.permute.xlu1 %1267 }
 0x253   :  { %1391 = vrot.lane.b32.xlu0 %v3459_v48, %s2028_s27  ;;  %1295 = vrot.lane.b32.xlu1 %v3484_v47, %s2027_s16 }
 0x255   :  { %v3490_v22 = vpop.permute.xlu0 %1367  ;;  %v3492_v56 = vpop.permute.xlu1 %1271 }
 0x257   :  { %1395 = vrot.lane.b32.xlu0 %v3471_v44, %s2028_s27  ;;  %1393 = vrot.lane.b32.xlu1 %v3473_v14, %s2028_s27 }
 0x259   :  { %v3500_v63 = vpop.permute.xlu0 %1371  ;;  %v3502_v51 = vpop.permute.xlu1 %1369 }
 0x25b   :  { %1113 = vrot.lane.b32.xlu0 %v3506_v59, %s2027_s16  ;;  %1397 = vrot.lane.b32.xlu1 %v3484_v47, %s2028_s27 }
 0x25d   :  { %v3514_v18 = vpop.permute.xlu0 %1273  ;;  %v3516_v62 = vpop.permute.xlu1 %1373 }
 0x25f   :  { %1117 = vrot.lane.b32.xlu0 %v3520_v37, %s2027_s16  ;;  %1115 = vrot.lane.b32.xlu1 %v3526_v54, %s2027_s16 }
 0x261   :  { %v3530_v43 = vpop.permute.xlu0 %1277  ;;  %v3532_v10 = vpop.permute.xlu1 %1275 }
 0x263   :  { %1214 = vrot.lane.b32.xlu0 %v3506_v59, %s2028_s27  ;;  %1119 = vrot.lane.b32.xlu1 %v3538_v13, %s2027_s16  ;;  %v1166_v59 = vmul.f32 %v3588_v21, %v3236_v36  ;;  %v3622_v36 = vld [vmem:[%s4074_s5 + $0x18] sm:$0xff] }
 0x265   :  { %v3542_v49 = vpop.permute.xlu0 %1375  ;;  %v3544_v17 = vpop.permute.xlu1 %1279 }
 0x266   :  { %4255 = vst [vmem:[#allocation37_spill] sm:$0xff] %v3542_v49  ;;  %v1447_v49 = vrot.slane %v3441_v46, 1 }
 0x267   :  { %1218 = vrot.lane.b32.xlu0 %v3520_v37, %s2028_s27  ;;  %1216 = vrot.lane.b32.xlu1 %v3526_v54, %s2028_s27  ;;  %v1446_v37 = vrot.slane %v3431_v28, 1 }
 0x269   :  { %v3552_v9 = vpop.permute.xlu0 %1379  ;;  %v3554_v30 = vpop.permute.xlu1 %1377 }
 0x26a   :  { %4256 = vst [vmem:[#allocation36_spill] sm:$0xff] %v3552_v9  ;;  %4257 = vst [vmem:[#allocation38_spill] sm:$0xff] %v3554_v30  ;;  %v1335_v30 = vmul.f32 %v3632_v19, %v3164_v11 }
 0x26b   :  { %1121 = vrot.lane.b32.xlu0 %v3558_v3, %s2027_s16  ;;  %1220 = vrot.lane.b32.xlu1 %v3538_v13, %s2028_s27 }
 0x26d   :  { %v1098_v31 = vpop.permute.xlu0 %1097  ;;  %v3566_v25 = vpop.permute.xlu1 %1381 }
 0x26e   :  { %4259 = vst [vmem:[#allocation32_spill] sm:$0xff] %v3566_v25  ;;  %v1131_v13 = vmul.f32 %v3575_v32, %v1098_v31  ;;  %v3608_v31 = vld [vmem:[%s4074_s5 + $0x8] sm:$0xff] }
 0x26f   :  { %1125 = vrot.lane.b32.xlu0 %v3570_v20, %s2027_s16  ;;  %1123 = vrot.lane.b32.xlu1 %v3581_v61, %s2027_s16  ;;  %v3646_v25 = vld [vmem:[%s4074_s5 + $0x28] sm:$0xff] }
 0x270   :  { %v1182_v28 = vadd.f32 %v1166_v59, %v1131_v13  ;;  %v1300_v13 = vmul.f32 %v3616_v27, %v3469_v12 }
 0x271   :  { %v1102_v0 = vpop.permute.xlu0 %1101  ;;  %v1100_v54 = vpop.permute.xlu1 %1099 }
 0x272   :  { %v1133_v52 = vmul.f32 %v3575_v32, %v1102_v0  ;;  %v1132_v59 = vmul.f32 %v3608_v31, %v1100_v54  ;;  %v1168_v0 = vmul.f32 %v3588_v21, %v3246_v6  ;;  %v1167_v54 = vmul.f32 %v3622_v36, %v3252_v57  ;;  %v3655_v6 = vld [vmem:[%s4074_s5 + $0x38] sm:$0xff] }
 0x273   :  { %1222 = vrot.lane.b32.xlu0 %v3558_v3, %s2028_s27  ;;  %1127 = vrot.lane.b32.xlu1 %v3596_v50, %s2027_s16  ;;  %v1438_v3 = vrot.slane %v3419_v42, 1 }
 0x274   :  { %v1183_v41 = vadd.f32 %v1167_v54, %v1132_v59 }
 0x275   :  { %v1199_v60 = vpop.permute.xlu0 %1198  ;;  %v1104_v39 = vpop.permute.xlu1 %1103  ;;  %v3627_v42 = vsel %vm591_vm1, %v1438_v3, %v1446_v37  ;;  %v3665_v11 = vsel %vm591_vm1, %v1446_v37, %v1438_v3  ;;  %v1169_v37 = vmul.f32 %v3622_v36, %v3260_v15 }
 0x276   :  { %v1233_v55 = vmul.f32 %v3601_v26, %v1199_v60  ;;  %v1134_v8 = vmul.f32 %v3608_v31, %v1104_v39  ;;  %v3675_v39 = vld [vmem:[%s4074_s5 + $0x48] sm:$0xff] }
 0x277   :  { %1482 = vrot.lane.b32.xlu0 %v3627_v42, %s2027_s16  ;;  %1224 = vrot.lane.b32.xlu1 %v3581_v61, %s2028_s27  ;;  %v1336_v15 = vmul.f32 %v3675_v39, %v3175_v33 }
 0x278   :  { %v1249_v60 = vadd.f32 %v1233_v55, %v1182_v28  ;;  %v1184_v55 = vadd.f32 %v1168_v0, %v1133_v52  ;;  %v1302_v52 = vmul.f32 %v3616_v27, %v3480_v4 }
 0x279   :  { %v1203_v9 = vpop.permute.xlu0 %1202  ;;  %v1201_v61 = vpop.permute.xlu1 %1200 }
 0x27a   :  { %v1316_v28 = vadd.f32 %v1300_v13, %v1249_v60  ;;  %v1235_v12 = vmul.f32 %v3601_v26, %v1203_v9  ;;  %v1234_v57 = vmul.f32 %v3646_v25, %v1201_v61  ;;  %v1439_v9 = vrot.slane %v3429_v24, 1 }
 0x27b   :  { %1226 = vrot.lane.b32.xlu0 %v3570_v20, %s2028_s27  ;;  %1484 = vrot.lane.b32.xlu1 %v3665_v11, %s2027_s16  ;;  %v1301_v61 = vmul.f32 %v3655_v6, %v3482_v16  ;;  %v1303_v16 = vmul.f32 %v3655_v6, %v3492_v56  ;;  %v1170_v56 = vmul.f32 %v3588_v21, %v3275_v53  ;;  %v3728_v53 = vld [vmem:[%s4074_s5 + $0x60] sm:$0xff] }
 0x27c   :  { %v1251_v13 = vadd.f32 %v1235_v12, %v1184_v55  ;;  %v1351_v59 = vadd.f32 %v1335_v30, %v1316_v28  ;;  %v1250_v3 = vadd.f32 %v1234_v57, %v1183_v41  ;;  %v3683_v54 = vsel %vm591_vm1, %v1439_v9, %v1447_v49 }
 0x27d   :  { %v1106_v4 = vpop.permute.xlu0 %1105  ;;  %v1205_v60 = vpop.permute.xlu1 %1204  ;;  %v1337_v30 = vmul.f32 %v3632_v19, %v3173_v23  ;;  %v1185_v55 = vadd.f32 %v1169_v37, %v1134_v8  ;;  %v3705_v33 = vsel %vm591_vm1, %v1447_v49, %v1439_v9  ;;  %v1338_v37 = vmul.f32 %v3675_v39, %v3185_v45 }
 0x27e   :  { %v1318_v0 = vadd.f32 %v1302_v52, %v1251_v13  ;;  %v1317_v28 = vadd.f32 %v1301_v61, %v1250_v3  ;;  %v1236_v12 = vmul.f32 %v3646_v25, %v1205_v60  ;;  %v1135_v52 = vmul.f32 %v3575_v32, %v1106_v4  ;;  %v3716_v3 = vld [vmem:[%s4074_s5 + $0x50] sm:$0xff] }
 0x27f   :  { %1486 = vrot.lane.b32.xlu0 %v3683_v54, %s2027_s16  ;;  %1228 = vrot.lane.b32.xlu1 %v3596_v50, %s2028_s27 }
 0x280   :  { %v3694_v41 = vadd.f32 %v1337_v30, %v1318_v0  ;;  %v1252_v57 = vadd.f32 %v1236_v12, %v1185_v55  ;;  %v3698_v8 = vadd.f32 %v1336_v15, %v1317_v28  ;;  %v1448_v0 = vrot.slane %v3473_v14, 1  ;;  %v3734_v28 = vld [vmem:[%s4074_s5 + $0x70] sm:$0xff] }
 0x281   :  { %v1110_v23 = vpop.permute.xlu0 %1109  ;;  %v1108_v13 = vpop.permute.xlu1 %1107  ;;  %v1186_v49 = vadd.f32 %v1170_v56, %v1135_v52  ;;  %v1440_v55 = vrot.slane %v3459_v48, 1  ;;  %4261 = vst [vmem:[#allocation43_spill] sm:$0xff] %v3734_v28  ;;  %v1402_v12 = vmul.f32 %v3716_v3, %v3490_v22  ;;  %v1304_v15 = vmul.f32 %v3616_v27, %v3514_v18 }
 0x282   :  { %v1319_v61 = vadd.f32 %v1303_v16, %v1252_v57  ;;  %v1136_v30 = vmul.f32 %v3608_v31, %v1108_v13  ;;  %v1171_v57 = vmul.f32 %v3622_v36, %v3294_v58  ;;  %v1339_v22 = vmul.f32 %v3632_v19, %v3203_v2 }
 0x283   :  { %1584 = vrot.lane.b32.xlu0 %v3627_v42, %s2028_s27  ;;  %1488 = vrot.lane.b32.xlu1 %v3705_v33, %s2027_s16  ;;  %v3746_v13 = vsel %vm591_vm1, %v1440_v55, %v1448_v0  ;;  %v1418_v56 = vadd.f32 %v1402_v12, %v1351_v59  ;;  %v1536_v58 = vmul.f32 %v3734_v28, %v3316_v34  ;;  %v1441_v59 = vrot.slane %v3471_v44, 1 }
 0x284   :  { %v3719_v60 = vadd.f32 %v1338_v37, %v1319_v61  ;;  %4262 = vst [vmem:[#allocation35_spill] sm:$0xff] %v3746_v13  ;;  %v1449_v61 = vrot.slane %v3484_v47, 1  ;;  %v1137_v37 = vmul.f32 %v3575_v32, %v1110_v23  ;;  %v1172_v47 = vmul.f32 %v3588_v21, %v3288_v35 }
 0x285   :  { %v1207_v4 = vpop.permute.xlu0 %1206  ;;  %v1112_v45 = vpop.permute.xlu1 %1111  ;;  %v1305_v34 = vmul.f32 %v3655_v6, %v3532_v10  ;;  %v3777_v10 = vsel %vm591_vm1, %v1448_v0, %v1440_v55 }
 0x286   :  { %v1237_v9 = vmul.f32 %v3601_v26, %v1207_v4  ;;  %v3770_v35 = vsel %vm591_vm1, %v1441_v59, %v1449_v61  ;;  %4264 = vst [vmem:[#allocation45_spill] sm:$0xff] %v3777_v10 }
 0x287   :  { %1588 = vrot.lane.b32.xlu0 %v3683_v54, %s2028_s27  ;;  %1586 = vrot.lane.b32.xlu1 %v3665_v11, %s2028_s27  ;;  %4263 = vst [vmem:[#allocation44_spill] sm:$0xff] %v3770_v35 }
 0x288   :  { %v1253_v16 = vadd.f32 %v1237_v9, %v1186_v49  ;;  %v1187_v9 = vadd.f32 %v1171_v57, %v1136_v30 }
 0x289   :  { %v1467_v52 = vpop.permute.xlu0 %1466  ;;  %v1209_v49 = vpop.permute.xlu1 %1208 }
 0x28a   :  { %v1320_v18 = vadd.f32 %v1304_v15, %v1253_v16  ;;  %v1501_v4 = vmul.f32 %v3728_v53, %v1467_v52  ;;  %v1238_v14 = vmul.f32 %v3646_v25, %v1209_v49  ;;  %v1188_v15 = vadd.f32 %v1172_v47, %v1137_v37  ;;  %v3784_v47 = vld [vmem:[%s4074_s5 + $0x58] sm:$0xff]  ;;  %v3791_v37 = vld [vmem:[%s4074_s5 + $0x68] sm:$0xff] }
 0x28b   :  { %1490 = vrot.lane.b32.xlu0 %v3746_v13, %s2027_s16  ;;  %1590 = vrot.lane.b32.xlu1 %v3705_v33, %s2028_s27 }
 0x28c   :  { %v1517_v2 = vadd.f32 %v1501_v4, %v1418_v56  ;;  %v3763_v23 = vadd.f32 %v1339_v22, %v1320_v18  ;;  %v1254_v30 = vadd.f32 %v1238_v14, %v1187_v9  ;;  %v1138_v56 = vmul.f32 %v3608_v31, %v1112_v45 }
 0x28d   :  { %v1211_v12 = vpop.permute.xlu0 %1210  ;;  %v1469_v57 = vpop.permute.xlu1 %1468  ;;  %v1340_v14 = vmul.f32 %v3675_v39, %v3215_v5  ;;  %v1306_v22 = vmul.f32 %v3616_v27, %v3530_v43  ;;  %v1173_v5 = vmul.f32 %v3622_v36, %v3309_v1  ;;  %v3801_v43 = vsel %vm591_vm1, %v1449_v61, %v1441_v59 }
 0x28e   :  { %v1239_v16 = vmul.f32 %v3601_v26, %v1211_v12  ;;  %v1552_v52 = vadd.f32 %v1536_v58, %v1517_v2  ;;  %v1321_v4 = vadd.f32 %v1305_v34, %v1254_v30  ;;  %4265 = vst [vmem:[#allocation46_spill] sm:$0xff] %v3801_v43  ;;  %v1341_v58 = vmul.f32 %v3632_v19, %v3213_v29  ;;  %v3818_v29 = vld [vmem:[%s4074_s5 + $0x78] sm:$0xff] }
 0x28f   :  { %1494 = vrot.lane.b32.xlu0 %v3770_v35, %s2027_s16  ;;  %1492 = vrot.lane.b32.xlu1 %v3777_v10, %s2027_s16  ;;  %v1403_v9 = vmul.f32 %v3784_v47, %v3502_v51  ;;  %v1189_v2 = vadd.f32 %v1173_v5, %v1138_v56  ;;  %v1502_v34 = vmul.f32 %v3791_v37, %v1469_v57 }
 0x290   :  { %v1255_v45 = vadd.f32 %v1239_v16, %v1188_v15  ;;  %v3797_v55 = vadd.f32 %v1340_v14, %v1321_v4  ;;  %v1307_v51 = vmul.f32 %v3655_v6, %v3544_v17  ;;  %v1404_v12 = vmul.f32 %v3716_v3, %v3500_v63  ;;  %v3830_v16 = vld [vmem:[%s4074_s5 + $0x80] sm:$0xff] }
 0x291   :  { %v1471_v0 = vpop.permute.xlu0 %1470  ;;  %v1213_v49 = vpop.permute.xlu1 %1212  ;;  %v1419_v61 = vadd.f32 %v1403_v9, %v3698_v8  ;;  %v1405_v15 = vmul.f32 %v3784_v47, %v3516_v62  ;;  %v1342_v56 = vmul.f32 %v3675_v39, %v3222_v38  ;;  %v1537_v63 = vmul.f32 %v3818_v29, %v3333_v40  ;;  %v3845_v62 = vld [vmem:[%s4074_s5 + $0x88] sm:$0xff] }
 0x292   :  { %v1322_v18 = vadd.f32 %v1306_v22, %v1255_v45  ;;  %v1240_v1 = vmul.f32 %v3646_v25, %v1213_v49  ;;  %v1503_v8 = vmul.f32 %v3728_v53, %v1471_v0  ;;  %v1420_v38 = vadd.f32 %v1404_v12, %v3694_v41 }
 0x293   :  { %1592 = vrot.lane.b32.xlu0 %v3746_v13, %s2028_s27  ;;  %1496 = vrot.lane.b32.xlu1 %v3801_v43, %s2027_s16  ;;  %v1518_v17 = vadd.f32 %v1502_v34, %v1419_v61  ;;  %v1421_v45 = vadd.f32 %v1405_v15, %v3719_v60 }
 0x294   :  { %v3813_v7 = vadd.f32 %v1341_v58, %v1322_v18  ;;  %v1256_v59 = vadd.f32 %v1240_v1, %v1189_v2  ;;  %v1519_v49 = vadd.f32 %v1503_v8, %v1420_v38  ;;  %v4266_v2 = vld [vmem:[#allocation30_spill] sm:$0xff]  ;;  %v4267_v1 = vld [vmem:[#allocation28_spill] sm:$0xff] }
 0x295   :  { %v1569_v30 = vpop.permute.xlu0 %1568  ;;  %v1473_v57 = vpop.permute.xlu1 %1472  ;;  %v1553_v9 = vadd.f32 %v1537_v63, %v1518_v17  ;;  %v1538_v34 = vmul.f32 %v3734_v28, %v4266_v2  ;;  %v1539_v41 = vmul.f32 %v3818_v29, %v4267_v1 }
 0x296   :  { %v1323_v4 = vadd.f32 %v1307_v51, %v1256_v59  ;;  %v1504_v14 = vmul.f32 %v3791_v37, %v1473_v57  ;;  %v1603_v22 = vmul.f32 %v3830_v16, %v1569_v30 }
 0x297   :  { %1596 = vrot.lane.b32.xlu0 %v3770_v35, %s2028_s27  ;;  %1594 = vrot.lane.b32.xlu1 %v3777_v10, %s2028_s27  ;;  %v1554_v12 = vadd.f32 %v1538_v34, %v1519_v49 }
 0x298   :  { %v1358_v0 = vadd.f32 %v1342_v56, %v1323_v4  ;;  %v1520_v58 = vadd.f32 %v1504_v14, %v1421_v45  ;;  %v1619_v61 = vadd.f32 %v1603_v22, %v1552_v52  ;;  %v4268_v14 = vld [vmem:[#allocation37_spill] sm:$0xff] }
 0x299   :  { %v1573_v5 = vpop.permute.xlu0 %1572  ;;  %v1571_v18 = vpop.permute.xlu1 %1570  ;;  %v1406_v63 = vmul.f32 %v3716_v3, %v4268_v14 }
 0x29a   :  { %v1604_v40 = vmul.f32 %v3845_v62, %v1571_v18  ;;  %v1605_v51 = vmul.f32 %v3830_v16, %v1573_v5  ;;  %v1555_v15 = vadd.f32 %v1539_v41, %v1520_v58  ;;  %v4269_v5 = vld [vmem:[#allocation38_spill] sm:$0xff]  ;;  %v4271_v41 = vld [vmem:[#allocation32_spill] sm:$0xff] }
 0x29b   :  { %1598 = vrot.lane.b32.xlu1 %v3801_v43, %s2028_s27  ;;  %v1407_v52 = vmul.f32 %v3784_v47, %v4269_v5  ;;  %v1422_v49 = vadd.f32 %v1406_v63, %v3763_v23  ;;  %v4274_v5 = vld [vmem:[#allocation22_spill] sm:$0xff] }
 0x29c   :  { %v1620_v59 = vadd.f32 %v1604_v40, %v1553_v9  ;;  %v1621_v17 = vadd.f32 %v1605_v51, %v1554_v12  ;;  %v4270_v9 = vld [vmem:[#allocation36_spill] sm:$0xff]  ;;  %v1409_v51 = vmul.f32 %v3784_v47, %v4271_v41  ;;  %v4273_v12 = vld [vmem:[#allocation29_spill] sm:$0xff] }
 0x29d   :  { %v1475_v60 = vpop.permute.xlu0 %1474  ;;  %v1575_v30 = vpop.permute.xlu1 %1574  ;;  %v1423_v58 = vadd.f32 %v1407_v52, %v3797_v55  ;;  %v1408_v2 = vmul.f32 %v3716_v3, %v4270_v9  ;;  %v1541_v55 = vmul.f32 %v3818_v29, %v4273_v12  ;;  %v1542_v52 = vmul.f32 %v3734_v28, %v4274_v5 }
 0x29e   :  { %v1606_v57 = vmul.f32 %v3845_v62, %v1575_v30  ;;  %v1635_v56 = vpack.c.bf16 %v1620_v59, %v1619_v61  ;;  %v1505_v38 = vmul.f32 %v3728_v53, %v1475_v60  ;;  %v4272_v30 = vld [vmem:[#allocation24_spill] sm:$0xff] }
 0x29f   :  { %v1540_v23 = vmul.f32 %v3734_v28, %v4272_v30 }
 0x2a0   :  { %v1622_v8 = vadd.f32 %v1606_v57, %v1555_v15  ;;  %1977 = vmatprep.mubr.bf16.mxu1 %v1635_v56  ;;  %v1521_v34 = vadd.f32 %v1505_v38, %v1422_v49  ;;  %v1424_v15 = vadd.f32 %v1408_v2, %v3813_v7  ;;  %v1425_v56 = vadd.f32 %v1409_v51, %v1358_v0 }
 0x2a1   :  { %v1479_v4 = vpop.permute.xlu0 %1478  ;;  %v1477_v45 = vpop.permute.xlu1 %1476 }
 0x2a2   :  { %v1506_v22 = vmul.f32 %v3791_v37, %v1477_v45  ;;  %v1636_v18 = vpack.c.bf16 %v1622_v8, %v1621_v17  ;;  %v1507_v60 = vmul.f32 %v3728_v53, %v1479_v4  ;;  %v1556_v8 = vadd.f32 %v1540_v23, %v1521_v34 }
 0x2a4   :  { %1978 = vmatmul.mubr.bf16.vlgmr.msra.gmra.mxu1 %v1636_v18  ;;  %v1522_v61 = vadd.f32 %v1506_v22, %v1423_v58  ;;  %v1523_v63 = vadd.f32 %v1507_v60, %v1424_v15  ;;  %v4275_v22 = vld [vmem:[#allocation23_spill] sm:$0xff] }
 0x2a5   :  { %v1577_v40 = vpop.permute.xlu0 %1576  ;;  %v1481_v1 = vpop.permute.xlu1 %1480  ;;  %v1543_v18 = vmul.f32 %v3818_v29, %v4275_v22 }
 0x2a6   :  { %v1508_v59 = vmul.f32 %v3791_v37, %v1481_v1  ;;  %v1607_v57 = vmul.f32 %v3830_v16, %v1577_v40  ;;  %v1557_v4 = vadd.f32 %v1541_v55, %v1522_v61  ;;  %v1558_v9 = vadd.f32 %v1542_v52, %v1523_v63 }
 0x2a8   :  { %v1524_v38 = vadd.f32 %v1508_v59, %v1425_v56  ;;  %v1623_v49 = vadd.f32 %v1607_v57, %v1556_v8 }
 0x2a9   :  { %v1581_v17 = vpop.permute.xlu0 %1580  ;;  %v1579_v14 = vpop.permute.xlu1 %1578 }
 0x2aa   :  { %v1608_v45 = vmul.f32 %v3845_v62, %v1579_v14  ;;  %v1609_v7 = vmul.f32 %v3830_v16, %v1581_v17  ;;  %v1559_v2 = vadd.f32 %v1543_v18, %v1524_v38  ;;  %v4278_v18 = vld [vmem:[#allocation26_spill] sm:$0xff] }
 0x2ac   :  { %v1624_v58 = vadd.f32 %v1608_v45, %v1557_v4  ;;  %v1625_v41 = vadd.f32 %v1609_v7, %v1558_v9 }
 0x2ad   :  { %v1282_v40 = vpop.permute.xlu0 %1281  ;;  %v1583_v0 = vpop.permute.xlu1 %1582 }
 0x2ae   :  { %v1610_v34 = vmul.f32 %v3845_v62, %v1583_v0  ;;  %v1637_v1 = vpack.c.bf16 %v1624_v58, %v1623_v49  ;;  %v1174_v49 = vmul.f32 %v3588_v21, %v4278_v18 }
 0x2b0   :  { %v1626_v51 = vadd.f32 %v1610_v34, %v1559_v2  ;;  %1981 = vmatprep.mubr.bf16.mxu1 %v1637_v1  ;;  %v1308_v1 = vmul.f32 %v3616_v27, %v1282_v40 }
 0x2b1   :  { %v1286_v60 = vpop.permute.xlu0 %1285  ;;  %v1284_v61 = vpop.permute.xlu1 %1283 }
 0x2b2   :  { %v1638_v59 = vpack.c.bf16 %v1626_v51, %v1625_v41  ;;  %v4279_v41 = vld [vmem:[#allocation41_spill] sm:$0xff] }
 0x2b3   :  { %v1176_v51 = vmul.f32 %v3588_v21, %v4279_v41  ;;  %v1310_v41 = vmul.f32 %v3616_v27, %v1286_v60 }
 0x2b4   :  { %1982 = vmatmul.mubr.bf16.gmra.mxu1 %v1638_v59 }
 0x2b5   :  { %v3886_v30 = vpop.permute.xlu0 %1383  ;;  %v1288_v23 = vpop.permute.xlu1 %1287 }
 0x2b9   :  { %v3888_v12 = vpop.permute.xlu0 %1387  ;;  %v3890_v55 = vpop.permute.xlu1 %1385 }
 0x2bd   :  { %v3892_v15 = vpop.permute.xlu0 %1289  ;;  %v3894_v57 = vpop.permute.xlu1 %1389 }
 0x2c1   :  { %v3896_v56 = vpop.permute.xlu0 %1293  ;;  %v3898_v17 = vpop.permute.xlu1 %1291 }
 0x2c5   :  { %v3900_v8 = vpop.permute.xlu0 %1391  ;;  %v3902_v14 = vpop.permute.xlu1 %1295 }
 0x2c9   :  { %v3904_v63 = vpop.permute.xlu0 %1395  ;;  %v3906_v38 = vpop.permute.xlu1 %1393 }
 0x2ca   :  { %4276 = vst [vmem:[#allocation6_spill] sm:$0xff] %v3904_v63 }
 0x2cd   :  { %v1114_v4 = vpop.permute.xlu0 %1113  ;;  %v3908_v45 = vpop.permute.xlu1 %1397 }
 0x2ce   :  { %4277 = vst [vmem:[#allocation7_spill] sm:$0xff] %v3908_v45  ;;  %v1139_v52 = vmul.f32 %v3575_v32, %v1114_v4  ;;  %v4280_v4 = vld [vmem:[#allocation42_spill] sm:$0xff]  ;;  %v4282_v45 = vld [vmem:[#allocation33_spill] sm:$0xff] }
 0x2cf   :  { %v1175_v43 = vmul.f32 %v3622_v36, %v4280_v4  ;;  %v1309_v4 = vmul.f32 %v3655_v6, %v1284_v61  ;;  %v1311_v61 = vmul.f32 %v3655_v6, %v1288_v23  ;;  %v1545_v23 = vmul.f32 %v3818_v29, %v3665_v11 }
 0x2d0   :  { %v1190_v58 = vadd.f32 %v1174_v49, %v1139_v52  ;;  %v4281_v49 = vld [vmem:[#allocation27_spill] sm:$0xff] }
 0x2d1   :  { %v1118_v5 = vpop.permute.xlu0 %1117  ;;  %v1116_v22 = vpop.permute.xlu1 %1115 }
 0x2d2   :  { %v1141_v0 = vmul.f32 %v3575_v32, %v1118_v5  ;;  %v1140_v34 = vmul.f32 %v3608_v31, %v1116_v22 }
 0x2d4   :  { %v1192_v18 = vadd.f32 %v1176_v51, %v1141_v0  ;;  %v1191_v13 = vadd.f32 %v1175_v43, %v1140_v34  ;;  %v1177_v0 = vmul.f32 %v3622_v36, %v4282_v45  ;;  %v1345_v43 = vmul.f32 %v3632_v19, %v3429_v24 }
 0x2d5   :  { %v1215_v7 = vpop.permute.xlu0 %1214  ;;  %v1120_v2 = vpop.permute.xlu1 %1119 }
 0x2d6   :  { %v1241_v9 = vmul.f32 %v3601_v26, %v1215_v7  ;;  %v1343_v7 = vmul.f32 %v3632_v19, %v4281_v49  ;;  %v1142_v22 = vmul.f32 %v3608_v31, %v1120_v2  ;;  %v4283_v49 = vld [vmem:[#allocation39_spill] sm:$0xff] }
 0x2d7   :  { %v1344_v60 = vmul.f32 %v3675_v39, %v4283_v49 }
 0x2d8   :  { %v1257_v59 = vadd.f32 %v1241_v9, %v1190_v58  ;;  %v1193_v34 = vadd.f32 %v1177_v0, %v1142_v22 }
 0x2d9   :  { %v1219_v35 = vpop.permute.xlu0 %1218  ;;  %v1217_v5 = vpop.permute.xlu1 %1216 }
 0x2da   :  { %v1324_v10 = vadd.f32 %v1308_v1, %v1257_v59  ;;  %v1243_v52 = vmul.f32 %v3601_v26, %v1219_v35  ;;  %v1242_v40 = vmul.f32 %v3646_v25, %v1217_v5 }
 0x2dc   :  { %v1259_v58 = vadd.f32 %v1243_v52, %v1192_v18  ;;  %v1359_v9 = vadd.f32 %v1343_v7, %v1324_v10  ;;  %v1258_v1 = vadd.f32 %v1242_v40, %v1191_v13  ;;  %v1346_v40 = vmul.f32 %v3675_v39, %v3441_v46 }
 0x2dd   :  { %v1122_v35 = vpop.permute.xlu0 %1121  ;;  %v1221_v59 = vpop.permute.xlu1 %1220  ;;  %v1410_v46 = vmul.f32 %v3716_v3, %v3886_v30 }
 0x2de   :  { %v1326_v51 = vadd.f32 %v1310_v41, %v1259_v58  ;;  %v1325_v2 = vadd.f32 %v1309_v4, %v1258_v1  ;;  %v1244_v5 = vmul.f32 %v3646_v25, %v1221_v59  ;;  %v1143_v59 = vmul.f32 %v3575_v32, %v1122_v35 }
 0x2df   :  { %v1180_v35 = vmul.f32 %v3588_v21, %v3570_v20 }
 0x2e0   :  { %v1361_v10 = vadd.f32 %v1345_v43, %v1326_v51  ;;  %v1260_v18 = vadd.f32 %v1244_v5, %v1193_v34  ;;  %v1360_v45 = vadd.f32 %v1344_v60, %v1325_v2  ;;  %v1544_v51 = vmul.f32 %v3734_v28, %v3627_v42  ;;  %v4284_v60 = vld [vmem:[#allocation31_spill] sm:$0xff] }
 0x2e1   :  { %v1126_v52 = vpop.permute.xlu0 %1125  ;;  %v1124_v13 = vpop.permute.xlu1 %1123  ;;  %v1546_v34 = vmul.f32 %v3734_v28, %v3683_v54  ;;  %v1411_v42 = vmul.f32 %v3784_v47, %v3890_v55  ;;  %v1178_v11 = vmul.f32 %v3588_v21, %v4284_v60  ;;  %v4285_v54 = vld [vmem:[#allocation34_spill] sm:$0xff] }
 0x2e2   :  { %v1327_v7 = vadd.f32 %v1311_v61, %v1260_v18  ;;  %v1144_v2 = vmul.f32 %v3608_v31, %v1124_v13  ;;  %v1179_v18 = vmul.f32 %v3622_v36, %v4285_v54  ;;  %v1426_v13 = vadd.f32 %v1410_v46, %v1359_v9 }
 0x2e3   :  { %v1194_v55 = vadd.f32 %v1178_v11, %v1143_v59  ;;  %v1427_v60 = vadd.f32 %v1411_v42, %v1360_v45  ;;  %v1145_v20 = vmul.f32 %v3575_v32, %v1126_v52  ;;  %v1413_v9 = vmul.f32 %v3784_v47, %v3894_v57 }
 0x2e4   :  { %v1362_v24 = vadd.f32 %v1346_v40, %v1327_v7  ;;  %v1412_v40 = vmul.f32 %v3716_v3, %v3888_v12  ;;  %v1195_v21 = vadd.f32 %v1179_v18, %v1144_v2  ;;  %v1313_v57 = vmul.f32 %v3655_v6, %v3898_v17 }
 0x2e5   :  { %v1223_v41 = vpop.permute.xlu0 %1222  ;;  %v1128_v22 = vpop.permute.xlu1 %1127  ;;  %v1347_v18 = vmul.f32 %v3632_v19, %v3459_v48  ;;  %v1414_v48 = vmul.f32 %v3716_v3, %v3900_v8 }
 0x2e6   :  { %v1245_v30 = vmul.f32 %v3601_v26, %v1223_v41  ;;  %v1428_v52 = vadd.f32 %v1412_v40, %v1361_v10  ;;  %v1429_v59 = vadd.f32 %v1413_v9, %v1362_v24  ;;  %v1415_v9 = vmul.f32 %v3784_v47, %v3906_v38 }
 0x2e9   :  { %v1483_v58 = vpop.permute.xlu0 %1482  ;;  %v1225_v4 = vpop.permute.xlu1 %1224 }
 0x2ea   :  { %v1509_v5 = vmul.f32 %v3728_v53, %v1483_v58  ;;  %v1246_v7 = vmul.f32 %v3646_v25, %v1225_v4  ;;  %v1181_v58 = vmul.f32 %v3622_v36, %v3596_v50  ;;  %v1312_v50 = vmul.f32 %v3616_v27, %v3892_v15 }
 0x2eb   :  { %v1261_v36 = vadd.f32 %v1245_v30, %v1194_v55 }
 0x2ec   :  { %v1525_v54 = vadd.f32 %v1509_v5, %v1426_v13  ;;  %v1262_v45 = vadd.f32 %v1246_v7, %v1195_v21 }
 0x2ed   :  { %v1227_v0 = vpop.permute.xlu0 %1226  ;;  %v1485_v1 = vpop.permute.xlu1 %1484 }
 0x2ee   :  { %v1510_v61 = vmul.f32 %v3791_v37, %v1485_v1  ;;  %v1146_v1 = vmul.f32 %v3608_v31, %v1128_v22  ;;  %v1247_v32 = vmul.f32 %v3601_v26, %v1227_v0  ;;  %v1547_v26 = vmul.f32 %v3818_v29, %v3705_v33  ;;  %v4286_v33 = vld [vmem:[#allocation25_spill] sm:$0xff] }
 0x2ef   :  { %v1329_v10 = vadd.f32 %v1313_v57, %v1262_v45  ;;  %v1348_v13 = vmul.f32 %v3675_v39, %v4286_v33 }
 0x2f0   :  { %v1526_v41 = vadd.f32 %v1510_v61, %v1427_v60  ;;  %v1197_v2 = vadd.f32 %v1181_v58, %v1146_v1 }
 0x2f1   :  { %v1487_v43 = vpop.permute.xlu0 %1486  ;;  %v1229_v49 = vpop.permute.xlu1 %1228 }
 0x2f2   :  { %v1511_v4 = vmul.f32 %v3728_v53, %v1487_v43  ;;  %v1248_v31 = vmul.f32 %v3646_v25, %v1229_v49  ;;  %v1196_v43 = vadd.f32 %v1180_v35, %v1145_v20  ;;  %v1561_v11 = vadd.f32 %v1545_v23, %v1526_v41 }
 0x2f3   :  { %v1328_v25 = vadd.f32 %v1312_v50, %v1261_v36  ;;  %v1315_v23 = vmul.f32 %v3655_v6, %v3902_v14  ;;  %v1364_v20 = vadd.f32 %v1348_v13, %v1329_v10 }
 0x2f4   :  { %v1527_v42 = vadd.f32 %v1511_v4, %v1428_v52  ;;  %v1264_v24 = vadd.f32 %v1248_v31, %v1197_v2  ;;  %v4288_v31 = vld [vmem:[#allocation6_spill] sm:$0xff]  ;;  %v4291_v2 = vld [vmem:[#allocation43_spill] sm:$0xff] }
 0x2f5   :  { %v1585_v28 = vpop.permute.xlu0 %1584  ;;  %v1489_v63 = vpop.permute.xlu1 %1488  ;;  %v1363_v60 = vadd.f32 %v1347_v18, %v1328_v25 }
 0x2f6   :  { %v1512_v12 = vmul.f32 %v3791_v37, %v1489_v63  ;;  %v1611_v22 = vmul.f32 %v3830_v16, %v1585_v28  ;;  %v1560_v63 = vadd.f32 %v1544_v51, %v1525_v54  ;;  %v1263_v28 = vadd.f32 %v1247_v32, %v1196_v43 }
 0x2f7   :  { %v1314_v51 = vmul.f32 %v3616_v27, %v3896_v56  ;;  %v1562_v7 = vadd.f32 %v1546_v34, %v1527_v42  ;;  %v1331_v1 = vadd.f32 %v1315_v23, %v1264_v24  ;;  %v1349_v34 = vmul.f32 %v3632_v19, %v3471_v44  ;;  %v4293_v24 = vld [vmem:[#allocation44_spill] sm:$0xff] }
 0x2f8   :  { %v1528_v15 = vadd.f32 %v1512_v12, %v1429_v59  ;;  %v1627_v0 = vadd.f32 %v1611_v22, %v1560_v63  ;;  %v4287_v12 = vld [vmem:[#allocation40_spill] sm:$0xff]  ;;  %v1430_v36 = vadd.f32 %v1414_v48, %v1363_v60  ;;  %v1431_v32 = vadd.f32 %v1415_v9, %v1364_v20  ;;  %v4289_v59 = vld [vmem:[#allocation7_spill] sm:$0xff] }
 0x2f9   :  { %v1589_v46 = vpop.permute.xlu0 %1588  ;;  %v1587_v5 = vpop.permute.xlu1 %1586  ;;  %v1330_v21 = vadd.f32 %v1314_v51, %v1263_v28  ;;  %v1350_v50 = vmul.f32 %v3675_v39, %v4287_v12  ;;  %v1416_v22 = vmul.f32 %v3716_v3, %v4288_v31  ;;  %v1417_v38 = vmul.f32 %v3784_v47, %v4289_v59  ;;  %v4290_v39 = vld [vmem:[#allocation35_spill] sm:$0xff] }
 0x2fa   :  { %v1612_v61 = vmul.f32 %v3845_v62, %v1587_v5  ;;  %v1613_v49 = vmul.f32 %v3830_v16, %v1589_v46  ;;  %v1563_v40 = vadd.f32 %v1547_v26, %v1528_v15  ;;  %v1548_v63 = vmul.f32 %v4291_v2, %v4290_v39  ;;  %v4292_v5 = vld [vmem:[#allocation45_spill] sm:$0xff] }
 0x2fb   :  { %v1365_v45 = vadd.f32 %v1349_v34, %v1330_v21  ;;  %v1366_v52 = vadd.f32 %v1350_v50, %v1331_v1  ;;  %v1549_v42 = vmul.f32 %v3818_v29, %v4292_v5 }
 0x2fc   :  { %v1628_v17 = vadd.f32 %v1612_v61, %v1561_v11  ;;  %v1629_v27 = vadd.f32 %v1613_v49, %v1562_v7 }
 0x2fd   :  { %v1491_v35 = vpop.permute.xlu0 %1490  ;;  %v1591_v30 = vpop.permute.xlu1 %1590  ;;  %v1432_v15 = vadd.f32 %v1416_v22, %v1365_v45  ;;  %v1433_v3 = vadd.f32 %v1417_v38, %v1366_v52 }
 0x2fe   :  { %v1614_v55 = vmul.f32 %v3845_v62, %v1591_v30  ;;  %v1639_v58 = vpack.c.bf16 %v1628_v17, %v1627_v0  ;;  %v1513_v14 = vmul.f32 %v3728_v53, %v1491_v35  ;;  %v4294_v0 = vld [vmem:[#allocation46_spill] sm:$0xff] }
 0x2ff   :  { %v1551_v49 = vmul.f32 %v3818_v29, %v4294_v0 }
 0x300   :  { %v1630_v56 = vadd.f32 %v1614_v55, %v1563_v40  ;;  %1985 = vmatprep.mubr.bf16.mxu1 %v1639_v58  ;;  %v1529_v19 = vadd.f32 %v1513_v14, %v1430_v36  ;;  %v1888_v58 = vld [vmem:[%s4076_s7] ss:$0 sm:$0xff] }
 0x301   :  { %v1495_v6 = vpop.permute.xlu0 %1494  ;;  %v1493_v54 = vpop.permute.xlu1 %1492 }
 0x302   :  { %v1514_v41 = vmul.f32 %v3791_v37, %v1493_v54  ;;  %v1640_v4 = vpack.c.bf16 %v1630_v56, %v1629_v27  ;;  %v1515_v46 = vmul.f32 %v3728_v53, %v1495_v6  ;;  %v1564_v61 = vadd.f32 %v1548_v63, %v1529_v19 }
 0x304   :  { %1986 = vmatmul.mubr.bf16.gmra.mxu1 %v1640_v4  ;;  %v1530_v57 = vadd.f32 %v1514_v41, %v1431_v32  ;;  %v1531_v10 = vadd.f32 %v1515_v46, %v1432_v15 }
 0x305   :  { %v1593_v8 = vpop.permute.xlu0 %1592  ;;  %v1497_v44 = vpop.permute.xlu1 %1496 }
 0x306   :  { %v1516_v43 = vmul.f32 %v3791_v37, %v1497_v44  ;;  %v1615_v11 = vmul.f32 %v3830_v16, %v1593_v8  ;;  %v1565_v28 = vadd.f32 %v1549_v42, %v1530_v57  ;;  %v1550_v37 = vmul.f32 %v4291_v2, %v4293_v24 }
 0x308   :  { %v1532_v47 = vadd.f32 %v1516_v43, %v1433_v3  ;;  %v1631_v17 = vadd.f32 %v1615_v11, %v1564_v61  ;;  %v1566_v18 = vadd.f32 %v1550_v37, %v1531_v10 }
 0x309   :  { %v1597_v26 = vpop.permute.xlu0 %1596  ;;  %v1595_v25 = vpop.permute.xlu1 %1594 }
 0x30a   :  { %v1616_v53 = vmul.f32 %v3845_v62, %v1595_v25  ;;  %v1617_v35 = vmul.f32 %v3830_v16, %v1597_v26  ;;  %v1567_v30 = vadd.f32 %v1551_v49, %v1532_v47 }
 0x30c   :  { %v1632_v51 = vadd.f32 %v1616_v53, %v1565_v28  ;;  %v1633_v7 = vadd.f32 %v1617_v35, %v1566_v18 }
 0x30d   :  { %v1599_v23 = vpop.permute.xlu1 %1598 }
 0x30e   :  { %v1618_v33 = vmul.f32 %v3845_v62, %v1599_v23  ;;  %v1641_v13 = vpack.c.bf16 %v1632_v51, %v1631_v17 }
 0x310   :  { %v1634_v40 = vadd.f32 %v1618_v33, %v1567_v30  ;;  %1989 = vmatprep.mubr.bf16.mxu1 %v1641_v13 }
 0x312   :  { %v1642_v55 = vpack.c.bf16 %v1634_v40, %v1633_v7 }
 0x314   :  { %1990 = vmatmul.mubr.bf16.gmra.mxu1 %v1642_v55 }
 0x364   :  { %v1979_v29 = vpop.f32.mrf.mxu1 }
 0x365   :  { %v1757_v60 = vadd.f32 %v1979_v29, %v1888_v58 }
 0x366   :  { %v1748_v20 = vpop.f32.mrf.mxu1 }
 0x367   :  { %1813 = vst [vmem:[%s4077_s8 + $0x10] sm:$0xff] %v1757_v60  ;;  %v1749_v16 = vadd.f32 %v1888_v58, %v1748_v20 }
 0x368   :  { %v1980_v21 = vpop.f32.mrf.mxu1 }
 0x369   :  { %1811 = vst [vmem:[%s4077_s8] sm:$0xff] %v1749_v16  ;;  %v1760_v62 = vadd.f32 %v1980_v21, %v1888_v58 }
 0x36a   :  { %v1751_v1 = vpop.f32.mrf.mxu1 }
 0x36b   :  { %1814 = vst [vmem:[%s4077_s8 + $0x18] sm:$0xff] %v1760_v62  ;;  %v1752_v27 = vadd.f32 %v1888_v58, %v1751_v1 }
 0x36d   :  { %1812 = vst [vmem:[%s4077_s8 + $0x8] sm:$0xff] %v1752_v27 }
 0x374   :  { %v1983_v56 = vpop.f32.mrf.mxu1 }
 0x375   :  { %v1773_v6 = vadd.f32 %v1983_v56, %v1888_v58 }
 0x376   :  { %v1764_v48 = vpop.f32.mrf.mxu1 }
 0x377   :  { %1817 = vst [vmem:[%s4077_s8 + $0x30] sm:$0xff] %v1773_v6  ;;  %v1765_v14 = vadd.f32 %v1888_v58, %v1764_v48 }
 0x378   :  { %v1984_v34 = vpop.f32.mrf.mxu1 }
 0x379   :  { %1815 = vst [vmem:[%s4077_s8 + $0x20] sm:$0xff] %v1765_v14  ;;  %v1776_v54 = vadd.f32 %v1984_v34, %v1888_v58 }
 0x37a   :  { %v1767_v9 = vpop.f32.mrf.mxu1 }
 0x37b   :  { %1818 = vst [vmem:[%s4077_s8 + $0x38] sm:$0xff] %v1776_v54  ;;  %v1768_v41 = vadd.f32 %v1888_v58, %v1767_v9 }
 0x37d   :  { %1816 = vst [vmem:[%s4077_s8 + $0x28] sm:$0xff] %v1768_v41 }
 0x3c4   :  { %v1987_v4 = vpop.f32.mrf.mxu1 }
 0x3c5   :  { %v1789_v12 = vadd.f32 %v1987_v4, %v1888_v58 }
 0x3c6   :  { %v1780_v50 = vpop.f32.mrf.mxu1 }
 0x3c7   :  { %1821 = vst [vmem:[%s4077_s8 + $0x50] sm:$0xff] %v1789_v12  ;;  %v1781_v36 = vadd.f32 %v1888_v58, %v1780_v50 }
 0x3c8   :  { %v1988_v45 = vpop.f32.mrf.mxu1 }
 0x3c9   :  { %1819 = vst [vmem:[%s4077_s8 + $0x40] sm:$0xff] %v1781_v36  ;;  %v1792_v32 = vadd.f32 %v1988_v45, %v1888_v58 }
 0x3ca   :  { %v1783_v8 = vpop.f32.mrf.mxu1 }
 0x3cb   :  { %1822 = vst [vmem:[%s4077_s8 + $0x58] sm:$0xff] %v1792_v32  ;;  %v1784_v52 = vadd.f32 %v1888_v58, %v1783_v8 }
 0x3cd   :  { %1820 = vst [vmem:[%s4077_s8 + $0x48] sm:$0xff] %v1784_v52 }
 0x3d4   :  { %v1991_v31 = vpop.f32.mrf.mxu1 }
 0x3d5   :  { %v1805_v22 = vadd.f32 %v1991_v31, %v1888_v58 }
 0x3d6   :  { %v1796_v19 = vpop.f32.mrf.mxu1 }
 0x3d7   :  { %1825 = vst [vmem:[%s4077_s8 + $0x70] sm:$0xff] %v1805_v22  ;;  %v1797_v44 = vadd.f32 %v1888_v58, %v1796_v19 }
 0x3d8   :  { %v1992_v59 = vpop.f32.mrf.mxu1 }
 0x3d9   :  { %1823 = vst [vmem:[%s4077_s8 + $0x60] sm:$0xff] %v1797_v44  ;;  %v1808_v38 = vadd.f32 %v1992_v59, %v1888_v58 }
 0x3da   :  { %v1799_v46 = vpop.f32.mrf.mxu1 }
 0x3db   :  { %1826 = vst [vmem:[%s4077_s8 + $0x78] sm:$0xff] %v1808_v38  ;;  %v1800_v57 = vadd.f32 %v1888_v58, %v1799_v46 }
 0x3dd   :  { %1824 = vst [vmem:[%s4077_s8 + $0x68] sm:$0xff] %v1800_v57 }
 0x3de   :  { %1831 = vsyncpa [#allocation3], 1 }

</bundles_post_ra>
